<compile_context>
chip_gen: v6e
topology: v6e:2x2x1
jax: 0.10.0
libtpu: 0.0.40
codegen_flags: <defaults>
</compile_context>

<pallas_src>
import functools
import math

import jax
import jax.numpy as jnp
from jax.experimental import pallas as pl
from jax.experimental.pallas import tpu as pltpu


def _mha_kernel(q_ref, k_ref, v_ref,
                wq_ref, bq_ref, wk_ref, bk_ref, wv_ref, bv_ref,
                wo_ref, bo_ref,
                out_ref, attn_ref,
                acc_ref,
                *, scale_inv):
    h = pl.program_id(1)
    n_h = pl.num_programs(1)
    Bt, S, D = q_ref.shape
    d_k = wq_ref.shape[-1]

    @pl.when(h == 0)
    def _init():
        acc_ref[...] = jnp.zeros_like(acc_ref)

    def proj(x_ref, w_ref, b_ref):
        # Per-head nn.Linear slice: y = x @ W^T[:, h*d_k:(h+1)*d_k] + b_h
        # bf16 operands on the MXU, f32 accumulation; bias add in f32.
        x2 = x_ref[...].reshape(Bt * S, D).astype(jnp.bfloat16)
        y = jnp.dot(x2, w_ref[0], preferred_element_type=jnp.float32)
        y = y + b_ref[0]                               # (Bt*S, d_k) + (1, d_k)
        return y.reshape(Bt, S, d_k)                   # f32

    qh = proj(q_ref, wq_ref, bq_ref)
    kh = proj(k_ref, wk_ref, bk_ref)
    vh = proj(v_ref, wv_ref, bv_ref)

    # scores_h = Q_h K_h^T / sqrt(d_k)  (single batch dim, contract last dims)
    scores = jnp.einsum('bqd,bkd->bqk',
                        qh.astype(jnp.bfloat16), kh.astype(jnp.bfloat16),
                        preferred_element_type=jnp.float32) * scale_inv

    # Numerically stable softmax in f32; reciprocal on the EUP slot.
    m = jnp.max(scores, axis=-1, keepdims=True)
    e = jnp.exp(scores - m)
    denom = jnp.sum(e, axis=-1, keepdims=True)
    w = e * pl.reciprocal(denom, approx=True)

    attn_ref[...] = w.reshape(Bt, 1, S, S).astype(attn_ref.dtype)

    # ctx_h = w @ V_h, then this head's contribution to the output Linear:
    # out += ctx_h @ Wo^T[h*d_k:(h+1)*d_k, :]
    ctx = jnp.einsum('bqk,bkd->bqd',
                     w.astype(jnp.bfloat16), vh.astype(jnp.bfloat16),
                     preferred_element_type=jnp.float32)
    part = jnp.dot(ctx.reshape(Bt * S, d_k).astype(jnp.bfloat16), wo_ref[0],
                   preferred_element_type=jnp.float32)
    acc_ref[...] += part.reshape(Bt, S, D)

    @pl.when(h == n_h - 1)
    def _finish():
        out_ref[...] = (acc_ref[...] + bo_ref[...]).astype(out_ref.dtype)


def multi_head_attention(query, key, value, params, *, n_heads,
                         batch_block=None):
    """Pallas TPU implementation of MultiHeadAttention.forward
    (mask=None, eval-mode dropout). Returns (output, attention_weights)."""
    B, S, D = query.shape
    assert key.shape == (B, S, D) and value.shape == (B, S, D)
    assert D % n_heads == 0, "d_model must be divisible by n_heads"
    H = n_heads
    d_k = D // H

    # Keep Bt small enough for v7x VMEM and B//Bt >= 4 so the grid pipelines
    # and both v7x TensorCores get work on the parallel (batch) axis.
    if batch_block is None:
        batch_block = 1
        for cand in (4, 2, 1):
            if B % cand == 0 and (B // cand) >= min(4, B):
                batch_block = cand
                break
    Bt = batch_block
    assert B % Bt == 0

    f32, bf16 = jnp.float32, jnp.bfloat16

    # Hoist the nn.Linear transposes + per-head splits out of the kernel.
    def head_cols(w):          # (D_out, D_in) -> W^T split per head: (H, D, d_k)
        return jnp.transpose(w).reshape(D, H, d_k).transpose(1, 0, 2).astype(bf16)

    wq_h = head_cols(params['wq'])
    wk_h = head_cols(params['wk'])
    wv_h = head_cols(params['wv'])
    wo_h = jnp.transpose(params['wo']).reshape(H, d_k, D).astype(bf16)  # (H, d_k, D)
    bq_h = params['bq'].reshape(H, 1, d_k).astype(f32)
    bk_h = params['bk'].reshape(H, 1, d_k).astype(f32)
    bv_h = params['bv'].reshape(H, 1, d_k).astype(f32)
    bo = params['bo'].reshape(1, D).astype(f32)

    x_spec = pl.BlockSpec((Bt, S, D), lambda b, h: (b, 0, 0))
    w_in_spec = pl.BlockSpec((1, D, d_k), lambda b, h: (h, 0, 0))
    b_in_spec = pl.BlockSpec((1, 1, d_k), lambda b, h: (h, 0, 0))
    wo_spec = pl.BlockSpec((1, d_k, D), lambda b, h: (h, 0, 0))
    bo_spec = pl.BlockSpec((1, D), lambda b, h: (0, 0))

    grid_spec = pltpu.PrefetchScalarGridSpec(
        num_scalar_prefetch=0,
        grid=(B // Bt, H),                       # head axis innermost
        in_specs=[x_spec, x_spec, x_spec,
                  w_in_spec, b_in_spec, w_in_spec, b_in_spec,
                  w_in_spec, b_in_spec,
                  wo_spec, bo_spec],
        out_specs=[
            pl.BlockSpec((Bt, S, D), lambda b, h: (b, 0, 0)),       # resident over h
            pl.BlockSpec((Bt, 1, S, S), lambda b, h: (b, h, 0, 0)),
        ],
        scratch_shapes=[pltpu.VMEM((Bt, S, D), jnp.float32)],        # output acc
    )

    # vmem budget from the actual block sizes (double-buffered I/O + scratch
    # + f32 working set), clamped to v7x's 64 MiB physical VMEM.
    in_bytes = query.dtype.itemsize
    qkv_blk = Bt * S * D * in_bytes
    attn_blk = Bt * S * S * in_bytes
    out_blk = Bt * S * D * in_bytes
    wts_blk = (4 * D * d_k) * 2 + (3 * d_k + D) * 4
    acc_blk = Bt * S * D * 4
    working = (3 * Bt * S * d_k + 3 * Bt * S * S + Bt * S * D) * 4
    vmem_bytes = 2 * (3 * qkv_blk + attn_blk + out_blk + wts_blk) \
        + acc_blk + 2 * working
    vmem_bytes = int(min(max(vmem_bytes, 16 << 20), 64 << 20))

    kernel = functools.partial(_mha_kernel, scale_inv=1.0 / math.sqrt(d_k))
    out_shapes = (
        jax.ShapeDtypeStruct((B, S, D), query.dtype),
        jax.ShapeDtypeStruct((B, H, S, S), query.dtype),
    )

    return pl.pallas_call(
        kernel,
        out_shape=out_shapes,
        grid_spec=grid_spec,
        compiler_params=pltpu.CompilerParams(
            dimension_semantics=("parallel", "arbitrary"),
            vmem_limit_bytes=vmem_bytes),
    )(query, key, value,
      wq_h, bq_h, wk_h, bk_h, wv_h, bv_h, wo_h, bo)


if __name__ == "__main__":
    # Small but lane-friendly demo: d_model = 128, seq = 128 (lane-dense attn
    # writeback), batch = 8 so grid = (4 batch tiles x 4 heads) = 16 steps.
    B, S, D, H = 8, 128, 128, 4
    d_k = D // H

    root = jax.random.PRNGKey(0)
    kq, kk, kv, kw = jax.random.split(root, 4)
    query = jax.random.normal(kq, (B, S, D), dtype=jnp.float32)
    key = jax.random.normal(kk, (B, S, D), dtype=jnp.float32)
    value = jax.random.normal(kv, (B, S, D), dtype=jnp.float32)

    wkeys = jax.random.split(kw, 8)
    init = 1.0 / math.sqrt(D)
    params = {
        'wq': jax.random.normal(wkeys[0], (D, D), jnp.float32) * init,
        'bq': jax.random.normal(wkeys[1], (D,), jnp.float32) * init,
        'wk': jax.random.normal(wkeys[2], (D, D), jnp.float32) * init,
        'bk': jax.random.normal(wkeys[3], (D,), jnp.float32) * init,
        'wv': jax.random.normal(wkeys[4], (D, D), jnp.float32) * init,
        'bv': jax.random.normal(wkeys[5], (D,), jnp.float32) * init,
        'wo': jax.random.normal(wkeys[6], (D, D), jnp.float32) * init,
        'bo': jax.random.normal(wkeys[7], (D,), jnp.float32) * init,
    }

    out, attn = multi_head_attention(query, key, value, params, n_heads=H)
    jax.block_until_ready((out, attn))
    assert out.shape == (B, S, D) and attn.shape == (B, H, S, S)

    # Pure-JAX f32 reference of the PyTorch forward (eval mode, mask=None).
    def lin(x, w, b):
        return jnp.einsum('bsd,od->bso', x, w) + b

    Q = lin(query, params['wq'], params['bq']).reshape(B, S, H, d_k).transpose(0, 2, 1, 3)
    K = lin(key, params['wk'], params['bk']).reshape(B, S, H, d_k).transpose(0, 2, 1, 3)
    V = lin(value, params['wv'], params['bv']).reshape(B, S, H, d_k).transpose(0, 2, 1, 3)
    scores_want = jnp.einsum('bhqd,bhkd->bhqk', Q, K) / math.sqrt(d_k)
    attn_want = jax.nn.softmax(scores_want, axis=-1)
    ctx_want = jnp.einsum('bhqk,bhkd->bhqd', attn_want, V).transpose(0, 2, 1, 3).reshape(B, S, D)
    out_want = jnp.einsum('bsd,od->bso', ctx_want, params['wo']) + params['bo']

    # Loosened tolerances: kernel feeds the MXU bf16 (f32 accumulation) and
    # uses an approx reciprocal in the softmax; reference is pure f32.
    attn_err = float(jnp.max(jnp.abs(attn - attn_want)))
    out_err = float(jnp.max(jnp.abs(out - out_want)))
    assert attn_err < 4e-2, f"attention weights mismatch: {attn_err}"
    assert out_err < 6e-2, f"output mismatch: {out_err}"

    print("KERNEL_OK")
</pallas_src>

<mosaic_0001>
module attributes {stable_mosaic.version = 11 : i64} {
  func.func @_mha_kernel(%arg0: i32, %arg1: i32, %arg2: memref<2x128x128xf32, #tpu.memory_space<vmem>>, %arg3: memref<2x128x128xf32, #tpu.memory_space<vmem>>, %arg4: memref<2x128x128xf32, #tpu.memory_space<vmem>>, %arg5: memref<1x128x32xbf16, #tpu.memory_space<vmem>>, %arg6: memref<1x1x32xf32, #tpu.memory_space<vmem>>, %arg7: memref<1x128x32xbf16, #tpu.memory_space<vmem>>, %arg8: memref<1x1x32xf32, #tpu.memory_space<vmem>>, %arg9: memref<1x128x32xbf16, #tpu.memory_space<vmem>>, %arg10: memref<1x1x32xf32, #tpu.memory_space<vmem>>, %arg11: memref<1x32x128xbf16, #tpu.memory_space<vmem>>, %arg12: memref<1x128xf32, #tpu.memory_space<vmem>>, %arg13: memref<2x128x128xf32, #tpu.memory_space<vmem>>, %arg14: memref<2x1x128x128xf32, #tpu.memory_space<vmem>>, %arg15: memref<2x128x128xf32, #tpu.memory_space<vmem>>) attributes {dimension_semantics = [#tpu.dimension_semantics<parallel>, #tpu.dimension_semantics<arbitrary>], iteration_bounds = array<i64: 4, 4>, scalar_prefetch = 0 : i64, scratch_operands = 1 : i64, tpu.core_type = #tpu.core_type<tc>, window_params = [{transform_indices = @transform_0, window_bounds = array<i64: 2, 128, 128>}, {transform_indices = @transform_1, window_bounds = array<i64: 2, 128, 128>}, {transform_indices = @transform_2, window_bounds = array<i64: 2, 128, 128>}, {transform_indices = @transform_3, window_bounds = array<i64: 1, 128, 32>}, {transform_indices = @transform_4, window_bounds = array<i64: 1, 1, 32>}, {transform_indices = @transform_5, window_bounds = array<i64: 1, 128, 32>}, {transform_indices = @transform_6, window_bounds = array<i64: 1, 1, 32>}, {transform_indices = @transform_7, window_bounds = array<i64: 1, 128, 32>}, {transform_indices = @transform_8, window_bounds = array<i64: 1, 1, 32>}, {transform_indices = @transform_9, window_bounds = array<i64: 1, 32, 128>}, {pipeline_mode = #tpu.pipeline_mode<synchronous>, transform_indices = @transform_10, window_bounds = array<i64: 1, 128>}, {transform_indices = @transform_11, window_bounds = array<i64: 2, 128, 128>}, {transform_indices = @transform_12, window_bounds = array<i64: 2, 1, 128, 128>}]} {
    %c0_i32 = arith.constant 0 : i32
    %0 = arith.cmpi eq, %arg1, %c0_i32 : i32
    %1 = arith.extui %0 : i1 to i32
    %c0_i32_0 = arith.constant 0 : i32
    %2 = arith.cmpi ne, %1, %c0_i32_0 : i32
    scf.if %2 {
      %cst_49 = arith.constant 0.000000e+00 : f32
      %68 = vector.broadcast %cst_49 : f32 to vector<2x128x128xf32>
      %c0_50 = arith.constant 0 : index
      %c0_51 = arith.constant 0 : index
      %c0_52 = arith.constant 0 : index
      %69 = vector.load %arg15[%c0_50, %c0_51, %c0_52] : memref<2x128x128xf32, #tpu.memory_space<vmem>>, vector<2x128x128xf32>
      tpu.vector_store %arg15[%c0_50, %c0_51, %c0_52], %68 {strides = array<i32>} : memref<2x128x128xf32, #tpu.memory_space<vmem>>, vector<2x128x128xf32>,
    } else {
    }
    %c0 = arith.constant 0 : index
    %c0_1 = arith.constant 0 : index
    %c0_2 = arith.constant 0 : index
    %3 = vector.load %arg2[%c0, %c0_1, %c0_2] : memref<2x128x128xf32, #tpu.memory_space<vmem>>, vector<2x128x128xf32>
    %4 = vector.shape_cast %3 : vector<2x128x128xf32> to vector<256x128xf32>
    %5 = arith.truncf %4 : vector<256x128xf32> to vector<256x128xbf16>
    %c0_3 = arith.constant 0 : index
    %c0_4 = arith.constant 0 : index
    %c0_5 = arith.constant 0 : index
    %6 = vector.load %arg5[%c0_3, %c0_4, %c0_5] : memref<1x128x32xbf16, #tpu.memory_space<vmem>>, vector<1x128x32xbf16>
    %7 = vector.shape_cast %6 : vector<1x128x32xbf16> to vector<128x32xbf16>
    %cst = arith.constant dense<0.000000e+00> : vector<256x32xf32>
    %8 = tpu.matmul %5, %7, %cst {dimension_numbers = #tpu.dot_dimension_numbers<[1], [0], [0], [1], [0, 0, 1, 1], [], []>} : vector<256x128xbf16>, vector<128x32xbf16>, vector<256x32xf32> -> vector<256x32xf32>
    %c0_6 = arith.constant 0 : index
    %c0_7 = arith.constant 0 : index
    %c0_8 = arith.constant 0 : index
    %9 = vector.load %arg6[%c0_6, %c0_7, %c0_8] : memref<1x1x32xf32, #tpu.memory_space<vmem>>, vector<1x1x32xf32>
    %10 = vector.shape_cast %9 : vector<1x1x32xf32> to vector<1x32xf32>
    %11 = vector.broadcast %10 : vector<1x32xf32> to vector<256x32xf32>
    %12 = arith.addf %8, %11 : vector<256x32xf32>
    %13 = vector.shape_cast %12 : vector<256x32xf32> to vector<2x128x32xf32>
    %c0_9 = arith.constant 0 : index
    %c0_10 = arith.constant 0 : index
    %c0_11 = arith.constant 0 : index
    %14 = vector.load %arg3[%c0_9, %c0_10, %c0_11] : memref<2x128x128xf32, #tpu.memory_space<vmem>>, vector<2x128x128xf32>
    %15 = vector.shape_cast %14 : vector<2x128x128xf32> to vector<256x128xf32>
    %16 = arith.truncf %15 : vector<256x128xf32> to vector<256x128xbf16>
    %c0_12 = arith.constant 0 : index
    %c0_13 = arith.constant 0 : index
    %c0_14 = arith.constant 0 : index
    %17 = vector.load %arg7[%c0_12, %c0_13, %c0_14] : memref<1x128x32xbf16, #tpu.memory_space<vmem>>, vector<1x128x32xbf16>
    %18 = vector.shape_cast %17 : vector<1x128x32xbf16> to vector<128x32xbf16>
    %cst_15 = arith.constant dense<0.000000e+00> : vector<256x32xf32>
    %19 = tpu.matmul %16, %18, %cst_15 {dimension_numbers = #tpu.dot_dimension_numbers<[1], [0], [0], [1], [0, 0, 1, 1], [], []>} : vector<256x128xbf16>, vector<128x32xbf16>, vector<256x32xf32> -> vector<256x32xf32>
    %c0_16 = arith.constant 0 : index
    %c0_17 = arith.constant 0 : index
    %c0_18 = arith.constant 0 : index
    %20 = vector.load %arg8[%c0_16, %c0_17, %c0_18] : memref<1x1x32xf32, #tpu.memory_space<vmem>>, vector<1x1x32xf32>
    %21 = vector.shape_cast %20 : vector<1x1x32xf32> to vector<1x32xf32>
    %22 = vector.broadcast %21 : vector<1x32xf32> to vector<256x32xf32>
    %23 = arith.addf %19, %22 : vector<256x32xf32>
    %24 = vector.shape_cast %23 : vector<256x32xf32> to vector<2x128x32xf32>
    %c0_19 = arith.constant 0 : index
    %c0_20 = arith.constant 0 : index
    %c0_21 = arith.constant 0 : index
    %25 = vector.load %arg4[%c0_19, %c0_20, %c0_21] : memref<2x128x128xf32, #tpu.memory_space<vmem>>, vector<2x128x128xf32>
    %26 = vector.shape_cast %25 : vector<2x128x128xf32> to vector<256x128xf32>
    %27 = arith.truncf %26 : vector<256x128xf32> to vector<256x128xbf16>
    %c0_22 = arith.constant 0 : index
    %c0_23 = arith.constant 0 : index
    %c0_24 = arith.constant 0 : index
    %28 = vector.load %arg9[%c0_22, %c0_23, %c0_24] : memref<1x128x32xbf16, #tpu.memory_space<vmem>>, vector<1x128x32xbf16>
    %29 = vector.shape_cast %28 : vector<1x128x32xbf16> to vector<128x32xbf16>
    %cst_25 = arith.constant dense<0.000000e+00> : vector<256x32xf32>
    %30 = tpu.matmul %27, %29, %cst_25 {dimension_numbers = #tpu.dot_dimension_numbers<[1], [0], [0], [1], [0, 0, 1, 1], [], []>} : vector<256x128xbf16>, vector<128x32xbf16>, vector<256x32xf32> -> vector<256x32xf32>
    %c0_26 = arith.constant 0 : index
    %c0_27 = arith.constant 0 : index
    %c0_28 = arith.constant 0 : index
    %31 = vector.load %arg10[%c0_26, %c0_27, %c0_28] : memref<1x1x32xf32, #tpu.memory_space<vmem>>, vector<1x1x32xf32>
    %32 = vector.shape_cast %31 : vector<1x1x32xf32> to vector<1x32xf32>
    %33 = vector.broadcast %32 : vector<1x32xf32> to vector<256x32xf32>
    %34 = arith.addf %30, %33 : vector<256x32xf32>
    %35 = vector.shape_cast %34 : vector<256x32xf32> to vector<2x128x32xf32>
    %36 = arith.truncf %13 : vector<2x128x32xf32> to vector<2x128x32xbf16>
    %37 = arith.truncf %24 : vector<2x128x32xf32> to vector<2x128x32xbf16>
    "tpu.trace_start"() <{level = 10 : i32, message = "bqd,bkd->bqk"}> : () -> ()
    %cst_29 = arith.constant dense<0.000000e+00> : vector<2x128x128xf32>
    %38 = tpu.matmul %36, %37, %cst_29 {dimension_numbers = #tpu.dot_dimension_numbers<[2], [2], [1], [1], [0, 0, 0, 1, 1, 1], [0], [0]>} : vector<2x128x32xbf16>, vector<2x128x32xbf16>, vector<2x128x128xf32> -> vector<2x128x128xf32>
    "tpu.trace_stop"() : () -> ()
    %cst_30 = arith.constant 0.176776692 : f32
    %39 = vector.broadcast %cst_30 : f32 to vector<2x128x128xf32>
    %40 = arith.mulf %38, %39 : vector<2x128x128xf32>
    %cst_31 = arith.constant dense<0xFF800000> : vector<2x128xf32>
    %41 = vector.multi_reduction <maximumf>, %40, %cst_31 [2] : vector<2x128x128xf32> to vector<2x128xf32>
    %42 = vector.shape_cast %41 : vector<2x128xf32> to vector<2x128x1xf32>
    %43 = vector.broadcast %42 : vector<2x128x1xf32> to vector<2x128x128xf32>
    %44 = arith.subf %40, %43 : vector<2x128x128xf32>
    %45 = math.exp %44 : vector<2x128x128xf32>
    %cst_32 = arith.constant dense<0.000000e+00> : vector<2x128xf32>
    %46 = vector.multi_reduction <add>, %45, %cst_32 [2] : vector<2x128x128xf32> to vector<2x128xf32>
    %47 = vector.shape_cast %46 : vector<2x128xf32> to vector<2x128x1xf32>
    %48 = tpu.reciprocal %47 {approx = true} : vector<2x128x1xf32> -> vector<2x128x1xf32>
    %49 = vector.broadcast %48 : vector<2x128x1xf32> to vector<2x128x128xf32>
    %50 = arith.mulf %45, %49 : vector<2x128x128xf32>
    %51 = vector.shape_cast %50 : vector<2x128x128xf32> to vector<2x1x128x128xf32>
    %c0_33 = arith.constant 0 : index
    %c0_34 = arith.constant 0 : index
    %c0_35 = arith.constant 0 : index
    %c0_36 = arith.constant 0 : index
    %52 = vector.load %arg14[%c0_33, %c0_34, %c0_35, %c0_36] : memref<2x1x128x128xf32, #tpu.memory_space<vmem>>, vector<2x1x128x128xf32>
    tpu.vector_store %arg14[%c0_33, %c0_34, %c0_35, %c0_36], %51 {strides = array<i32>} : memref<2x1x128x128xf32, #tpu.memory_space<vmem>>, vector<2x1x128x128xf32>,
    %53 = arith.truncf %50 : vector<2x128x128xf32> to vector<2x128x128xbf16>
    %54 = arith.truncf %35 : vector<2x128x32xf32> to vector<2x128x32xbf16>
    "tpu.trace_start"() <{level = 10 : i32, message = "bqk,bkd->bqd"}> : () -> ()
    %cst_37 = arith.constant dense<0.000000e+00> : vector<2x128x32xf32>
    %55 = tpu.matmul %53, %54, %cst_37 {dimension_numbers = #tpu.dot_dimension_numbers<[2], [1], [1], [2], [0, 0, 0, 1, 1, 2], [0], [0]>} : vector<2x128x128xbf16>, vector<2x128x32xbf16>, vector<2x128x32xf32> -> vector<2x128x32xf32>
    "tpu.trace_stop"() : () -> ()
    %56 = vector.shape_cast %55 : vector<2x128x32xf32> to vector<256x32xf32>
    %57 = arith.truncf %56 : vector<256x32xf32> to vector<256x32xbf16>
    %c0_38 = arith.constant 0 : index
    %c0_39 = arith.constant 0 : index
    %c0_40 = arith.constant 0 : index
    %58 = vector.load %arg11[%c0_38, %c0_39, %c0_40] : memref<1x32x128xbf16, #tpu.memory_space<vmem>>, vector<1x32x128xbf16>
    %59 = vector.shape_cast %58 : vector<1x32x128xbf16> to vector<32x128xbf16>
    %cst_41 = arith.constant dense<0.000000e+00> : vector<256x128xf32>
    %60 = tpu.matmul %57, %59, %cst_41 {dimension_numbers = #tpu.dot_dimension_numbers<[1], [0], [0], [1], [0, 0, 1, 1], [], []>} : vector<256x32xbf16>, vector<32x128xbf16>, vector<256x128xf32> -> vector<256x128xf32>
    %c0_42 = arith.constant 0 : index
    %c0_43 = arith.constant 0 : index
    %c0_44 = arith.constant 0 : index
    %61 = vector.load %arg15[%c0_42, %c0_43, %c0_44] : memref<2x128x128xf32, #tpu.memory_space<vmem>>, vector<2x128x128xf32>
    %62 = vector.shape_cast %60 : vector<256x128xf32> to vector<2x128x128xf32>
    %63 = arith.addf %61, %62 : vector<2x128x128xf32>
    %c0_45 = arith.constant 0 : index
    %c0_46 = arith.constant 0 : index
    %c0_47 = arith.constant 0 : index
    %64 = vector.load %arg15[%c0_45, %c0_46, %c0_47] : memref<2x128x128xf32, #tpu.memory_space<vmem>>, vector<2x128x128xf32>
    tpu.vector_store %arg15[%c0_45, %c0_46, %c0_47], %63 {strides = array<i32>} : memref<2x128x128xf32, #tpu.memory_space<vmem>>, vector<2x128x128xf32>,
    %c3_i32 = arith.constant 3 : i32
    %65 = arith.cmpi eq, %arg1, %c3_i32 : i32
    %66 = arith.extui %65 : i1 to i32
    %c0_i32_48 = arith.constant 0 : i32
    %67 = arith.cmpi ne, %66, %c0_i32_48 : i32
    scf.if %67 {
      %c0_49 = arith.constant 0 : index
      %c0_50 = arith.constant 0 : index
      %c0_51 = arith.constant 0 : index
      %68 = vector.load %arg15[%c0_49, %c0_50, %c0_51] : memref<2x128x128xf32, #tpu.memory_space<vmem>>, vector<2x128x128xf32>
      %c0_52 = arith.constant 0 : index
      %c0_53 = arith.constant 0 : index
      %69 = vector.load %arg12[%c0_52, %c0_53] : memref<1x128xf32, #tpu.memory_space<vmem>>, vector<1x128xf32>
      %70 = vector.shape_cast %69 : vector<1x128xf32> to vector<1x1x128xf32>
      %71 = vector.broadcast %70 : vector<1x1x128xf32> to vector<2x128x128xf32>
      %72 = arith.addf %68, %71 : vector<2x128x128xf32>
      %c0_54 = arith.constant 0 : index
      %c0_55 = arith.constant 0 : index
      %c0_56 = arith.constant 0 : index
      %73 = vector.load %arg13[%c0_54, %c0_55, %c0_56] : memref<2x128x128xf32, #tpu.memory_space<vmem>>, vector<2x128x128xf32>
      tpu.vector_store %arg13[%c0_54, %c0_55, %c0_56], %72 {strides = array<i32>} : memref<2x128x128xf32, #tpu.memory_space<vmem>>, vector<2x128x128xf32>,
    } else {
    }
    return
  }
  func.func @transform_0(%arg0: i32, %arg1: i32) -> (i32, i32, i32) {
    %c0_i32 = arith.constant 0 : i32
    %c0_i32_0 = arith.constant 0 : i32
    %c0_i32_1 = arith.constant 0 : i32
    return %arg0, %c0_i32, %c0_i32_0 : i32, i32, i32
  }
  func.func @transform_1(%arg0: i32, %arg1: i32) -> (i32, i32, i32) {
    %c0_i32 = arith.constant 0 : i32
    %c0_i32_0 = arith.constant 0 : i32
    %c0_i32_1 = arith.constant 0 : i32
    return %arg0, %c0_i32, %c0_i32_0 : i32, i32, i32
  }
  func.func @transform_2(%arg0: i32, %arg1: i32) -> (i32, i32, i32) {
    %c0_i32 = arith.constant 0 : i32
    %c0_i32_0 = arith.constant 0 : i32
    %c0_i32_1 = arith.constant 0 : i32
    return %arg0, %c0_i32, %c0_i32_0 : i32, i32, i32
  }
  func.func @transform_3(%arg0: i32, %arg1: i32) -> (i32, i32, i32) {
    %c0_i32 = arith.constant 0 : i32
    %c0_i32_0 = arith.constant 0 : i32
    %c0_i32_1 = arith.constant 0 : i32
    return %arg1, %c0_i32, %c0_i32_0 : i32, i32, i32
  }
  func.func @transform_4(%arg0: i32, %arg1: i32) -> (i32, i32, i32) {
    %c0_i32 = arith.constant 0 : i32
    %c0_i32_0 = arith.constant 0 : i32
    %c0_i32_1 = arith.constant 0 : i32
    return %arg1, %c0_i32, %c0_i32_0 : i32, i32, i32
  }
  func.func @transform_5(%arg0: i32, %arg1: i32) -> (i32, i32, i32) {
    %c0_i32 = arith.constant 0 : i32
    %c0_i32_0 = arith.constant 0 : i32
    %c0_i32_1 = arith.constant 0 : i32
    return %arg1, %c0_i32, %c0_i32_0 : i32, i32, i32
  }
  func.func @transform_6(%arg0: i32, %arg1: i32) -> (i32, i32, i32) {
    %c0_i32 = arith.constant 0 : i32
    %c0_i32_0 = arith.constant 0 : i32
    %c0_i32_1 = arith.constant 0 : i32
    return %arg1, %c0_i32, %c0_i32_0 : i32, i32, i32
  }
  func.func @transform_7(%arg0: i32, %arg1: i32) -> (i32, i32, i32) {
    %c0_i32 = arith.constant 0 : i32
    %c0_i32_0 = arith.constant 0 : i32
    %c0_i32_1 = arith.constant 0 : i32
    return %arg1, %c0_i32, %c0_i32_0 : i32, i32, i32
  }
  func.func @transform_8(%arg0: i32, %arg1: i32) -> (i32, i32, i32) {
    %c0_i32 = arith.constant 0 : i32
    %c0_i32_0 = arith.constant 0 : i32
    %c0_i32_1 = arith.constant 0 : i32
    return %arg1, %c0_i32, %c0_i32_0 : i32, i32, i32
  }
  func.func @transform_9(%arg0: i32, %arg1: i32) -> (i32, i32, i32) {
    %c0_i32 = arith.constant 0 : i32
    %c0_i32_0 = arith.constant 0 : i32
    %c0_i32_1 = arith.constant 0 : i32
    return %arg1, %c0_i32, %c0_i32_0 : i32, i32, i32
  }
  func.func @transform_10(%arg0: i32, %arg1: i32) -> (i32, i32) {
    %c0_i32 = arith.constant 0 : i32
    %c0_i32_0 = arith.constant 0 : i32
    %c0_i32_1 = arith.constant 0 : i32
    return %c0_i32, %c0_i32_0 : i32, i32
  }
  func.func @transform_11(%arg0: i32, %arg1: i32) -> (i32, i32, i32) {
    %c0_i32 = arith.constant 0 : i32
    %c0_i32_0 = arith.constant 0 : i32
    %c0_i32_1 = arith.constant 0 : i32
    return %arg0, %c0_i32, %c0_i32_0 : i32, i32, i32
  }
  func.func @transform_12(%arg0: i32, %arg1: i32) -> (i32, i32, i32, i32) {
    %c0_i32 = arith.constant 0 : i32
    %c0_i32_0 = arith.constant 0 : i32
    %c0_i32_1 = arith.constant 0 : i32
    return %arg0, %arg1, %c0_i32, %c0_i32_0 : i32, i32, i32, i32
  }
}

</mosaic_0001>

<bundles_post_ra>
// kernel: tpu_custom_call.1
= control target key start
LH: loop header
LB: loop body
LE: loop exit
PB: predicated region body
PF: predicated region fallthrough
CT: control target
= control target key end

     0   :  { %s6154_s0 = inlined_call_operand.hbm [shape: f32[8,128,128], index: 0, kind: input, shape index: {}]   ;;  %s6155_s1 = inlined_call_operand.hbm [shape: f32[8,128,128], index: 1, kind: input, shape index: {}]   ;;  %s6156_s2 = inlined_call_operand.hbm [shape: f32[8,128,128], index: 2, kind: input, shape index: {}]   ;;  %s6157_s3 = inlined_call_operand.vmem [shape: bf16[4,128,32], index: 3, kind: input, shape index: {}]   ;;  %s6158_s4 = inlined_call_operand.hbm [shape: f32[4,1,32], index: 4, kind: input, shape index: {}]   ;;  %s6159_s5 = inlined_call_operand.vmem [shape: bf16[4,128,32], index: 5, kind: input, shape index: {}]   ;;  %s6160_s6 = inlined_call_operand.hbm [shape: f32[4,1,32], index: 6, kind: input, shape index: {}]   ;;  %s6161_s7 = inlined_call_operand.vmem [shape: bf16[4,128,32], index: 7, kind: input, shape index: {}]   ;;  %s6162_s8 = inlined_call_operand.hbm [shape: f32[4,1,32], index: 8, kind: input, shape index: {}]   ;;  %s6163_s9 = inlined_call_operand.hbm [shape: bf16[4,32,128], index: 9, kind: input, shape index: {}]   ;;  %s6164_s10 = inlined_call_operand.hbm [shape: f32[1,128], index: 10, kind: input, shape index: {}]   ;;  %s6165_s11 = inlined_call_operand.hbm [shape: f32[8,128,128], index: 11, kind: output, shape index: {0}]   ;;  %s6166_s12 = inlined_call_operand.hbm [shape: f32[8,4,128,128], index: 12, kind: output, shape index: {1}]  }
   0x1   :  { %6216 = sst [smem:[#allocation54_spill]] %s6154_s0 }
   0x2   :  { %6217 = sst [smem:[#allocation55_spill]] %s6155_s1 }
   0x3   :  { %6218 = sst [smem:[#allocation56_spill]] %s6156_s2 }
   0x4   :  { %6219 = sst [smem:[#allocation57_spill]] %s6157_s3 }
   0x5   :  { %6220 = sst [smem:[#allocation58_spill]] %s6158_s4 }
   0x6   :  { %6221 = sst [smem:[#allocation59_spill]] %s6159_s5 }
   0x7   :  { %6222 = sst [smem:[#allocation60_spill]] %s6160_s6 }
   0x8   :  { %6223 = sst [smem:[#allocation61_spill]] %s6161_s7 }
   0x9   :  { %6224 = sst [smem:[#allocation62_spill]] %s6162_s8 }
   0xa   :  { %6225 = sst [smem:[#allocation63_spill]] %s6163_s9 }
   0xb   :  { %6226 = sst [smem:[#allocation64_spill]] %s6164_s10 }
   0xc   :  { %6227 = sst [smem:[#allocation65_spill]] %s6165_s11 }
   0xd   :  { %6228 = sst [smem:[#allocation66_spill]] %s6166_s12 }
   0xe   :  { %18 = vsyncpa [#allocation4], 0 }
   0xf   :  { %20 = vsyncpa [#allocation4 + $0x1], 0 }
  0x10   :  { %21 = vsyncpa [#allocation7], 0 }
  0x11   :  { %23 = vsyncpa [#allocation7 + $0x1], 0 }
  0x12   :  { %24 = vsyncpa [#allocation10], 0 }
  0x13   :  { %26 = vsyncpa [#allocation10 + $0x1], 0 }
  0x14   :  { %27 = vsyncpa [#allocation13], 0 }
  0x15   :  { %29 = vsyncpa [#allocation13 + $0x1], 0 }
  0x16   :  { %30 = vsyncpa [#allocation16], 0 }
  0x17   :  { %31 = vsyncpa [#allocation5], 0 }
  0x18   :  { %33 = vsyncpa [#allocation5 + $0x1], 0 }
  0x19   :  { %34 = vsyncpa [#allocation19], 0 }
  0x1a   :  { %36 = vsyncpa [#allocation19 + $0x1], 0  ;;  %s4762_s21 = smov 0   ;;  %s4764_s22 = smov 0  }
  0x1b   :  { %s4766_s23 = smov 0   ;;  %s4768_s24 = smov 0  }
  0x1c   :  { %s4770_s25 = smov 0   ;;  %s4772_s26 = smov 0  }
  0x1d   :  { %s4774_s27 = smov 0   ;;  %s4776_s28 = smov 0  }
  0x1e   :  { %s4778_s29 = smov 0   ;;  %s4780_s30 = smov 0  }
  0x1f   :  { %s4782_s13 = smov 0   ;;  %s4784_s14 = smov 0  }
  0x20   :  { %s4786_s15 = smov 0   ;;  %s4788_s16 = smov 0  }
  0x21 LB: > { %6229 = sst [smem:[#allocation29_spill]] %s4620_s21  ;;  %p68_p0 = scmp.ne.s32.totalorder %s4652_s29, %s4648_s28  ;;  %s4672_s16 = sphi %s4788_s16, %s42_s16   ;;  %s4668_s15 = sphi %s4786_s15, %s6359_s15   ;;  %s4664_s14 = sphi %s4784_s14, %s6348_s14   ;;  %s4660_s13 = sphi %s4782_s13, %s6358_s13   ;;  %s4656_s30 = sphi %s4780_s30, %s6357_s30   ;;  %s4652_s29 = sphi %s4778_s29, %s6345_s29   ;;  %s4648_s28 = sphi %s4776_s28, %s6356_s28   ;;  %s4644_s27 = sphi %s4774_s27, %s6355_s27   ;;  %s4640_s26 = sphi %s4772_s26, %s6343_s26   ;;  %s4636_s25 = sphi %s4770_s25, %s6354_s25   ;;  %s4632_s24 = sphi %s4768_s24, %s6353_s24   ;;  %s4628_s23 = sphi %s4766_s23, %s6341_s23   ;;  %s4624_s22 = sphi %s4764_s22, %s6352_s22   ;;  %s4620_s21 = sphi %s4762_s21, %s6351_s21  }
  0x22   : > { %6230 = sst [smem:[#allocation30_spill]] %s4628_s23  ;;  %p69_p1 = scmp.eq.s32.totalorder %s4672_s16, 0 }
  0x23   : > { %6231 = sst [smem:[#allocation31_spill]] %s4640_s26  ;;  %p4001_p2 = scmp.lt.s32.totalorder %s4672_s16, 16 }
  0x24   : > { %6232 = sst [smem:[#allocation32_spill]] %s4644_s27  ;;  %p70_p3 = por %p69_p1, %p68_p0 }
  0x25   : > { %6233 = sst [smem:[#allocation33_spill]] %s4652_s29  ;;  %s6169_s19 = sand.u32 1, %s4652_s29  }
  0x26   : > { %6234 = sst [smem:[#allocation34_spill]] %s4656_s30  ;;  %s4846_s20 = sshll.u32 %s6169_s19, 8 }
  0x27   : > { %6235 = sst [smem:[#allocation35_spill]] %s4660_s13  ;;  %s4849_s12 = sshll.u32 %s4668_s15, 12 }
  0x28   : > { %6236 = sst [smem:[#allocation36_spill]] %s4664_s14  ;;  %p4853_p4 = pnand %p4001_p2, %p70_p3 }
  0x29   : > { %6237 = sst [smem:[#allocation37_spill]] %s4668_s15  ;;  %s4858_s18 = sand.u32 1, %s4672_s16  }
  0x2a   : > { %6238 = sst [smem:[#allocation38_spill]] %s4672_s16  ;;  %s444_s19 = scalar_lea.vmem [#allocation6], %s4846_s20 }
  0x2b   : > { %6239 = sst [smem:[#allocation39_spill]] %s4846_s20  ;;  %s452_s5 = sshll.u32 %s444_s19, 4  ;;  %s453_s5 = int_to_ptr.vmem [resolvable:$true] %s452_s5 }
  0x2c   : > { %6240 = sst [smem:[#allocation40_spill]] %s4849_s12  ;;  %s6172_s3 = scalar_lea.sflag [#allocation7], %s4858_s18 }
  0x2d   : > { %s6241_s11 = scalar_select %p4853_p4, 1, 0 }
  0x2e   : > { %s6243_s1 = sld [smem:[#allocation55_spill]]  ;;  %p6190_p5 = pneg %p4853_p4 }
  0x2f   : > { %6242 = sst [smem:[#allocation41_spill]] %s6241_s11  ;;  %s4299_s30 = scalar_lea.vmem %s453_s5, 4096 }
  0x30   : > { %p4300_p6 = scmp.ne.s32.totalorder %s453_s5, %s4299_s30  ;;  %s4674_s9 = smov [#allocation6]  }
  0x31   : > { %s4304_s6 = sshll.u32 %s4674_s9, 4  ;;  %s4305_s6 = int_to_ptr.vmem [resolvable:$false] %s4304_s6 }
  0x32   : > { %p4302_p7 = pnand %p4300_p6, %p6190_p5  ;;  %s4306_s10 = scalar_lea.vmem %s4305_s6, 8192 }
  0x33   : > { %p4307_p9 = scmp.lt.s32.totalorder %s453_s5, %s4305_s6  ;;  %p4308_p10 = scmp.lt.s32.totalorder %s4306_s10, %s4299_s30 }
  0x34   : > { %s451_s7 = scalar_lea.hbm %s6243_s1, %s4849_s12  ;;  %p4303_p8 = pneg %p4302_p7 }
  0x35   : > { %p4309_p11 = por %p4308_p10, %p4307_p9 }
  0x37   : > { %p4310_p12 = pnand %p4309_p11, %p4303_p8 }
  0x39   : > { %4313 = shalt.err (!%p4310_p12)
}
  0x3a   : > { %s6173_s13 = smov 128   ;;  %s6175_s9 = smov 8  }
  0x3b   : > { %3977 = dma.hbm_to_vmem [thread:$0]  (!%p4853_p4), %s451_s7, 4096, %s453_s5, %s6172_s3, %s6173_s13, %s6173_s13, %s6175_s9  }
  0x3c   : > { %s51_s6 = sadd.s32 1, %s4664_s14  ;;  %s165_s10 = sadd.s32 1, %s4640_s26 }
  0x3d   : > { %p52_p13 = scmp.ge.s32.totalorder %s51_s6, 4  ;;  %p172_p3 = scmp.ne.s32.totalorder %s4640_s26, %s4636_s25 }
  0x3e   : > { %s4883_s30 = sand.u32 1, %s4640_s26   ;;  %s6245_s17 = sadd.s32 1, %s4668_s15 }
  0x3f   : > { %s6361_s6 = smov (%p52_p13, %s51_s6), 0  ;;  %s6363_s17 = smov (!%p52_p13, %s6245_s17), %s4668_s15 }
  0x40   : > { %6244 = sst [smem:[#allocation42_spill]] %s6361_s6  ;;  %s162_s19 = ssub.s32 %s4664_s14, %s6361_s6 }
  0x41   : > { %p4894_p6 = por %p172_p3, %p69_p1  ;;  %p56_p7 = scmp.ge.s32.totalorder %s6363_s17, 4 }
  0x42   : > { %p163_p8 = scmp.eq.s32.totalorder %s162_s19, 0  ;;  %s4899_s5 = sshll.u32 %s4664_s14, 4 }
  0x43   : > { %s6365_s17 = smov (%p56_p7, %s6363_s17), 0  ;;  %s6249_s4 = sld [smem:[#allocation58_spill]] }
  0x44   : > { %6247 = sst [smem:[#allocation43_spill]] %s6365_s17  ;;  %s58_s3 = ssub.s32 %s4668_s15, %s6365_s17 }
  0x45   : > { %s4904_s7 = scalar_select %p163_p8, %s4640_s26, %s165_s10  }
  0x46   : > { %p59_p1 = scmp.eq.s32.totalorder %s58_s3, 0  ;;  %s367_s11 = sor.u32 %s162_s19, %s58_s3 }
  0x47   : > { %6248 = sst [smem:[#allocation44_spill]] %s4904_s7  ;;  %p4912_p9 = scmp.eq.s32.totalorder %s367_s11, 0 }
  0x48   : > { %s495_s0 = scalar_lea.vmem [#allocation9], %s4883_s30  ;;  %s6251_s20 = sadd.s32 1, %s4652_s29 }
  0x49   : > { %s500_s6 = scalar_lea.hbm %s6249_s4, %s4899_s5  ;;  %s502_s14 = sshll.u32 %s495_s0, 4  ;;  %s503_s14 = int_to_ptr.vmem [resolvable:$true] %s502_s14 }
  0x4a   : > { %s4920_s12 = scalar_select %p59_p1, %s4652_s29, %s6251_s20  }
  0x4b   : > { %p4926_p10 = pnand %p4001_p2, %p4894_p6  ;;  %s6195_s3 = scalar_lea.sflag [#allocation10], %s4858_s18 }
  0x4c   : > { %6252 = sst [smem:[#allocation45_spill]] %s4920_s12  ;;  %s4327_s11 = scalar_lea.vmem %s503_s14, 16 }
  0x4d   : > { %p6189_p11 = pneg %p4926_p10  ;;  %p4328_p12 = scmp.ne.s32.totalorder %s503_s14, %s4327_s11 }
  0x4e   : > { %s4677_s0 = smov [#allocation9]  }
  0x4f   : > { %p4330_p13 = pnand %p4328_p12, %p6189_p11  ;;  %s4332_s20 = sshll.u32 %s4677_s0, 4  ;;  %s4333_s20 = int_to_ptr.vmem [resolvable:$false] %s4332_s20 }
  0x50   : > { %s4334_s1 = scalar_lea.vmem %s4333_s20, 32  ;;  %p4335_p2 = scmp.lt.s32.totalorder %s503_s14, %s4333_s20 }
  0x51   : > { %p4331_p3 = pneg %p4330_p13  ;;  %p4336_p6 = scmp.lt.s32.totalorder %s4334_s1, %s4327_s11 }
  0x53   : > { %p4337_p7 = por %p4336_p6, %p4335_p2 }
  0x55   : > { %p4338_p8 = pnand %p4337_p7, %p4331_p3 }
  0x57   : > { %4341 = shalt.err (!%p4338_p8)
}
  0x58   : > { %3983 = dma.hbm_to_vmem [thread:$0]  (!%p4926_p10), %s500_s6, 16, %s503_s14, %s6195_s3  }
  0x59   : > { %s6254_s8 = sld [smem:[#allocation62_spill]]  ;;  %s545_s13 = scalar_lea.vmem [#allocation12], %s4883_s30 }
  0x5a   : > { %s552_s4 = sshll.u32 %s545_s13, 4  ;;  %s6194_s11 = scalar_lea.sflag [#allocation13], %s4858_s18  ;;  %s553_s4 = int_to_ptr.vmem [resolvable:$true] %s552_s4 }
  0x5b   : > { %s4355_s20 = scalar_lea.vmem %s553_s4, 16  ;;  %s4678_s1 = smov [#allocation12]  }
  0x5c   : > { %p4356_p1 = scmp.ne.s32.totalorder %s553_s4, %s4355_s20  ;;  %s4360_s17 = sshll.u32 %s4678_s1, 4  ;;  %s4361_s17 = int_to_ptr.vmem [resolvable:$false] %s4360_s17 }
  0x5d   : > { %s4362_s15 = scalar_lea.vmem %s4361_s17, 32  ;;  %p4363_p3 = scmp.lt.s32.totalorder %s553_s4, %s4361_s17 }
  0x5e   : > { %p4358_p12 = pnand %p4356_p1, %p6189_p11  ;;  %p4364_p2 = scmp.lt.s32.totalorder %s4362_s15, %s4355_s20 }
  0x5f   : > { %s550_s0 = scalar_lea.hbm %s6254_s8, %s4899_s5 }
  0x60   : > { %p4359_p13 = pneg %p4358_p12  ;;  %p4365_p6 = por %p4364_p2, %p4363_p3 }
  0x62   : > { %p4366_p7 = pnand %p4365_p6, %p4359_p13 }
  0x64   : > { %4369 = shalt.err (!%p4366_p7)
}
  0x65   : > { %3989 = dma.hbm_to_vmem [thread:$0]  (!%p4926_p10), %s550_s0, 16, %s553_s4, %s6194_s11  }
  0x66   : > { %s4955_s14 = sadd.s32 4294967295, %s4672_s16   ;;  %s3321_s15 = sadd.s32 4294967294, %s4672_s16  }
  0x67   : > { %p74_p8 = scmp.ne.s32.totalorder %s4648_s28, %s4644_s27  ;;  %p6191_p1 = scmp.eq.s32.totalorder %s4955_s14, 0 }
  0x68   : > { %p178_p12 = scmp.ne.s32.totalorder %s4636_s25, %s4632_s24  ;;  %p353_p13 = scmp.eq.s32.totalorder %s4955_s14, 15 }
  0x69   : > { %p359_p3 = scmp.eq.s32.totalorder %s3321_s15, 15  ;;  %p4966_p2 = por %p6191_p1, %p74_p8 }
  0x6a   : > { %p4972_p6 = por %p178_p12, %p6191_p1  ;;  %s6257_s17 = sld [smem:[#allocation40_spill]] }
  0x6b   : > { %p4979_p7 = por %p353_p13, %p68_p0  ;;  %p4983_p11 = por %p359_p3, %p74_p8 }
  0x6c   : > { %s6256_s4 = scalar_select %p4972_p6, 1, 0 }
  0x6d   : > { %s6258_s13 = scalar_select %p4979_p7, 1, 0 }
  0x6e   : > { %s6260_s24 = scalar_select %p4983_p11, 1, 0 }
  0x6f   : > { %6259 = sst [smem:[#allocation40_spill]] %s6258_s13  ;;  %s370_s19 = sadd.s32 1, %s4628_s23 }
  0x70   : > { %6261 = sst [smem:[#allocation46_spill]] %s6260_s24  ;;  %p380_p5 = scmp.ne.s32.totalorder %s4628_s23, %s4624_s22 }
  0x71   : > { %s6262_s9 = sld [smem:[#allocation39_spill]]  ;;  %p386_p0 = scmp.ne.s32.totalorder %s4624_s22, %s4620_s21 }
  0x72   : > { %s4993_s0 = scalar_select %p4912_p9, %s4628_s23, %s370_s19  }
  0x73   : > { %p4995_p12 = por %p380_p5, %p353_p13  ;;  %p3322_p1 = scmp.ge.s32.totalorder %s4672_s16, 1 }
  0x74   : > { %6263 = sst [smem:[#allocation47_spill]] %s4993_s0  ;;  %p394_p6 = scmp.lt.s32.totalorder %s4672_s16, 17 }
  0x75   : > { %s6264_s20 = scalar_select %p4995_p12, 1, 0 }
  0x76   : > { %p5003_p7 = por %p386_p0, %p359_p3  ;;  %p5007_p8 = pnand %p3322_p1, %p394_p6 }
  0x77   : > { %6265 = sst [smem:[#allocation39_spill]] %s6264_s20  ;;  %s4679_s2 = smov [#allocation15]  }
  0x78   : > { %s6266_s1 = scalar_select %p5003_p7, 1, 0 }
  0x79   : > { %s407_s19 = sshll.u32 %s4679_s2, 4  ;;  %p3967_p9 = pneg %p5007_p8  ;;  %s408_s19 = int_to_ptr.vmem [resolvable:$true] %s407_s19 }
  0x7a   : > { %6267 = sst [smem:[#allocation48_spill]] %s6266_s1  ;;  %p6270_p5 = scmp.eq.s32.totalorder %s4955_s14, 0 }
  0x7b   : > { %s6269_s8 = sld [smem:[#allocation54_spill]]  ;;  %s422_s26 = scalar_lea.vmem [#allocation3], %s6262_s9 }
  0x7c   : > { %p5019_p13 = pnand %p3967_p9, %p6270_p5  ;;  %s430_s0 = sshll.u32 %s422_s26, 4  ;;  %s5024_s0 = int_to_ptr.vmem [resolvable:$true] %s430_s0 }
  0x7d   : > { %s6272_s2 = sld [smem:[#allocation56_spill]]  ;;  %s4381_s24 = scalar_lea.vmem %s408_s19, 16 }
  0x7e   : > { %p4372_p1 = pneg %p5019_p13  ;;  %p4382_p3 = scmp.ne.s32.totalorder %s408_s19, %s4381_s24 }
  0x7f   : > { %s4388_s3 = scalar_lea.vmem %s408_s19, 32  ;;  %p4389_p9 = scmp.lt.s32.totalorder %s408_s19, %s408_s19 }
  0x80   : > { %p4384_p6 = pnand %p4382_p3, %p4372_p1  ;;  %p4390_p5 = scmp.lt.s32.totalorder %s4388_s3, %s4381_s24 }
  0x82   : > { %p4385_p0 = pneg %p4384_p6  ;;  %p4391_p7 = por %p4390_p5, %p4389_p9 }
  0x84   : > { %p4392_p11 = pnand %p4391_p7, %p4385_p0 }
  0x86   : > { %4395 = shalt.err (!%p4392_p11)
}
  0x87   : > { %s6273_s12 = sld [smem:[#allocation64_spill]]  ;;  %s6275_s1 = sand.u32 1, %s4652_s29  }
  0x88   : > { %s419_s21 = scalar_lea.sflag [#allocation4], %s6275_s1  ;;  %s4409_s27 = scalar_lea.vmem %s5024_s0, 4096 }
  0x89   : > { %p4410_p1 = scmp.ne.s32.totalorder %s5024_s0, %s4409_s27  ;;  %p6276_p3 = pneg %p4853_p4 }
  0x8a   : > { %s4680_s24 = smov [#allocation3]  }
  0x8b   : > { %p4412_p6 = pnand %p4410_p1, %p6276_p3  ;;  %s4414_s3 = sshll.u32 %s4680_s24, 4  ;;  %s4415_s3 = int_to_ptr.vmem [resolvable:$false] %s4414_s3 }
  0x8c   : > { %s4416_s7 = scalar_lea.vmem %s4415_s3, 8192  ;;  %p4417_p11 = scmp.lt.s32.totalorder %s5024_s0, %s4415_s3 }
  0x8d   : > { %3970 = dma.hbm_to_vmem [thread:$0]  (!%p5019_p13), %s6273_s12, 16, %s408_s19, [#allocation16]  }
  0x8e   : > { %p4413_p7 = pneg %p4412_p6  ;;  %p4418_p0 = scmp.lt.s32.totalorder %s4416_s7, %s4409_s27 }
  0x90   : > { %p4419_p9 = por %p4418_p0, %p4417_p11 }
  0x92   : > { %p4420_p5 = pnand %p4419_p9, %p4413_p7 }
  0x94   : > { %4423 = shalt.err (!%p4420_p5)
}
  0x95   : > { %s6277_s12 = smov 8   ;;  %s6278_s19 = smov 128  }
  0x96   : > { %s6279_s1 = scalar_lea.hbm %s6269_s8, %s6257_s17  ;;  %s466_s24 = scalar_lea.vmem [#allocation8], %s6262_s9 }
  0x97   : > { %3974 = dma.hbm_to_vmem [thread:$0]  (!%p4853_p4), %s6279_s1, 4096, %s5024_s0, %s419_s21, %s6278_s19, %s6278_s19, %s6277_s12  }
  0x98   : > { %s474_s27 = sshll.u32 %s466_s24, 4  ;;  %s6280_s29 = sld [smem:[#allocation60_spill]]  ;;  %s475_s27 = int_to_ptr.vmem [resolvable:$true] %s474_s27 }
  0x99   : > { %s4437_s13 = scalar_lea.vmem %s475_s27, 4096  ;;  %p6282_p1 = pmov %p6276_p3 }
  0x9a   : > { %p4438_p13 = scmp.ne.s32.totalorder %s475_s27, %s4437_s13  ;;  %s4681_s26 = smov [#allocation8]  }
  0x9b   : > { %s4442_s11 = sshll.u32 %s4681_s26, 4  ;;  %s4443_s11 = int_to_ptr.vmem [resolvable:$false] %s4442_s11 }
  0x9c   : > { %p4440_p3 = pnand %p4438_p13, %p6282_p1  ;;  %s4444_s8 = scalar_lea.vmem %s4443_s11, 8192 }
  0x9d   : > { %p4445_p7 = scmp.lt.s32.totalorder %s475_s27, %s4443_s11  ;;  %p4446_p11 = scmp.lt.s32.totalorder %s4444_s8, %s4437_s13 }
  0x9e   : > { %s525_s16 = scalar_lea.hbm %s6280_s29, %s4899_s5  ;;  %p4441_p6 = pneg %p4440_p3 }
  0x9f   : > { %p4447_p0 = por %p4446_p11, %p4445_p7 }
  0xa1   : > { %p4448_p9 = pnand %p4447_p0, %p4441_p6 }
  0xa3   : > { %4451 = shalt.err (!%p4448_p9)
}
  0xa4   : > { %s6283_s21 = scalar_lea.sflag [#allocation7], %s4858_s18  ;;  %s6284_s0 = scalar_lea.hbm %s6272_s2, %s6257_s17 }
  0xa5   : > { %s6285_s1 = sld [smem:[#allocation36_spill]]  ;;  %s520_s8 = scalar_lea.vmem [#allocation11], %s4883_s30 }
  0xa6   : > { %3980 = dma.hbm_to_vmem [thread:$0]  (!%p4853_p4), %s6284_s0, 4096, %s475_s27, %s6283_s21, %s6278_s19, %s6278_s19, %s6277_s12  }
  0xa7   : > { %s527_s13 = sshll.u32 %s520_s8, 4  ;;  %p6286_p13 = pneg %p4926_p10  ;;  %s528_s13 = int_to_ptr.vmem [resolvable:$true] %s527_s13 }
  0xa8   : > { %s4465_s3 = scalar_lea.vmem %s528_s13, 16  ;;  %s4682_s23 = smov [#allocation11]  }
  0xa9   : > { %p4466_p5 = scmp.ne.s32.totalorder %s528_s13, %s4465_s3  ;;  %s4470_s7 = sshll.u32 %s4682_s23, 4  ;;  %s4471_s7 = int_to_ptr.vmem [resolvable:$false] %s4470_s7 }
  0xaa   : > { %s4472_s26 = scalar_lea.vmem %s4471_s7, 32  ;;  %p4473_p6 = scmp.lt.s32.totalorder %s528_s13, %s4471_s7 }
  0xab   : > { %s3438_s24 = sshll.u32 %s6285_s1, 8  ;;  %p4468_p1 = pnand %p4466_p5, %p6286_p13 }
  0xac   : > { %p4474_p7 = scmp.lt.s32.totalorder %s4472_s26, %s4465_s3 }
  0xad   : > { %p4469_p3 = pneg %p4468_p1 }
  0xae   : > { %p4475_p11 = por %p4474_p7, %p4473_p6 }
  0xb0   : > { %p4476_p0 = pnand %p4475_p11, %p4469_p3 }
  0xb2   : > { %4479 = shalt.err (!%p4476_p0)
}
  0xb3   : > { %s6287_s17 = scalar_lea.sflag [#allocation10], %s4858_s18  ;;  %s6288_s21 = sld [smem:[#allocation63_spill]] }
  0xb4   : > { %3986 = dma.hbm_to_vmem [thread:$0]  (!%p4926_p10), %s525_s16, 16, %s528_s13, %s6287_s17  }
  0xb5   : > { %s6289_s9 = sshll.u32 %s4883_s30, 4  ;;  %p6290_p9 = pmov %p6286_p13 }
  0xb6   : > { %s563_s0 = scalar_lea.vmem [#allocation14], %s6289_s9  ;;  %s4683_s3 = smov [#allocation14]  }
  0xb7   : > { %s570_s1 = sshll.u32 %s563_s0, 4  ;;  %s4498_s23 = sshll.u32 %s4683_s3, 4  ;;  %s571_s1 = int_to_ptr.vmem [resolvable:$true] %s570_s1  ;;  %s4499_s23 = int_to_ptr.vmem [resolvable:$false] %s4498_s23 }
  0xb8   : > { %s4493_s8 = scalar_lea.vmem %s571_s1, 256  ;;  %s4500_s5 = scalar_lea.vmem %s4499_s23, 512 }
  0xb9   : > { %s569_s29 = scalar_lea.hbm %s6288_s21, %s3438_s24  ;;  %p4494_p4 = scmp.ne.s32.totalorder %s571_s1, %s4493_s8 }
  0xba   : > { %p4501_p1 = scmp.lt.s32.totalorder %s571_s1, %s4499_s23  ;;  %p4502_p3 = scmp.lt.s32.totalorder %s4500_s5, %s4493_s8 }
  0xbb   : > { %p4496_p5 = pnand %p4494_p4, %p6290_p9 }
  0xbc   : > { %p4503_p6 = por %p4502_p3, %p4501_p1 }
  0xbd   : > { %p4497_p13 = pneg %p4496_p5 }
  0xbf   : > { %p4504_p7 = pnand %p4503_p6, %p4497_p13 }
  0xc1   : > { %4507 = shalt.err (!%p4504_p7)
}
  0xc2   : > { %s4684_s16 = smov 64   ;;  %s4685_s30 = smov 4  }
  0xc3   : > { %s6291_s13 = scalar_lea.sflag [#allocation13], %s4858_s18  ;;  %582 = sbr.rel (%p5007_p8) target bundleno = 1642 (0x66a), region = 64 }
  0xc4   : > { %3992 = dma.hbm_to_vmem [thread:$0]  (!%p4926_p10), %s569_s29, 256, %s571_s1, %s6291_s13, %s4684_s16, %s4684_s16, %s4685_s30  }
  0xc8   : > { %s5105_s24 = sand.u32 1, %s4648_s28  }
  0xc9   : > { %s5108_s7 = sshll.u32 %s5105_s24, 8  ;;  %s585_s26 = scalar_lea.sflag [#allocation4], %s5105_s24 }
  0xca   : > { %s5112_s17 = scalar_lea.vmem [#allocation3], %s5108_s7 }
  0xcb   : > { %4591 = dma.done.wait (%p4966_p2), %s585_s26, 4096  }
  0xcc   : > { %4593 = vsyncadd (%p4966_p2), %s585_s26, 4294963200  ;;  %s593_s18 = sand.u32 1, %s4955_s14   ;;  %s5120_s15 = scalar_lea.vmem [#allocation6], %s5108_s7 }
  0xcd   : > { %s594_s10 = scalar_lea.sflag [#allocation7], %s593_s18 }
  0xce   : > { %4595 = dma.done.wait (%p4966_p2), %s594_s10, 8192  }
  0xcf   : > { %4597 = vsyncadd (%p4966_p2), %s594_s10, 4294959104  ;;  %s5127_s12 = sand.u32 1, %s4636_s25   ;;  %s5130_s19 = scalar_lea.vmem [#allocation8], %s5108_s7 }
  0xd0   : > { %s612_s27 = scalar_lea.sflag [#allocation10], %s593_s18  ;;  %s614_s11 = scalar_lea.vmem [#allocation9], %s5127_s12 }
  0xd1   : > { %p6292_p10 = scmp.ne.s32.totalorder %s6256_s4, 0 }
  0xd3   : > { %4599 = dma.done.wait (%p6292_p10), %s612_s27, 32  }
  0xd4   : > { %4601 = vsyncadd (%p6292_p10), %s612_s27, 4294967264  ;;  %s628_s21 = scalar_lea.sflag [#allocation13], %s593_s18 }
  0xd5   : > { %4603 = dma.done.wait (%p6292_p10), %s628_s21, 272  }
  0xd6   : > { %4605 = vsyncadd (%p6292_p10), %s628_s21, 4294967024  ;;  %s3347_s9 = sshll.u32 %s5127_s12, 4  ;;  %p6293_p2 = scmp.eq.s32.totalorder %s4955_s14, 0 }
  0xd7   : > { %s5144_s0 = scalar_lea.vmem [#allocation14], %s3347_s9 }
  0xd8   : > { %4607 = dma.done.wait (%p6293_p2), [#allocation16], 16   ;;  %p6294_p8 = pmov %p6293_p2 }
  0xd9   : > { %s6295_s1 = sld [smem:[#allocation34_spill]]  ;;  %s6210_s8 = sand.u32 1, %s4624_s22  }
  0xda   : > { %4609 = vsyncadd (%p6294_p8), [#allocation16], 4294967280  ;;  %s3350_s3 = sshll.u32 %s6210_s8, 8  ;;  %s6296_s30 = sld [smem:[#allocation57_spill]] }
  0xdb   : > { %s6297_s14 = sld [smem:[#allocation59_spill]]  ;;  %s5171_s6 = scalar_lea.vmem [#allocation17], %s5108_s7 }
  0xdc   : > { %s6298_s9 = sld [smem:[#allocation61_spill]]  ;;  %s5173_s8 = scalar_lea.vmem [#allocation18], %s3350_s3 }
  0xdf   : > { %p734_p11 = scmp.lt.s32.totalorder %s6295_s1, 3  ;;  %p3357_p0 = scmp.ne.s32.totalorder %s6295_s1, 0 }
  0xe1   : > { %s735_s4 = scalar_select %p734_p11, %s6295_s1, 3 }
  0xe2   : > { %755 = sbr.rel (%p3357_p0) target bundleno = 248 (0xf8), region = 100 }
  0xe3   : > { %s3439_s23 = sshll.u32 %s735_s4, 6 }
  0xe4   : > { %s5158_s13 = scalar_lea.vmem %s6296_s30, %s3439_s23  ;;  %s5163_s10 = scalar_lea.vmem %s6297_s14, %s3439_s23 }
  0xe5   : > { %s5168_s29 = scalar_lea.vmem %s6298_s9, %s3439_s23 }
  0xe7   : > { %v4686_v0 = vmov 0.0  }
  0xe8   : > { %756 = vst [vmem:[#allocation2 + $0xb0] sm:$0xff] %v4686_v0  ;;  %757 = vst [vmem:[#allocation2] sm:$0xff] %v4686_v0 }
  0xe9   : > { %758 = vst [vmem:[#allocation2 + $0xd8] sm:$0xff] %v4686_v0  ;;  %759 = vst [vmem:[#allocation2 + $0x18] sm:$0xff] %v4686_v0 }
  0xea   : > { %760 = vst [vmem:[#allocation2 + $0x50] sm:$0xff] %v4686_v0  ;;  %761 = vst [vmem:[#allocation2 + $0x68] sm:$0xff] %v4686_v0 }
  0xeb   : > { %762 = vst [vmem:[#allocation2 + $0x30] sm:$0xff] %v4686_v0  ;;  %763 = vst [vmem:[#allocation2 + $0x48] sm:$0xff] %v4686_v0 }
  0xec   : > { %764 = vst [vmem:[#allocation2 + $0x80] sm:$0xff] %v4686_v0  ;;  %765 = vst [vmem:[#allocation2 + $0x88] sm:$0xff] %v4686_v0 }
  0xed   : > { %766 = vst [vmem:[#allocation2 + $0xe8] sm:$0xff] %v4686_v0  ;;  %767 = vst [vmem:[#allocation2 + $0xb8] sm:$0xff] %v4686_v0 }
  0xee   : > { %768 = vst [vmem:[#allocation2 + $0x60] sm:$0xff] %v4686_v0  ;;  %769 = vst [vmem:[#allocation2 + $0xf0] sm:$0xff] %v4686_v0 }
  0xef   : > { %770 = vst [vmem:[#allocation2 + $0x8] sm:$0xff] %v4686_v0  ;;  %771 = vst [vmem:[#allocation2 + $0x78] sm:$0xff] %v4686_v0 }
  0xf0   : > { %772 = vst [vmem:[#allocation2 + $0x38] sm:$0xff] %v4686_v0  ;;  %773 = vst [vmem:[#allocation2 + $0x58] sm:$0xff] %v4686_v0 }
  0xf1   : > { %774 = vst [vmem:[#allocation2 + $0x40] sm:$0xff] %v4686_v0  ;;  %775 = vst [vmem:[#allocation2 + $0xc8] sm:$0xff] %v4686_v0 }
  0xf2   : > { %776 = vst [vmem:[#allocation2 + $0xe0] sm:$0xff] %v4686_v0  ;;  %777 = vst [vmem:[#allocation2 + $0x90] sm:$0xff] %v4686_v0 }
  0xf3   : > { %778 = vst [vmem:[#allocation2 + $0x70] sm:$0xff] %v4686_v0  ;;  %779 = vst [vmem:[#allocation2 + $0xc0] sm:$0xff] %v4686_v0 }
  0xf4   : > { %780 = vst [vmem:[#allocation2 + $0xa8] sm:$0xff] %v4686_v0  ;;  %781 = vst [vmem:[#allocation2 + $0xd0] sm:$0xff] %v4686_v0 }
  0xf5   : > { %782 = vst [vmem:[#allocation2 + $0x10] sm:$0xff] %v4686_v0  ;;  %783 = vst [vmem:[#allocation2 + $0x28] sm:$0xff] %v4686_v0 }
  0xf6   : > { %784 = vst [vmem:[#allocation2 + $0xa0] sm:$0xff] %v4686_v0  ;;  %785 = vst [vmem:[#allocation2 + $0xf8] sm:$0xff] %v4686_v0 }
  0xf7   : > { %786 = vst [vmem:[#allocation2 + $0x20] sm:$0xff] %v4686_v0  ;;  %787 = vst [vmem:[#allocation2 + $0x98] sm:$0xff] %v4686_v0 }
  0xf8 PF: > { %v4131_v1 = vld [vmem:[%s5158_s13 + $0x38] sm:$0xff]   ;;  %v4132_v2 = vld [vmem:[%s5158_s13 + $0x30] sm:$0xff]   ;;  %v4133_v3 = vld [vmem:[%s5158_s13 + $0x28] sm:$0xff]   ;;  %vm1660_vm0 = vcmask 261120   ;;  %s6304_s7 = scalar_lea.vmem [#allocation11], %s5127_s12 }
  0xf9   : > { %3907 = vmatprep.subr.bf16.mxu1 %v4131_v1  ;;  %3599 = vmatprep.subr.bf16.mxu0 %v4131_v1  ;;  %v4134_v4 = vld [vmem:[%s5158_s13 + $0x20] sm:$0xff]   ;;  %v805_v6 = vld [vmem:[%s5112_s17 + $0x88] sm:$0xff]  ;;  %v4135_v8 = vld [vmem:[%s5158_s13 + $0x18] sm:$0xff]  }
  0xfa   : > { %3915 = vmatpush3.bf16.msra.mxu1 %v4131_v1  ;;  %3600 = vmatpush3.bf16.msra.mxu0 %v4131_v1  ;;  %v804_v5 = vld [vmem:[%s5112_s17 + $0x80] sm:$0xff]  ;;  %v4136_v9 = vld [vmem:[%s5158_s13 + $0x10] sm:$0xff]   ;;  %v4137_v10 = vld [vmem:[%s5158_s13 + $0x8] sm:$0xff]  }
  0xfb   : > { %3908 = vmatprep.subr.bf16.mxu1 %v4132_v2  ;;  %3601 = vmatprep.subr.bf16.mxu0 %v4132_v2  ;;  %v828_v7 = vpack.c.bf16 %v805_v6, %v804_v5  ;;  %v4138_v11 = vld [vmem:[%s5158_s13] sm:$0xff]   ;;  %v806_v12 = vld [vmem:[%s5112_s17 + $0x90] sm:$0xff]  ;;  %v807_v13 = vld [vmem:[%s5112_s17 + $0x98] sm:$0xff] }
  0xfc   : > { %v4139_v14 = vld [vmem:[%s5163_s10 + $0x38] sm:$0xff]   ;;  %v808_v15 = vld [vmem:[%s5112_s17 + $0xa0] sm:$0xff]  ;;  %v809_v16 = vld [vmem:[%s5112_s17 + $0xa8] sm:$0xff]  ;;  %v829_v17 = vpack.c.bf16 %v807_v13, %v806_v12 }
  0xfd   : > { %3631 = vmatprep.mubr.bf16.mxu1 %v828_v7  ;;  %v4140_v18 = vld [vmem:[%s5163_s10 + $0x30] sm:$0xff]   ;;  %v830_v19 = vpack.c.bf16 %v809_v16, %v808_v15  ;;  %v788_v20 = vld [vmem:[%s5112_s17] sm:$0xff]  ;;  %v789_v21 = vld [vmem:[%s5112_s17 + $0x8] sm:$0xff] }
  0xfe   : > { %3916 = vmatpush3.bf16.msra.mxu1 %v4132_v2  ;;  %3602 = vmatpush3.bf16.msra.mxu0 %v4132_v2  ;;  %v790_v22 = vld [vmem:[%s5112_s17 + $0x10] sm:$0xff]  ;;  %v811_v24 = vld [vmem:[%s5112_s17 + $0xb8] sm:$0xff]  ;;  %v820_v25 = vpack.c.bf16 %v789_v21, %v788_v20  ;;  %v4141_v27 = vld [vmem:[%s5163_s10 + $0x28] sm:$0xff]  }
  0xff   : > { %3909 = vmatprep.subr.bf16.mxu1 %v4133_v3  ;;  %3603 = vmatprep.subr.bf16.mxu0 %v4133_v3  ;;  %v810_v23 = vld [vmem:[%s5112_s17 + $0xb0] sm:$0xff]  ;;  %v791_v26 = vld [vmem:[%s5112_s17 + $0x18] sm:$0xff]  ;;  %v792_v31 = vld [vmem:[%s5112_s17 + $0x20] sm:$0xff] }
 0x100   : > { %v821_v28 = vpack.c.bf16 %v791_v26, %v790_v22  ;;  %v4147_v29 = vld [vmem:[%s5168_s29 + $0x38] sm:$0xff]   ;;  %v4148_v30 = vld [vmem:[%s5168_s29 + $0x30] sm:$0xff]   ;;  %v793_v32 = vld [vmem:[%s5112_s17 + $0x28] sm:$0xff]  ;;  %3615 = vmatprep.mubr.bf16.mxu0 %v820_v25  ;;  %v831_v36 = vpack.c.bf16 %v811_v24, %v810_v23 }
 0x101   : > { %v812_v33 = vld [vmem:[%s5112_s17 + $0xc0] sm:$0xff]  ;;  %v813_v34 = vld [vmem:[%s5112_s17 + $0xc8] sm:$0xff]  ;;  %v822_v35 = vpack.c.bf16 %v793_v32, %v792_v31  ;;  %v794_v37 = vld [vmem:[%s5112_s17 + $0x30] sm:$0xff] }
 0x102   : > { %3917 = vmatpush3.bf16.msra.mxu1 %v4133_v3  ;;  %3604 = vmatpush3.bf16.msra.mxu0 %v4133_v3  ;;  %v795_v38 = vld [vmem:[%s5112_s17 + $0x38] sm:$0xff]  ;;  %v4142_v39 = vld [vmem:[%s5163_s10 + $0x20] sm:$0xff]   ;;  %v832_v40 = vpack.c.bf16 %v813_v34, %v812_v33  ;;  %v797_v42 = vld [vmem:[%s5112_s17 + $0x48] sm:$0xff] }
 0x103   : > { %3910 = vmatprep.subr.bf16.mxu1 %v4134_v4  ;;  %3605 = vmatprep.subr.bf16.mxu0 %v4134_v4  ;;  %v796_v41 = vld [vmem:[%s5112_s17 + $0x40] sm:$0xff]  ;;  %v4149_v43 = vld [vmem:[%s5168_s29 + $0x28] sm:$0xff]   ;;  %v814_v44 = vld [vmem:[%s5112_s17 + $0xd0] sm:$0xff]  ;;  %v823_v45 = vpack.c.bf16 %v795_v38, %v794_v37 }
 0x104   : > { %v815_v46 = vld [vmem:[%s5112_s17 + $0xd8] sm:$0xff]  ;;  %v816_v48 = vld [vmem:[%s5112_s17 + $0xe0] sm:$0xff]  ;;  %v824_v49 = vpack.c.bf16 %v797_v42, %v796_v41  ;;  %v817_v51 = vld [vmem:[%s5112_s17 + $0xe8] sm:$0xff] }
 0x105   : > { %v4143_v47 = vld [vmem:[%s5163_s10 + $0x18] sm:$0xff]   ;;  %v4150_v50 = vld [vmem:[%s5168_s29 + $0x20] sm:$0xff]   ;;  %v833_v52 = vpack.c.bf16 %v815_v46, %v814_v44  ;;  %v798_v53 = vld [vmem:[%s5112_s17 + $0x50] sm:$0xff]  ;;  %v834_v55 = vpack.c.bf16 %v817_v51, %v816_v48 }
 0x106   : > { %3918 = vmatpush3.bf16.msra.mxu1 %v4134_v4  ;;  %3606 = vmatpush3.bf16.msra.mxu0 %v4134_v4  ;;  %v799_v54 = vld [vmem:[%s5112_s17 + $0x58] sm:$0xff]  ;;  %v800_v56 = vld [vmem:[%s5112_s17 + $0x60] sm:$0xff]  ;;  %v801_v57 = vld [vmem:[%s5112_s17 + $0x68] sm:$0xff] }
 0x107   : > { %3911 = vmatprep.subr.bf16.mxu1 %v4135_v8  ;;  %3607 = vmatprep.subr.bf16.mxu0 %v4135_v8  ;;  %v4144_v58 = vld [vmem:[%s5163_s10 + $0x10] sm:$0xff]   ;;  %v4151_v59 = vld [vmem:[%s5168_s29 + $0x18] sm:$0xff]   ;;  %v825_v60 = vpack.c.bf16 %v799_v54, %v798_v53  ;;  %v826_v61 = vpack.c.bf16 %v801_v57, %v800_v56  ;;  %v4145_v1 = vld [vmem:[%s5163_s10 + $0x8] sm:$0xff]  }
 0x108   : > { %v818_v62 = vld [vmem:[%s5112_s17 + $0xf0] sm:$0xff]  ;;  %v819_v63 = vld [vmem:[%s5112_s17 + $0xf8] sm:$0xff]  ;;  %v1068_v2 = vld [vmem:[%s5120_s15] sm:$0xff] }
 0x109   : > { %v4152_v0 = vld [vmem:[%s5168_s29 + $0x10] sm:$0xff]   ;;  %v1069_v3 = vld [vmem:[%s5120_s15 + $0x8] sm:$0xff]  ;;  %v803_v5 = vld [vmem:[%s5112_s17 + $0x78] sm:$0xff]  ;;  %v835_v6 = vpack.c.bf16 %v819_v63, %v818_v62 }
 0x10a   : > { %3919 = vmatpush3.bf16.msra.mxu1 %v4135_v8  ;;  %3608 = vmatpush3.bf16.msra.mxu0 %v4135_v8  ;;  %v802_v4 = vld [vmem:[%s5112_s17 + $0x70] sm:$0xff]  ;;  %v1100_v7 = vpack.c.bf16 %v1069_v3, %v1068_v2  ;;  %v1348_v8 = vld [vmem:[%s5130_s19] sm:$0xff]  ;;  %v1071_v15 = vld [vmem:[%s5120_s15 + $0x18] sm:$0xff]  ;;  %s6305_s17 = scalar_lea.vmem [#allocation12], %s5127_s12  ;;  %s6323_s12 = sld [smem:[#allocation34_spill]] }
 0x10b   : > { %3912 = vmatprep.subr.bf16.mxu1 %v4136_v9  ;;  %3609 = vmatprep.subr.bf16.mxu0 %v4136_v9  ;;  %v827_v12 = vpack.c.bf16 %v803_v5, %v802_v4  ;;  %v4154_v16 = vld [vmem:[%s5168_s29] sm:$0xff]   ;;  %v1350_v20 = vld [vmem:[%s5130_s19 + $0x10] sm:$0xff]  ;;  %v1351_v21 = vld [vmem:[%s5130_s19 + $0x18] sm:$0xff] }
 0x10c   : > { %v1352_v23 = vld [vmem:[%s5130_s19 + $0x20] sm:$0xff]  ;;  %v1353_v24 = vld [vmem:[%s5130_s19 + $0x28] sm:$0xff]  ;;  %v1381_v25 = vpack.c.bf16 %v1351_v21, %v1350_v20  ;;  %v1354_v32 = vld [vmem:[%s5130_s19 + $0x30] sm:$0xff] }
 0x10d   : > { %v1382_v26 = vpack.c.bf16 %v1353_v24, %v1352_v23  ;;  %v1355_v33 = vld [vmem:[%s5130_s19 + $0x38] sm:$0xff]  ;;  %v1080_v41 = vld [vmem:[%s5120_s15 + $0x60] sm:$0xff]  ;;  %v1081_v42 = vld [vmem:[%s5120_s15 + $0x68] sm:$0xff] }
 0x10e   : > { %3920 = vmatpush3.bf16.msra.mxu1 %v4136_v9  ;;  %3610 = vmatpush3.bf16.msra.mxu0 %v4136_v9  ;;  %v1349_v9 = vld [vmem:[%s5130_s19 + $0x8] sm:$0xff]  ;;  %v1383_v37 = vpack.c.bf16 %v1355_v33, %v1354_v32  ;;  %v1358_v44 = vld [vmem:[%s5130_s19 + $0x50] sm:$0xff]  ;;  %v1106_v46 = vpack.c.bf16 %v1081_v42, %v1080_v41  ;;  %v1084_v53 = vld [vmem:[%s5120_s15 + $0x80] sm:$0xff] }
 0x10f   : > { %3913 = vmatprep.subr.bf16.mxu1 %v4137_v10  ;;  %3611 = vmatprep.subr.bf16.mxu0 %v4137_v10  ;;  %v1380_v13 = vpack.c.bf16 %v1349_v9, %v1348_v8  ;;  %v1361_v48 = vld [vmem:[%s5130_s19 + $0x68] sm:$0xff]  ;;  %v1082_v51 = vld [vmem:[%s5120_s15 + $0x70] sm:$0xff]  ;;  %v1363_v57 = vld [vmem:[%s5130_s19 + $0x78] sm:$0xff] }
 0x110   : > { %v1085_v54 = vld [vmem:[%s5120_s15 + $0x88] sm:$0xff]  ;;  %v1362_v56 = vld [vmem:[%s5130_s19 + $0x70] sm:$0xff]  ;;  %v1367_v5 = vld [vmem:[%s5130_s19 + $0x98] sm:$0xff]  ;;  %p3419_p4 = scmp.ne.s32.totalorder %s6323_s12, 3 }
 0x111   : > { %v1086_v63 = vld [vmem:[%s5120_s15 + $0x90] sm:$0xff]  ;;  %v1089_v2 = vld [vmem:[%s5120_s15 + $0xa8] sm:$0xff]  ;;  %v1095_v24 = vld [vmem:[%s5120_s15 + $0xd8] sm:$0xff] }
 0x112   : > { %3921 = vmatpush3.bf16.msra.mxu1 %v4137_v10  ;;  %3612 = vmatpush3.bf16.msra.mxu0 %v4137_v10  ;;  %v4146_v10 = vld [vmem:[%s5163_s10] sm:$0xff]   ;;  %v1366_v4 = vld [vmem:[%s5130_s19 + $0x90] sm:$0xff]  ;;  %v1369_v8 = vld [vmem:[%s5130_s19 + $0xa8] sm:$0xff] }
 0x113   : > { %3914 = vmatprep.subr.bf16.mxu1 %v4138_v11  ;;  %3613 = vmatprep.subr.bf16.mxu0 %v4138_v11  ;;  %v1389_v9 = vpack.c.bf16 %v1367_v5, %v1366_v4  ;;  %v1373_v20 = vld [vmem:[%s5130_s19 + $0xc8] sm:$0xff]  ;;  %v1094_v23 = vld [vmem:[%s5120_s15 + $0xd0] sm:$0xff]  ;;  %v5298_v41 = vld [vmem:[%s614_s11] ss:$0 sm:$0xff] }
 0x114   : > { %v1377_v32 = vld [vmem:[%s5130_s19 + $0xe8] sm:$0xff] }
 0x116   : > { %3922 = vmatpush3.bf16.msra.mxu1 %v4138_v11  ;;  %3614 = vmatpush3.bf16.msra.mxu0 %v4138_v11  ;;  %v4153_v11 = vld [vmem:[%s5168_s29 + $0x8] sm:$0xff]  }
 0x117   : > { %3647 = vmatprep.subr.bf16.mxu1 %v4139_v14  ;;  %3695 = vmatprep.subr.bf16.mxu0 %v4147_v29 }
 0x119   : > { %3632 = vmatmul.mubr.bf16.vlgmr.msra.gmra.mxu1 %v829_v17  ;;  %3616 = vmatmul.mubr.bf16.vlgmr.msra.gmra.mxu0 %v821_v28  ;;  %v1072_v17 = vld [vmem:[%s5120_s15 + $0x20] sm:$0xff]  ;;  %v1075_v28 = vld [vmem:[%s5120_s15 + $0x38] sm:$0xff] }
 0x11a   : > { %3648 = vmatpush3.bf16.msra.mxu1 %v4139_v14  ;;  %3635 = vmatprep.mubr.bf16.mxu1 %v830_v19  ;;  %v1070_v14 = vld [vmem:[%s5120_s15 + $0x10] sm:$0xff] }
 0x11b   : > { %3649 = vmatprep.subr.bf16.mxu1 %v4140_v18  ;;  %3696 = vmatpush3.bf16.msra.mxu0 %v4147_v29  ;;  %v1101_v19 = vpack.c.bf16 %v1071_v15, %v1070_v14  ;;  %v1076_v29 = vld [vmem:[%s5120_s15 + $0x40] sm:$0xff]  ;;  %v1093_v14 = vld [vmem:[%s5120_s15 + $0xc8] sm:$0xff] }
 0x11c   : > { %3619 = vmatprep.mubr.bf16.mxu0 %v822_v35  ;;  %3697 = vmatprep.subr.bf16.mxu0 %v4148_v30  ;;  %v1356_v35 = vld [vmem:[%s5130_s19 + $0x40] sm:$0xff] }
 0x11e   : > { %3650 = vmatpush3.bf16.msra.mxu1 %v4140_v18  ;;  %v1073_v18 = vld [vmem:[%s5120_s15 + $0x28] sm:$0xff] }
 0x11f   : > { %3651 = vmatprep.subr.bf16.mxu1 %v4141_v27  ;;  %3698 = vmatpush3.bf16.msra.mxu0 %v4148_v30  ;;  %v1102_v22 = vpack.c.bf16 %v1073_v18, %v1072_v17  ;;  %v1077_v30 = vld [vmem:[%s5120_s15 + $0x48] sm:$0xff]  ;;  %v1371_v17 = vld [vmem:[%s5130_s19 + $0xb8] sm:$0xff] }
 0x120   : > { %3699 = vmatprep.subr.bf16.mxu0 %v4149_v43  ;;  %v1104_v34 = vpack.c.bf16 %v1077_v30, %v1076_v29  ;;  %v1375_v29 = vld [vmem:[%s5130_s19 + $0xd8] sm:$0xff] }
 0x121   : > { %3636 = vmatmul.mubr.bf16.gmra.mxu1 %v831_v36  ;;  %3620 = vmatmul.mubr.bf16.gmra.mxu0 %v823_v45  ;;  %v1357_v36 = vld [vmem:[%s5130_s19 + $0x48] sm:$0xff]  ;;  %v1359_v45 = vld [vmem:[%s5130_s19 + $0x58] sm:$0xff] }
 0x122   : > { %3652 = vmatpush3.bf16.msra.mxu1 %v4141_v27  ;;  %3639 = vmatprep.mubr.bf16.mxu1 %v832_v40  ;;  %v1074_v27 = vld [vmem:[%s5120_s15 + $0x30] sm:$0xff]  ;;  %v1384_v38 = vpack.c.bf16 %v1357_v36, %v1356_v35  ;;  %v1079_v40 = vld [vmem:[%s5120_s15 + $0x58] sm:$0xff] }
 0x123   : > { %3653 = vmatprep.subr.bf16.mxu1 %v4142_v39  ;;  %3700 = vmatpush3.bf16.msra.mxu0 %v4149_v43  ;;  %v1103_v31 = vpack.c.bf16 %v1075_v28, %v1074_v27  ;;  %v1113_v27 = vpack.c.bf16 %v1095_v24, %v1094_v23  ;;  %v1374_v28 = vld [vmem:[%s5130_s19 + $0xd0] sm:$0xff]  ;;  %v1099_v36 = vld [vmem:[%s5120_s15 + $0xf8] sm:$0xff] }
 0x124   : > { %3623 = vmatprep.mubr.bf16.mxu0 %v824_v49  ;;  %3701 = vmatprep.subr.bf16.mxu0 %v4150_v50  ;;  %v1385_v49 = vpack.c.bf16 %v1359_v45, %v1358_v44  ;;  %v1393_v33 = vpack.c.bf16 %v1375_v29, %v1374_v28  ;;  %v1098_v35 = vld [vmem:[%s5120_s15 + $0xf0] sm:$0xff] }
 0x126   : > { %3654 = vmatpush3.bf16.msra.mxu1 %v4142_v39  ;;  %v1078_v39 = vld [vmem:[%s5120_s15 + $0x50] sm:$0xff] }
 0x127   : > { %3655 = vmatprep.subr.bf16.mxu1 %v4143_v47  ;;  %3702 = vmatpush3.bf16.msra.mxu0 %v4150_v50  ;;  %v1105_v43 = vpack.c.bf16 %v1079_v40, %v1078_v39  ;;  %v1379_v39 = vld [vmem:[%s5130_s19 + $0xf8] sm:$0xff] }
 0x128   : > { %3703 = vmatprep.subr.bf16.mxu0 %v4151_v59 }
 0x129   : > { %3640 = vmatmul.mubr.bf16.gmra.mxu1 %v833_v52  ;;  %3624 = vmatmul.mubr.bf16.gmra.mxu0 %v825_v60  ;;  %v1083_v52 = vld [vmem:[%s5120_s15 + $0x78] sm:$0xff]  ;;  %v1365_v60 = vld [vmem:[%s5130_s19 + $0x88] sm:$0xff] }
 0x12a   : > { %3656 = vmatpush3.bf16.msra.mxu1 %v4143_v47  ;;  %3643 = vmatprep.mubr.bf16.mxu1 %v834_v55  ;;  %v1360_v47 = vld [vmem:[%s5130_s19 + $0x60] sm:$0xff]  ;;  %v1107_v55 = vpack.c.bf16 %v1083_v52, %v1082_v51 }
 0x12b   : > { %3657 = vmatprep.subr.bf16.mxu1 %v4144_v58  ;;  %3704 = vmatpush3.bf16.msra.mxu0 %v4151_v59  ;;  %v1386_v50 = vpack.c.bf16 %v1361_v48, %v1360_v47  ;;  %v1364_v59 = vld [vmem:[%s5130_s19 + $0x80] sm:$0xff] }
 0x12c   : > { %3627 = vmatprep.mubr.bf16.mxu0 %v826_v61  ;;  %3705 = vmatprep.subr.bf16.mxu0 %v4152_v0  ;;  %v1387_v61 = vpack.c.bf16 %v1363_v57, %v1362_v56  ;;  %v1388_v62 = vpack.c.bf16 %v1365_v60, %v1364_v59 }
 0x12e   : > { %3658 = vmatpush3.bf16.msra.mxu1 %v4144_v58  ;;  %v1108_v58 = vpack.c.bf16 %v1085_v54, %v1084_v53 }
 0x12f   : > { %3659 = vmatprep.subr.bf16.mxu1 %v4145_v1  ;;  %3706 = vmatpush3.bf16.msra.mxu0 %v4152_v0  ;;  %v1087_v0 = vld [vmem:[%s5120_s15 + $0x98] sm:$0xff] }
 0x130   : > { %3707 = vmatprep.subr.bf16.mxu0 %v4153_v11  ;;  %v1109_v3 = vpack.c.bf16 %v1087_v0, %v1086_v63 }
 0x131   : > { %3644 = vmatmul.mubr.bf16.gmra.mxu1 %v835_v6  ;;  %3628 = vmatmul.mubr.bf16.gmra.mxu0 %v827_v12  ;;  %v1091_v12 = vld [vmem:[%s5120_s15 + $0xb8] sm:$0xff] }
 0x132   : > { %3660 = vmatpush3.bf16.msra.mxu1 %v4145_v1  ;;  %3663 = vmatprep.mubr.bf16.mxu1 %v1100_v7  ;;  %v1088_v1 = vld [vmem:[%s5120_s15 + $0xa0] sm:$0xff] }
 0x133   : > { %3661 = vmatprep.subr.bf16.mxu1 %v4146_v10  ;;  %3708 = vmatpush3.bf16.msra.mxu0 %v4153_v11  ;;  %v1110_v6 = vpack.c.bf16 %v1089_v2, %v1088_v1  ;;  %v1368_v7 = vld [vmem:[%s5130_s19 + $0xa0] sm:$0xff]  ;;  %v1090_v11 = vld [vmem:[%s5120_s15 + $0xb0] sm:$0xff] }
 0x134   : > { %3711 = vmatprep.mubr.bf16.mxu0 %v1380_v13  ;;  %3709 = vmatprep.subr.bf16.mxu0 %v4154_v16  ;;  %v1092_v13 = vld [vmem:[%s5120_s15 + $0xc0] sm:$0xff]  ;;  %v1111_v15 = vpack.c.bf16 %v1091_v12, %v1090_v11 }
 0x135   : > { %v1112_v18 = vpack.c.bf16 %v1093_v14, %v1092_v13 }
 0x136   : > { %3662 = vmatpush3.bf16.msra.mxu1 %v4146_v10  ;;  %v1390_v10 = vpack.c.bf16 %v1369_v8, %v1368_v7 }
 0x137   : > { %3710 = vmatpush3.bf16.msra.mxu0 %v4154_v16  ;;  %v1370_v16 = vld [vmem:[%s5130_s19 + $0xb0] sm:$0xff] }
 0x138   : > { %v1391_v21 = vpack.c.bf16 %v1371_v17, %v1370_v16 }
 0x139   : > { %3664 = vmatmul.mubr.bf16.vlgmr.msra.gmra.mxu1 %v1101_v19  ;;  %v1372_v19 = vld [vmem:[%s5130_s19 + $0xc0] sm:$0xff] }
 0x13a   : > { %3667 = vmatprep.mubr.bf16.mxu1 %v1102_v22  ;;  %3712 = vmatmul.mubr.bf16.vlgmr.msra.gmra.mxu0 %v1381_v25  ;;  %v1392_v22 = vpack.c.bf16 %v1373_v20, %v1372_v19  ;;  %v1096_v25 = vld [vmem:[%s5120_s15 + $0xe0] sm:$0xff] }
 0x13b   : > { %3715 = vmatprep.mubr.bf16.mxu0 %v1382_v26  ;;  %v1097_v26 = vld [vmem:[%s5120_s15 + $0xe8] sm:$0xff]  ;;  %s6322_s15 = smov %s6305_s17 }
 0x13c   : > { %v1114_v30 = vpack.c.bf16 %v1097_v26, %v1096_v25 }
 0x141   : > { %3668 = vmatmul.mubr.bf16.gmra.mxu1 %v1103_v31  ;;  %v1376_v31 = vld [vmem:[%s5130_s19 + $0xe0] sm:$0xff] }
 0x142   : > { %3671 = vmatprep.mubr.bf16.mxu1 %v1104_v34  ;;  %3716 = vmatmul.mubr.bf16.gmra.mxu0 %v1383_v37  ;;  %v1394_v34 = vpack.c.bf16 %v1377_v32, %v1376_v31  ;;  %v1115_v37 = vpack.c.bf16 %v1099_v36, %v1098_v35 }
 0x143   : > { %3719 = vmatprep.mubr.bf16.mxu0 %v1384_v38  ;;  %v1378_v38 = vld [vmem:[%s5130_s19 + $0xf0] sm:$0xff] }
 0x144   : > { %v1395_v40 = vpack.c.bf16 %v1379_v39, %v1378_v38 }
 0x149   : > { %3672 = vmatmul.mubr.bf16.gmra.mxu1 %v1105_v43 }
 0x14a   : > { %3675 = vmatprep.mubr.bf16.mxu1 %v1106_v46  ;;  %3720 = vmatmul.mubr.bf16.gmra.mxu0 %v1385_v49 }
 0x14b   : > { %3723 = vmatprep.mubr.bf16.mxu0 %v1386_v50 }
 0x151   : > { %3676 = vmatmul.mubr.bf16.gmra.mxu1 %v1107_v55 }
 0x152   : > { %3679 = vmatprep.mubr.bf16.mxu1 %v1108_v58  ;;  %3724 = vmatmul.mubr.bf16.gmra.mxu0 %v1387_v61 }
 0x153   : > { %3727 = vmatprep.mubr.bf16.mxu0 %v1388_v62 }
 0x159   : > { %3680 = vmatmul.mubr.bf16.gmra.mxu1 %v1109_v3 }
 0x15a   : > { %3683 = vmatprep.mubr.bf16.mxu1 %v1110_v6  ;;  %3728 = vmatmul.mubr.bf16.gmra.mxu0 %v1389_v9 }
 0x15b   : > { %3731 = vmatprep.mubr.bf16.mxu0 %v1390_v10 }
 0x161   : > { %3684 = vmatmul.mubr.bf16.gmra.mxu1 %v1111_v15 }
 0x162   : > { %3687 = vmatprep.mubr.bf16.mxu1 %v1112_v18  ;;  %3732 = vmatmul.mubr.bf16.gmra.mxu0 %v1391_v21 }
 0x163   : > { %3735 = vmatprep.mubr.bf16.mxu0 %v1392_v22 }
 0x169   : > { %3688 = vmatmul.mubr.bf16.gmra.mxu1 %v1113_v27 }
 0x16a   : > { %3691 = vmatprep.mubr.bf16.mxu1 %v1114_v30  ;;  %3736 = vmatmul.mubr.bf16.gmra.mxu0 %v1393_v33 }
 0x16b   : > { %3739 = vmatprep.mubr.bf16.mxu0 %v1394_v34 }
 0x171   : > { %3692 = vmatmul.mubr.bf16.gmra.mxu1 %v1115_v37 }
 0x172   : > { %3740 = vmatmul.mubr.bf16.gmra.mxu0 %v1395_v40 }
 0x1d9   : > { %v3633_v42 = vpop.f32.mrf.mxu1  ;;  %v3617_v45 = vpop.f32.mrf.mxu0 }
 0x1da   : > { %v5301_v43 = vadd.f32 %v3633_v42, %v5298_v41  ;;  %v5304_v47 = vadd.f32 %v3617_v45, %v5298_v41 }
 0x1db   : > { %v1005_v44 = vpop.f32.mrf.mxu1  ;;  %v941_v49 = vpop.f32.mrf.mxu0 }
 0x1dc   : > { %v1006_v51 = vadd.f32 %v5298_v41, %v1005_v44  ;;  %v942_v56 = vadd.f32 %v5298_v41, %v941_v49 }
 0x1dd   : > { %v3634_v46 = vpop.f32.mrf.mxu1  ;;  %v3618_v54 = vpop.f32.mrf.mxu0 }
 0x1de   : > { %v5307_v48 = vadd.f32 %v3634_v46, %v5298_v41  ;;  %v5315_v57 = vadd.f32 %v3618_v54, %v5298_v41 }
 0x1df   : > { %v1008_v50 = vpop.f32.mrf.mxu1  ;;  %v944_v60 = vpop.f32.mrf.mxu0 }
 0x1e0   : > { %v1009_v53 = vadd.f32 %v5298_v41, %v1008_v50  ;;  %v945_v63 = vadd.f32 %v5298_v41, %v944_v60 }
 0x1e1   : > { %v3637_v55 = vpop.f32.mrf.mxu1  ;;  %v3621_v1 = vpop.f32.mrf.mxu0 }
 0x1e2   : > { %v1636_v58 = vpack.c.bf16 %v1009_v53, %v1006_v51  ;;  %v5318_v59 = vadd.f32 %v3637_v55, %v5298_v41  ;;  %v1628_v3 = vpack.c.bf16 %v945_v63, %v942_v56  ;;  %v5328_v4 = vadd.f32 %v3621_v1, %v5298_v41  ;;  %v5404_v53 = vld [vmem:[%s6304_s7] ss:$0 sm:$0xff] }
 0x1e3   : > { %v1021_v61 = vpop.f32.mrf.mxu1  ;;  %v5333_v6 = vpop.f32.mrf.mxu0 }
 0x1e4   : > { %v5324_v0 = vadd.f32 %v5298_v41, %v1021_v61  ;;  %3791 = vmatprep.mubr.msk.bf16.mxu0 %vm1660_vm0, %v1636_v58  ;;  %3759 = vmatprep.mubr.msk.bf16.mxu1 %vm1660_vm0, %v1628_v3 }
 0x1e5   : > { %v3638_v2 = vpop.f32.mrf.mxu1  ;;  %v3622_v10 = vpop.f32.mrf.mxu0 }
 0x1e6   : > { %v5331_v5 = vadd.f32 %v3638_v2, %v5298_v41  ;;  %v5342_v12 = vadd.f32 %v3622_v10, %v5298_v41 }
 0x1e7   : > { %v1024_v7 = vpop.f32.mrf.mxu1  ;;  %v5349_v15 = vpop.f32.mrf.mxu0 }
 0x1e8   : > { %v5339_v9 = vadd.f32 %v5298_v41, %v1024_v7 }
 0x1e9   : > { %v3641_v11 = vpop.f32.mrf.mxu1  ;;  %v3625_v19 = vpop.f32.mrf.mxu0 }
 0x1ea   : > { %v5347_v14 = vadd.f32 %v3641_v11, %v5298_v41  ;;  %v5357_v21 = vadd.f32 %v3625_v19, %v5298_v41 }
 0x1eb   : > { %v1037_v16 = vpop.f32.mrf.mxu1  ;;  %v5362_v23 = vpop.f32.mrf.mxu0 }
 0x1ec   : > { %6299 = vst [vmem:[#allocation49_spill] sm:$0xff] %v5347_v14  ;;  %v5354_v18 = vadd.f32 %v5298_v41, %v1037_v16 }
 0x1ed   : > { %v3642_v20 = vpop.f32.mrf.mxu1  ;;  %v3626_v27 = vpop.f32.mrf.mxu0 }
 0x1ee   : > { %v5360_v22 = vadd.f32 %v3642_v20, %v5298_v41  ;;  %v5370_v29 = vadd.f32 %v3626_v27, %v5298_v41 }
 0x1ef   : > { %v1040_v24 = vpop.f32.mrf.mxu1  ;;  %v5377_v32 = vpop.f32.mrf.mxu0 }
 0x1f0   : > { %v5367_v26 = vadd.f32 %v5298_v41, %v1040_v24 }
 0x1f1   : > { %v3645_v28 = vpop.f32.mrf.mxu1  ;;  %v3629_v36 = vpop.f32.mrf.mxu0 }
 0x1f2   : > { %v5375_v31 = vadd.f32 %v3645_v28, %v5298_v41  ;;  %v5385_v38 = vadd.f32 %v3629_v36, %v5298_v41 }
 0x1f3   : > { %v1053_v33 = vpop.f32.mrf.mxu1  ;;  %v5390_v40 = vpop.f32.mrf.mxu0 }
 0x1f4   : > { %6300 = vst [vmem:[#allocation50_spill] sm:$0xff] %v5375_v31  ;;  %v5382_v35 = vadd.f32 %v5298_v41, %v1053_v33 }
 0x1f5   : > { %v3646_v37 = vpop.f32.mrf.mxu1  ;;  %v3630_v46 = vpop.f32.mrf.mxu0 }
 0x1f6   : > { %6301 = vst [vmem:[#allocation51_spill] sm:$0xff] %v5382_v35  ;;  %v5388_v39 = vadd.f32 %v3646_v37, %v5298_v41  ;;  %v5398_v50 = vadd.f32 %v3630_v46, %v5298_v41 }
 0x1f7   : > { %v1056_v42 = vpop.f32.mrf.mxu1  ;;  %v5422_v28 = vpop.f32.mrf.mxu0 }
 0x1f8   : > { %6302 = vst [vmem:[#allocation52_spill] sm:$0xff] %v5388_v39  ;;  %v5395_v45 = vadd.f32 %v5298_v41, %v1056_v42 }
 0x1f9   : > { %v3665_v49 = vpop.f32.mrf.mxu1 }
 0x1fa   : > { %6303 = vst [vmem:[#allocation53_spill] sm:$0xff] %v5395_v45  ;;  %v1230_v58 = vadd.f32 %v3665_v49, %v5404_v53  ;;  %v5424_v36 = vpop.f32.mrf.mxu0 }
 0x1fb   : > { %v1221_v54 = vpop.f32.mrf.mxu1 }
 0x1fc   : > { %v1222_v63 = vadd.f32 %v5404_v53, %v1221_v54  ;;  %v5426_v46 = vpop.f32.mrf.mxu0 }
 0x1fd   : > { %v3666_v56 = vpop.f32.mrf.mxu1 }
 0x1fe   : > { %v1233_v60 = vadd.f32 %v3666_v56, %v5404_v53 }
 0x1ff   : > { %v1224_v61 = vpop.f32.mrf.mxu1 }
 0x200   : > { %v5411_v1 = vpack.c.bf16 %v1233_v60, %v1230_v58  ;;  %v1225_v2 = vadd.f32 %v5404_v53, %v1224_v61 }
 0x201   : > { %v5414_v3 = vpop.f32.mrf.mxu1 }
 0x202   : > { %v5416_v7 = vpack.c.bf16 %v1225_v2, %v1222_v63  ;;  %v5432_v2 = vpop.f32.mrf.mxu0  ;;  %v1246_v34 = vadd.f32 %v5414_v3, %v5404_v53 }
 0x203   : > { %v5418_v10 = vpop.f32.mrf.mxu1 }
 0x205   : > { %v3670_v11 = vpop.f32.mrf.mxu1 }
 0x206   : > { %v1249_v55 = vadd.f32 %v3670_v11, %v5404_v53 }
 0x207   : > { %v5420_v16 = vpop.f32.mrf.mxu1 }
 0x208   : > { %v1647_v62 = vpack.c.bf16 %v1249_v55, %v1246_v34  ;;  %v1241_v11 = vadd.f32 %v5404_v53, %v5420_v16  ;;  %v1238_v34 = vadd.f32 %v5404_v53, %v5418_v10 }
 0x209   : > { %v3673_v19 = vpop.f32.mrf.mxu1 }
 0x20a   : > { %v1646_v45 = vpack.c.bf16 %v1241_v11, %v1238_v34  ;;  %v1695_v16 = vsel %vm1660_vm0, %v1647_v62, 0 }
 0x20b   : > { %v1253_v20 = vpop.f32.mrf.mxu1 }
 0x20c   : > { %v1692_v11 = vsel %vm1660_vm0, %v1646_v45, 0 }
 0x20d   : > { %v3674_v24 = vpop.f32.mrf.mxu1 }
 0x20f   : > { %v1256_v27 = vpop.f32.mrf.mxu1 }
 0x211   : > { %v3677_v33 = vpop.f32.mrf.mxu1 }
 0x212   : > { %v1278_v49 = vadd.f32 %v3677_v33, %v5404_v53 }
 0x213   : > { %v1269_v37 = vpop.f32.mrf.mxu1 }
 0x214   : > { %v1270_v58 = vadd.f32 %v5404_v53, %v1269_v37 }
 0x215   : > { %v3678_v42 = vpop.f32.mrf.mxu1 }
 0x216   : > { %v1281_v54 = vadd.f32 %v3678_v42, %v5404_v53  ;;  %v5439_v42 = vpop.f32.mrf.mxu0 }
 0x217   : > { %v1272_v56 = vpop.f32.mrf.mxu1 }
 0x218   : > { %v1651_v60 = vpack.c.bf16 %v1281_v54, %v1278_v49  ;;  %v1273_v61 = vadd.f32 %v5404_v53, %v1272_v56  ;;  %v1265_v49 = vadd.f32 %v3674_v24, %v5404_v53 }
 0x219   : > { %v3681_v63 = vpop.f32.mrf.mxu1 }
 0x21a   : > { %v1650_v44 = vpack.c.bf16 %v1273_v61, %v1270_v58  ;;  %v1294_v51 = vadd.f32 %v3681_v63, %v5404_v53  ;;  %3923 = vmatprep.subr.msk.bf16.mxu1 %vm1660_vm0, %v1651_v60  ;;  %v1707_v25 = vsel %vm1660_vm0, %v1651_v60, 0  ;;  %v1262_v58 = vadd.f32 %v3673_v19, %v5404_v53 }
 0x21b   : > { %v1285_v30 = vpop.f32.mrf.mxu1  ;;  %3744 = vmatpush3.bf16.xpose.msra.mxu1 %v1707_v25  ;;  %v5449_v25 = vpop.f32.mrf.mxu0  ;;  %v1257_v19 = vadd.f32 %v5404_v53, %v1256_v27 }
 0x21c   : > { %v1286_v33 = vadd.f32 %v5404_v53, %v1285_v30  ;;  %3924 = vmatprep.subr.msk.bf16.mxu1 %vm1660_vm0, %v1650_v44  ;;  %v1649_v30 = vpack.c.bf16 %v1265_v49, %v1262_v58  ;;  %v1704_v13 = vsel %vm1660_vm0, %v1650_v44, 0 }
 0x21d   : > { %v3682_v37 = vpop.f32.mrf.mxu1 }
 0x21e   : > { %v1297_v54 = vadd.f32 %v3682_v37, %v5404_v53  ;;  %v1701_v44 = vsel %vm1660_vm0, %v1649_v30, 0 }
 0x21f   : > { %v1288_v56 = vpop.f32.mrf.mxu1 }
 0x220   : > { %v5444_v61 = vpack.c.bf16 %v1297_v54, %v1294_v51  ;;  %v1289_v60 = vadd.f32 %v5404_v53, %v1288_v56  ;;  %v5459_v51 = vpop.f32.mrf.mxu0  ;;  %v1254_v54 = vadd.f32 %v5404_v53, %v1253_v20 }
 0x221   : > { %v5447_v63 = vpop.f32.mrf.mxu1 }
 0x222   : > { %v5451_v8 = vpack.c.bf16 %v1289_v60, %v1286_v33  ;;  %v5465_v33 = vpop.f32.mrf.mxu0  ;;  %v1648_v56 = vpack.c.bf16 %v1257_v19, %v1254_v54 }
 0x223   : > { %v5454_v52 = vpop.f32.mrf.mxu1  ;;  %3746 = vmatpush3.bf16.xpose.msra.mxu1 %v1704_v13 }
 0x224   : > { %3925 = vmatprep.subr.msk.bf16.mxu1 %vm1660_vm0, %v1649_v30  ;;  %v5469_v60 = vpop.f32.mrf.mxu0  ;;  %v1698_v19 = vsel %vm1660_vm0, %v1648_v56, 0 }
 0x225   : > { %v5457_v24 = vpop.f32.mrf.mxu1 }
 0x226   : > { %v5474_v17 = vpop.f32.mrf.mxu0 }
 0x227   : > { %v5462_v37 = vpop.f32.mrf.mxu1 }
 0x229   : > { %v3689_v49 = vpop.f32.mrf.mxu1 }
 0x22b   : > { %v1317_v58 = vpop.f32.mrf.mxu1  ;;  %3748 = vmatpush3.bf16.xpose.msra.mxu1 %v1701_v44  ;;  %v5478_v44 = vpop.f32.mrf.mxu0 }
 0x22c   : > { %3926 = vmatprep.subr.msk.bf16.mxu1 %vm1660_vm0, %v1648_v56 }
 0x22d   : > { %v3690_v13 = vpop.f32.mrf.mxu1  ;;  %v3722_v35 = vpop.f32.mrf.mxu0 }
 0x22f   : > { %v1320_v27 = vpop.f32.mrf.mxu1  ;;  %v1536_v10 = vpop.f32.mrf.mxu0 }
 0x230   : > { %v1321_v34 = vadd.f32 %v5404_v53, %v1320_v27 }
 0x231   : > { %v3693_v20 = vpop.f32.mrf.mxu1 }
 0x232   : > { %v1342_v31 = vadd.f32 %v3693_v20, %v5404_v53 }
 0x233   : > { %v1333_v30 = vpop.f32.mrf.mxu1  ;;  %3750 = vmatpush3.bf16.xpose.msra.mxu1 %v1698_v19 }
 0x234   : > { %3927 = vmatprep.subr.msk.bf16.mxu1 %vm1660_vm0, %v1647_v62  ;;  %v1334_v55 = vadd.f32 %v5404_v53, %v1333_v30  ;;  %v3725_v30 = vpop.f32.mrf.mxu0 }
 0x235   : > { %v3694_v54 = vpop.f32.mrf.mxu1 }
 0x236   : > { %v1345_v3 = vadd.f32 %v3694_v54, %v5404_v53 }
 0x237   : > { %v1336_v39 = vpop.f32.mrf.mxu1 }
 0x238   : > { %v1659_v56 = vpack.c.bf16 %v1345_v3, %v1342_v31  ;;  %v1337_v19 = vadd.f32 %v5404_v53, %v1336_v39  ;;  %v1329_v31 = vadd.f32 %v3690_v13, %v5404_v53  ;;  %v1326_v39 = vadd.f32 %v3689_v49, %v5404_v53  ;;  %v1549_v3 = vpop.f32.mrf.mxu0  ;;  %v5504_v49 = vld [vmem:[%s6305_s17] ss:$0 sm:$0xff] }
 0x239   : > { %v1318_v13 = vadd.f32 %v5404_v53, %v1317_v58  ;;  %v1558_v27 = vadd.f32 %v3725_v30, %v5504_v49  ;;  %v961_v30 = vadd.f32 %v5298_v41, %v5349_v15 }
 0x23a   : > { %v1658_v14 = vpack.c.bf16 %v1337_v19, %v1334_v55  ;;  %3931 = vmatprep.subr.msk.bf16.mxu0 %vm1660_vm0, %v1659_v56  ;;  %v1852_v20 = vsel %vm1660_vm0, %v1659_v56, 0  ;;  %v1657_v54 = vpack.c.bf16 %v1329_v31, %v1326_v39  ;;  %v3726_v55 = vpop.f32.mrf.mxu0  ;;  %v1313_v19 = vadd.f32 %v5457_v24, %v5404_v53 }
 0x23b   : > { %3752 = vmatpush3.bf16.xpose.msra.mxu1 %v1695_v16  ;;  %3776 = vmatpush3.bf16.xpose.msra.mxu0 %v1852_v20  ;;  %v1656_v56 = vpack.c.bf16 %v1321_v34, %v1318_v13  ;;  %v1561_v58 = vadd.f32 %v3726_v55, %v5504_v49  ;;  %v1310_v16 = vadd.f32 %v5447_v63, %v5404_v53  ;;  %v1686_v31 = vsel %vm1660_vm0, %v5416_v7, 0 }
 0x23c   : > { %3928 = vmatprep.subr.msk.bf16.mxu1 %vm1660_vm0, %v1646_v45  ;;  %3932 = vmatprep.subr.msk.bf16.mxu0 %vm1660_vm0, %v1658_v14  ;;  %v1849_v62 = vsel %vm1660_vm0, %v1658_v14, 0  ;;  %v1689_v14 = vsel %vm1660_vm0, %v5411_v1, 0  ;;  %v1846_v45 = vsel %vm1660_vm0, %v1657_v54, 0  ;;  %v1550_v63 = vadd.f32 %v5504_v49, %v1549_v3 }
 0x23d   : > { %v1655_v20 = vpack.c.bf16 %v1313_v19, %v1310_v16  ;;  %v1843_v39 = vsel %vm1660_vm0, %v1656_v56, 0  ;;  %v1302_v34 = vadd.f32 %v5404_v53, %v5454_v52  ;;  %v1545_v13 = vadd.f32 %v3722_v35, %v5504_v49 }
 0x23e   : > { %v977_v52 = vadd.f32 %v5298_v41, %v5377_v32  ;;  %v6307_v32 = vpack.c.bf16 %v5342_v12, %v5328_v4  ;;  %v1518_v4 = vadd.f32 %v5504_v49, %v5459_v51  ;;  %v1834_v51 = vsel %vm1660_vm0, %v5444_v61, 0 }
 0x23f   : > { %v1840_v3 = vsel %vm1660_vm0, %v1655_v20, 0 }
 0x243   : > { %3754 = vmatpush3.bf16.xpose.msra.mxu1 %v1692_v11  ;;  %3778 = vmatpush3.bf16.xpose.msra.mxu0 %v1849_v62  ;;  %v958_v11 = vadd.f32 %v5298_v41, %v5333_v6  ;;  %v1542_v6 = vadd.f32 %v5474_v17, %v5504_v49  ;;  %v1534_v17 = vadd.f32 %v5504_v49, %v5478_v44 }
 0x244   : > { %3929 = vmatprep.subr.msk.bf16.mxu1 %vm1660_vm0, %v5411_v1  ;;  %3933 = vmatprep.subr.msk.bf16.mxu0 %vm1660_vm0, %v1657_v54  ;;  %v2326_v1 = vpack.c.bf16 %v1561_v58, %v1558_v27  ;;  %v1552_v54 = vpop.f32.mrf.mxu0  ;;  %v6308_v27 = vpack.c.bf16 %v5370_v29, %v5357_v21  ;;  %v6309_v29 = vpack.c.bf16 %v5398_v50, %v5385_v38  ;;  %v6314_v50 = vld [vmem:[#allocation49_spill] sm:$0xff]  ;;  %v6317_v58 = vld [vmem:[#allocation51_spill] sm:$0xff] }
 0x245   : > { %v1553_v24 = vadd.f32 %v5504_v49, %v1552_v54  ;;  %v1630_v62 = vpack.c.bf16 %v961_v30, %v958_v11  ;;  %v6312_v38 = vpack.c.bf16 %v5331_v5, %v5318_v59  ;;  %v6319_v59 = vld [vmem:[#allocation52_spill] sm:$0xff]  ;;  %v6320_v5 = vld [vmem:[#allocation50_spill] sm:$0xff] }
 0x246   : > { %v6321_v19 = vpack.c.bf16 %v6319_v59, %v6320_v5 }
 0x247   : > { %v2325_v15 = vpack.c.bf16 %v1553_v24, %v1550_v63 }
 0x24b   : > { %3756 = vmatpush3.bf16.xpose.msra.mxu1 %v1689_v14  ;;  %3780 = vmatpush3.bf16.xpose.msra.mxu0 %v1846_v45 }
 0x24c   : > { %3930 = vmatprep.subr.msk.bf16.mxu1 %vm1660_vm0, %v5416_v7  ;;  %3934 = vmatprep.subr.msk.bf16.mxu0 %vm1660_vm0, %v1656_v56  ;;  %v1305_v7 = vadd.f32 %v5404_v53, %v5462_v37  ;;  %v6306_v56 = vpack.c.bf16 %v5315_v57, %v5304_v47  ;;  %v974_v37 = vadd.f32 %v5298_v41, %v5362_v23 }
 0x24d   : > { %v2324_v47 = vpack.c.bf16 %v1545_v13, %v1542_v6  ;;  %v1537_v57 = vadd.f32 %v5504_v49, %v1536_v10  ;;  %v1526_v23 = vadd.f32 %v5449_v25, %v5504_v49  ;;  %v1529_v53 = vadd.f32 %v5465_v33, %v5504_v49 }
 0x24e   : > { %v1654_v55 = vpack.c.bf16 %v1305_v7, %v1302_v34  ;;  %v1632_v35 = vpack.c.bf16 %v977_v52, %v974_v37  ;;  %v990_v10 = vadd.f32 %v5298_v41, %v5390_v40  ;;  %v993_v25 = vadd.f32 %v5298_v41, %v5422_v28 }
 0x24f   : > { %v2323_v14 = vpack.c.bf16 %v1537_v57, %v1534_v17  ;;  %v2322_v12 = vpack.c.bf16 %v1529_v53, %v1526_v23  ;;  %v1521_v33 = vadd.f32 %v5504_v49, %v5469_v60  ;;  %v1510_v40 = vadd.f32 %v5424_v36, %v5504_v49 }
 0x250   : > { %v1837_v44 = vsel %vm1660_vm0, %v1654_v55, 0  ;;  %v1634_v45 = vpack.c.bf16 %v993_v25, %v990_v10  ;;  %v1513_v41 = vadd.f32 %v5432_v2, %v5504_v49  ;;  %v1502_v36 = vadd.f32 %v5504_v49, %v5426_v46 }
 0x251   : > { %v2321_v28 = vpack.c.bf16 %v1521_v33, %v1518_v4  ;;  %v1505_v60 = vadd.f32 %v5504_v49, %v5439_v42  ;;  %v6310_v46 = vpack.c.bf16 %v5307_v48, %v5301_v43  ;;  %v6311_v42 = vpack.c.bf16 %v5339_v9, %v5324_v0  ;;  %v6316_v48 = vld [vmem:[#allocation53_spill] sm:$0xff]  ;;  %v5616_v9 = vpop.f32.mrf.mxu0 }
 0x252   : > { %v2320_v2 = vpack.c.bf16 %v1513_v41, %v1510_v40  ;;  %v6315_v43 = vpack.c.bf16 %v5360_v22, %v6314_v50  ;;  %v6318_v0 = vpack.c.bf16 %v6316_v48, %v6317_v58 }
 0x253   : > { %3758 = vmatpush3.bf16.xpose.msra.mxu1 %v1686_v31  ;;  %3782 = vmatpush3.bf16.xpose.msra.mxu0 %v1843_v39  ;;  %v2319_v21 = vpack.c.bf16 %v1505_v60, %v1502_v36 }
 0x254   : > { %3935 = vmatprep.subr.msk.bf16.mxu0 %vm1660_vm0, %v1655_v20  ;;  %3807 = vmatprep.subr.bf16.mxu1 %v2326_v1 }
 0x25a   : > { %3760 = vmatmul.mubr.msk.bf16.vlgmr.msra.gmra.mxu1 %vm1660_vm0, %v6306_v56 }
 0x25b   : > { %3784 = vmatpush3.bf16.xpose.msra.mxu0 %v1840_v3  ;;  %3763 = vmatprep.mubr.msk.bf16.mxu1 %vm1660_vm0, %v1630_v62 }
 0x25c   : > { %3936 = vmatprep.subr.msk.bf16.mxu0 %vm1660_vm0, %v1654_v55  ;;  %3808 = vmatpush3.bf16.msra.mxu1 %v2326_v1 }
 0x25d   : > { %3809 = vmatprep.subr.bf16.mxu1 %v2325_v15 }
 0x260   : > { %3810 = vmatpush3.bf16.msra.mxu1 %v2325_v15 }
 0x261   : > { %3811 = vmatprep.subr.bf16.mxu1 %v2324_v47 }
 0x262   : > { %3764 = vmatmul.mubr.msk.bf16.gmra.mxu1 %vm1660_vm0, %v6307_v32 }
 0x263   : > { %3786 = vmatpush3.bf16.xpose.msra.mxu0 %v1837_v44  ;;  %3767 = vmatprep.mubr.msk.bf16.mxu1 %vm1660_vm0, %v1632_v35 }
 0x264   : > { %3937 = vmatprep.subr.msk.bf16.mxu0 %vm1660_vm0, %v5444_v61  ;;  %3812 = vmatpush3.bf16.msra.mxu1 %v2324_v47  ;;  %v1831_v61 = vsel %vm1660_vm0, %v5451_v8, 0 }
 0x265   : > { %3813 = vmatprep.subr.bf16.mxu1 %v2323_v14 }
 0x268   : > { %3814 = vmatpush3.bf16.msra.mxu1 %v2323_v14 }
 0x269   : > { %3815 = vmatprep.subr.bf16.mxu1 %v2322_v12 }
 0x26a   : > { %3768 = vmatmul.mubr.msk.bf16.gmra.mxu1 %vm1660_vm0, %v6308_v27 }
 0x26b   : > { %3788 = vmatpush3.bf16.xpose.msra.mxu0 %v1834_v51  ;;  %3771 = vmatprep.mubr.msk.bf16.mxu1 %vm1660_vm0, %v1634_v45 }
 0x26c   : > { %3938 = vmatprep.subr.msk.bf16.mxu0 %vm1660_vm0, %v5451_v8  ;;  %3816 = vmatpush3.bf16.msra.mxu1 %v2322_v12  ;;  %v6313_v8 = vpack.c.bf16 %v5367_v26, %v5354_v18  ;;  %v1565_v18 = vpop.f32.mrf.mxu0 }
 0x26d   : > { %3817 = vmatprep.subr.bf16.mxu1 %v2321_v28  ;;  %v1566_v16 = vadd.f32 %v5504_v49, %v1565_v18 }
 0x26e   : > { %v5622_v26 = vpop.f32.mrf.mxu0 }
 0x270   : > { %3818 = vmatpush3.bf16.msra.mxu1 %v2321_v28  ;;  %v1568_v22 = vpop.f32.mrf.mxu0 }
 0x271   : > { %3819 = vmatprep.subr.bf16.mxu1 %v2320_v2  ;;  %v1569_v1 = vadd.f32 %v5504_v49, %v1568_v22 }
 0x272   : > { %3772 = vmatmul.mubr.msk.bf16.gmra.mxu1 %vm1660_vm0, %v6309_v29  ;;  %v3733_v20 = vpop.f32.mrf.mxu0 }
 0x273   : > { %3790 = vmatpush3.bf16.xpose.msra.mxu0 %v1831_v61  ;;  %v5626_v31 = vpack.c.bf16 %v1569_v1, %v1566_v16  ;;  %v1590_v54 = vadd.f32 %v3733_v20, %v5504_v49 }
 0x274   : > { %3820 = vmatpush3.bf16.msra.mxu1 %v2320_v2  ;;  %v1581_v39 = vpop.f32.mrf.mxu0 }
 0x275   : > { %3821 = vmatprep.subr.bf16.mxu1 %v2319_v21  ;;  %v1582_v30 = vadd.f32 %v5504_v49, %v1581_v39 }
 0x276   : > { %v3734_v11 = vpop.f32.mrf.mxu0 }
 0x277   : > { %v1593_v63 = vadd.f32 %v3734_v11, %v5504_v49 }
 0x278   : > { %3822 = vmatpush3.bf16.msra.mxu1 %v2319_v21  ;;  %v1584_v24 = vpop.f32.mrf.mxu0 }
 0x279   : > { %v5631_v7 = vpack.c.bf16 %v1593_v63, %v1590_v54  ;;  %v1585_v62 = vadd.f32 %v5504_v49, %v1584_v24 }
 0x27a   : > { %3792 = vmatmul.mubr.msk.bf16.vlgmr.msra.gmra.mxu0 %vm1660_vm0, %v6310_v46  ;;  %v3737_v34 = vpop.f32.mrf.mxu0 }
 0x27b   : > { %3795 = vmatprep.mubr.msk.bf16.mxu0 %vm1660_vm0, %v6311_v42  ;;  %v5634_v6 = vpack.c.bf16 %v1585_v62, %v1582_v30  ;;  %v1606_v15 = vadd.f32 %v3737_v34, %v5504_v49 }
 0x27c   : > { %v1597_v13 = vpop.f32.mrf.mxu0 }
 0x27d   : > { %v1598_v56 = vadd.f32 %v5504_v49, %v1597_v13 }
 0x27e   : > { %v3738_v55 = vpop.f32.mrf.mxu0 }
 0x27f   : > { %v1609_v3 = vadd.f32 %v3738_v55, %v5504_v49 }
 0x280   : > { %v1600_v37 = vpop.f32.mrf.mxu0 }
 0x281   : > { %v5639_v52 = vpack.c.bf16 %v1609_v3, %v1606_v15  ;;  %v1601_v17 = vadd.f32 %v5504_v49, %v1600_v37 }
 0x282   : > { %3796 = vmatmul.mubr.msk.bf16.gmra.mxu0 %vm1660_vm0, %v6312_v38  ;;  %v3741_v47 = vpop.f32.mrf.mxu0 }
 0x283   : > { %3799 = vmatprep.mubr.msk.bf16.mxu0 %vm1660_vm0, %v6313_v8  ;;  %v5642_v57 = vpack.c.bf16 %v1601_v17, %v1598_v56  ;;  %v1622_v23 = vadd.f32 %v3741_v47, %v5504_v49 }
 0x284   : > { %v5644_v35 = vpop.f32.mrf.mxu0 }
 0x286   : > { %v3742_v53 = vpop.f32.mrf.mxu0 }
 0x287   : > { %v1625_v14 = vadd.f32 %v3742_v53, %v5504_v49 }
 0x288   : > { %v5690_v5 = vpop.f32.mrf.mxu0 }
 0x289   : > { %v5648_v32 = vpack.c.bf16 %v1625_v14, %v1622_v23 }
 0x28a   : > { %3800 = vmatmul.mubr.msk.bf16.gmra.mxu0 %vm1660_vm0, %v6315_v43 }
 0x28b   : > { %3803 = vmatprep.mubr.msk.bf16.mxu0 %vm1660_vm0, %v6318_v0  ;;  %3839 = vmatprep.subr.bf16.mxu1 %v5648_v32 }
 0x292   : > { %3804 = vmatmul.mubr.msk.bf16.gmra.mxu0 %vm1660_vm0, %v6321_v19 }
 0x31a   : > { %v3761_v44 = vpop.f32.mrf.mxu1 }
 0x31b   : > { %v5651_v10 = vmul.f32 0.17677669, %v3761_v44 }
 0x31c   : > { %v1743_v25 = vpop.f32.mrf.mxu1 }
 0x31d   : > { %v5653_v4 = vmul.f32 0.17677669, %v1743_v25  ;;  %1987 = vmax.xlane.f32.xlu1 %v5651_v10 }
 0x31e   : > { %v3762_v12 = vpop.f32.mrf.mxu1 }
 0x31f   : > { %v5656_v33 = vmul.f32 0.17677669, %v3762_v12  ;;  %1983 = vmax.xlane.f32.xlu0 %v5653_v4 }
 0x320   : > { %v1746_v45 = vpop.f32.mrf.mxu1 }
 0x321   : > { %v5659_v40 = vmul.f32 0.17677669, %v1746_v45  ;;  %1989 = vmax.xlane.f32.xlu1 %v5656_v33 }
 0x322   : > { %v3765_v41 = vpop.f32.mrf.mxu1 }
 0x323   : > { %1985 = vmax.xlane.f32.xlu0 %v5659_v40  ;;  %v5666_v2 = vmul.f32 0.17677669, %v3765_v41 }
 0x324   : > { %v1759_v28 = vpop.f32.mrf.mxu1 }
 0x325   : > { %v5663_v27 = vmul.f32 0.17677669, %v1759_v28 }
 0x326   : > { %v3766_v51 = vpop.f32.mrf.mxu1 }
 0x327   : > { %1991 = vmax.xlane.f32.xlu0 %v5663_v27  ;;  %v5672_v61 = vmul.f32 0.17677669, %v3766_v51 }
 0x328   : > { %v1762_v36 = vpop.f32.mrf.mxu1 }
 0x329   : > { %v5668_v60 = vmul.f32 0.17677669, %v1762_v36 }
 0x32a   : > { %v3769_v21 = vpop.f32.mrf.mxu1 }
 0x32b   : > { %1995 = vmax.xlane.f32.xlu0 %v5666_v2  ;;  %1993 = vmax.xlane.f32.xlu1 %v5668_v60  ;;  %v5678_v8 = vmul.f32 0.17677669, %v3769_v21 }
 0x32c   : > { %v1775_v29 = vpop.f32.mrf.mxu1 }
 0x32d   : > { %v5674_v46 = vmul.f32 0.17677669, %v1775_v29 }
 0x32e   : > { %v3770_v42 = vpop.f32.mrf.mxu1 }
 0x32f   : > { %1997 = vmax.xlane.f32.xlu1 %v5672_v61  ;;  %1999 = vmax.xlane.f32.xlu0 %v5674_v46  ;;  %v5684_v58 = vmul.f32 0.17677669, %v3770_v42 }
 0x330   : > { %v1778_v38 = vpop.f32.mrf.mxu1 }
 0x331   : > { %v5680_v50 = vmul.f32 0.17677669, %v1778_v38 }
 0x332   : > { %v3773_v43 = vpop.f32.mrf.mxu1 }
 0x333   : > { %2003 = vmax.xlane.f32.xlu0 %v5678_v8  ;;  %2001 = vmax.xlane.f32.xlu1 %v5680_v50  ;;  %v5692_v18 = vmul.f32 0.17677669, %v3773_v43 }
 0x334   : > { %v1791_v48 = vpop.f32.mrf.mxu1 }
 0x335   : > { %v5686_v0 = vmul.f32 0.17677669, %v1791_v48 }
 0x336   : > { %v3774_v59 = vpop.f32.mrf.mxu1 }
 0x337   : > { %2005 = vmax.xlane.f32.xlu1 %v5684_v58  ;;  %2007 = vmax.xlane.f32.xlu0 %v5686_v0  ;;  %v5698_v20 = vmul.f32 0.17677669, %v3774_v59 }
 0x338   : > { %v1794_v19 = vpop.f32.mrf.mxu1 }
 0x339   : > { %v5694_v16 = vmul.f32 0.17677669, %v1794_v19 }
 0x33a   : > { %v3793_v22 = vpop.f32.mrf.mxu0 }
 0x33b   : > { %2011 = vmax.xlane.f32.xlu0 %v5692_v18  ;;  %2009 = vmax.xlane.f32.xlu1 %v5694_v16  ;;  %v5704_v30 = vmul.f32 0.17677669, %v3793_v22 }
 0x33c   : > { %v1888_v1 = vpop.f32.mrf.mxu0 }
 0x33d   : > { %v5700_v39 = vmul.f32 0.17677669, %v1888_v1 }
 0x33e   : > { %v3794_v54 = vpop.f32.mrf.mxu0 }
 0x33f   : > { %2015 = vmax.xlane.f32.xlu0 %v5700_v39  ;;  %2013 = vmax.xlane.f32.xlu1 %v5698_v20  ;;  %v5710_v34 = vmul.f32 0.17677669, %v3794_v54 }
 0x340   : > { %v1891_v11 = vpop.f32.mrf.mxu0 }
 0x341   : > { %v5706_v63 = vmul.f32 0.17677669, %v1891_v11 }
 0x342   : > { %v3797_v24 = vpop.f32.mrf.mxu0 }
 0x343   : > { %2019 = vmax.xlane.f32.xlu0 %v5704_v30  ;;  %2017 = vmax.xlane.f32.xlu1 %v5706_v63  ;;  %v5716_v56 = vmul.f32 0.17677669, %v3797_v24 }
 0x344   : > { %v1904_v62 = vpop.f32.mrf.mxu0 }
 0x345   : > { %v5712_v13 = vmul.f32 0.17677669, %v1904_v62 }
 0x346   : > { %v3798_v15 = vpop.f32.mrf.mxu0 }
 0x347   : > { %2023 = vmax.xlane.f32.xlu0 %v5712_v13  ;;  %2021 = vmax.xlane.f32.xlu1 %v5710_v34  ;;  %v5722_v47 = vmul.f32 0.17677669, %v3798_v15 }
 0x348   : > { %v1907_v55 = vpop.f32.mrf.mxu0 }
 0x349   : > { %v5718_v3 = vmul.f32 0.17677669, %v1907_v55 }
 0x34a   : > { %v3801_v37 = vpop.f32.mrf.mxu0 }
 0x34b   : > { %2027 = vmax.xlane.f32.xlu0 %v5716_v56  ;;  %2025 = vmax.xlane.f32.xlu1 %v5718_v3  ;;  %v5728_v44 = vmul.f32 0.17677669, %v3801_v37 }
 0x34c   : > { %v1920_v17 = vpop.f32.mrf.mxu0 }
 0x34d   : > { %v5724_v23 = vmul.f32 0.17677669, %v1920_v17 }
 0x34e   : > { %v3802_v53 = vpop.f32.mrf.mxu0 }
 0x34f   : > { %2031 = vmax.xlane.f32.xlu0 %v5724_v23  ;;  %2029 = vmax.xlane.f32.xlu1 %v5722_v47  ;;  %v5734_v41 = vmul.f32 0.17677669, %v3802_v53 }
 0x350   : > { %v1923_v14 = vpop.f32.mrf.mxu0 }
 0x351   : > { %v5730_v25 = vmul.f32 0.17677669, %v1923_v14 }
 0x352   : > { %v3805_v12 = vpop.f32.mrf.mxu0 }
 0x353   : > { %2035 = vmax.xlane.f32.xlu0 %v5728_v44  ;;  %2033 = vmax.xlane.f32.xlu1 %v5730_v25  ;;  %v5740_v21 = vmul.f32 0.17677669, %v3805_v12 }
 0x354   : > { %v1936_v45 = vpop.f32.mrf.mxu0 }
 0x355   : > { %v5736_v28 = vmul.f32 0.17677669, %v1936_v45 }
 0x356   : > { %v3806_v51 = vpop.f32.mrf.mxu0 }
 0x357   : > { %2039 = vmax.xlane.f32.xlu0 %v5736_v28  ;;  %2037 = vmax.xlane.f32.xlu1 %v5734_v41  ;;  %v5746_v42 = vmul.f32 0.17677669, %v3806_v51 }
 0x358   : > { %v1939_v36 = vpop.f32.mrf.mxu0 }
 0x359   : > { %v5742_v29 = vmul.f32 0.17677669, %v1939_v36 }
 0x35b   : > { %2043 = vmax.xlane.f32.xlu0 %v5740_v21  ;;  %2041 = vmax.xlane.f32.xlu1 %v5742_v29 }
 0x35f   : > { %2045 = vmax.xlane.f32.xlu1 %v5746_v42 }
 0x3a6   : > { %v1988_v38 = vpop.xlane.xlu1 %1987 }
 0x3a7   : > { %v2049_v43 = vsub.f32 %v5651_v10, %v1988_v38 }
 0x3a8   : > { %v1984_v48 = vpop.xlane.xlu0 %1983 }
 0x3a9   : > { %v2047_v59 = vsub.f32 %v5653_v4, %v1984_v48  ;;  %v2083_v1 = vmul.f32 1.442695, %v2049_v43 }
 0x3aa   : > { %v1990_v19 = vpop.xlane.xlu1 %1989 }
 0x3ab   : > { %v2079_v22 = vmul.f32 1.442695, %v2047_v59  ;;  %v2050_v54 = vsub.f32 %v5656_v33, %v1990_v19 }
 0x3ac   : > { %v1986_v11 = vpop.xlane.xlu0 %1985 }
 0x3ad   : > { %4157 = vpow2.f32 %v2079_v22  ;;  %v2048_v24 = vsub.f32 %v5659_v40, %v1986_v11  ;;  %v2085_v15 = vmul.f32 1.442695, %v2050_v54 }
 0x3ae   : > { %4159 = vpow2.f32 %v2083_v1 }
 0x3af   : > { %v2081_v62 = vmul.f32 1.442695, %v2048_v24 }
 0x3b0   : > { %v1992_v55 = vpop.xlane.xlu0 %1991 }
 0x3b1   : > { %4161 = vpow2.f32 %v2081_v62  ;;  %v2051_v37 = vsub.f32 %v5663_v27, %v1992_v55 }
 0x3b2   : > { %4163 = vpow2.f32 %v2085_v15 }
 0x3b3   : > { %v2087_v10 = vmul.f32 1.442695, %v2051_v37 }
 0x3b4   : > { %v1996_v17 = vpop.xlane.xlu0 %1995  ;;  %v1994_v4 = vpop.xlane.xlu1 %1993 }
 0x3b5   : > { %4165 = vpow2.f32 %v2087_v10  ;;  %v2053_v53 = vsub.f32 %v5666_v2, %v1996_v17  ;;  %v2052_v33 = vsub.f32 %v5668_v60, %v1994_v4 }
 0x3b7   : > { %v2091_v14 = vmul.f32 1.442695, %v2053_v53  ;;  %v2089_v12 = vmul.f32 1.442695, %v2052_v33 }
 0x3b8   : > { %v1998_v45 = vpop.xlane.xlu1 %1997  ;;  %v2000_v40 = vpop.xlane.xlu0 %1999 }
 0x3b9   : > { %4167 = vpow2.f32 %v2091_v14  ;;  %v2054_v51 = vsub.f32 %v5672_v61, %v1998_v45  ;;  %v2055_v36 = vsub.f32 %v5674_v46, %v2000_v40 }
 0x3ba   : > { %v5758_v38 = vpop.eup %4157  ;;  %4169 = vpow2.f32 %v2089_v12 }
 0x3bb   : > { %v2093_v27 = vmul.f32 1.442695, %v2054_v51  ;;  %v2095_v43 = vmul.f32 1.442695, %v2055_v36  ;;  %2143 = vadd.xlane.f32.xlu0 %v5758_v38  ;;  %v5761_v59 = vpop.eup %4159 }
 0x3bc   : > { %v2004_v48 = vpop.xlane.xlu0 %2003  ;;  %v2002_v2 = vpop.xlane.xlu1 %2001 }
 0x3bd   : > { %4171 = vpow2.f32 %v2093_v27  ;;  %v2057_v60 = vsub.f32 %v5678_v8, %v2004_v48  ;;  %v2056_v19 = vsub.f32 %v5680_v50, %v2002_v2 }
 0x3be   : > { %v5765_v22 = vpop.eup %4161  ;;  %4173 = vpow2.f32 %v2095_v43 }
 0x3bf   : > { %v2099_v61 = vmul.f32 1.442695, %v2057_v60  ;;  %v2097_v46 = vmul.f32 1.442695, %v2056_v19  ;;  %2147 = vadd.xlane.f32.xlu0 %v5761_v59  ;;  %2145 = vadd.xlane.f32.xlu1 %v5765_v22  ;;  %v5769_v11 = vpop.eup %4163 }
 0x3c0   : > { %v2006_v1 = vpop.xlane.xlu1 %2005  ;;  %v2008_v54 = vpop.xlane.xlu0 %2007 }
 0x3c1   : > { %4175 = vpow2.f32 %v2099_v61  ;;  %v2058_v24 = vsub.f32 %v5684_v58, %v2006_v1  ;;  %v2059_v8 = vsub.f32 %v5686_v0, %v2008_v54 }
 0x3c2   : > { %v5773_v62 = vpop.eup %4165  ;;  %4177 = vpow2.f32 %v2097_v46 }
 0x3c3   : > { %v2101_v50 = vmul.f32 1.442695, %v2058_v24  ;;  %v2103_v15 = vmul.f32 1.442695, %v2059_v8  ;;  %2151 = vadd.xlane.f32.xlu0 %v5773_v62  ;;  %2149 = vadd.xlane.f32.xlu1 %v5769_v11 }
 0x3c4   : > { %v2012_v55 = vpop.xlane.xlu0 %2011  ;;  %v2010_v37 = vpop.xlane.xlu1 %2009 }
 0x3c5   : > { %4179 = vpow2.f32 %v2101_v50  ;;  %v2061_v10 = vsub.f32 %v5692_v18, %v2012_v55  ;;  %v2060_v17 = vsub.f32 %v5694_v16, %v2010_v37 }
 0x3c6   : > { %v5779_v4 = vpop.eup %4167  ;;  %4181 = vpow2.f32 %v2103_v15 }
 0x3c7   : > { %v5781_v58 = vpop.eup %4169  ;;  %v2107_v0 = vmul.f32 1.442695, %v2061_v10  ;;  %v2105_v53 = vmul.f32 1.442695, %v2060_v17  ;;  %2155 = vadd.xlane.f32.xlu0 %v5779_v4 }
 0x3c8   : > { %2153 = vadd.xlane.f32.xlu1 %v5781_v58  ;;  %v2016_v33 = vpop.xlane.xlu0 %2015  ;;  %v2014_v14 = vpop.xlane.xlu1 %2013 }
 0x3c9   : > { %4183 = vpow2.f32 %v2107_v0  ;;  %v2063_v12 = vsub.f32 %v5700_v39, %v2016_v33  ;;  %v2062_v18 = vsub.f32 %v5698_v20, %v2014_v14 }
 0x3ca   : > { %v5787_v45 = vpop.eup %4171  ;;  %4185 = vpow2.f32 %v2105_v53 }
 0x3cb   : > { %v5789_v16 = vpop.eup %4173  ;;  %v2111_v40 = vmul.f32 1.442695, %v2063_v12  ;;  %v2109_v51 = vmul.f32 1.442695, %v2062_v18 }
 0x3cc   : > { %2159 = vadd.xlane.f32.xlu0 %v5789_v16  ;;  %2157 = vadd.xlane.f32.xlu1 %v5787_v45  ;;  %v2020_v36 = vpop.xlane.xlu0 %2019  ;;  %v2018_v27 = vpop.xlane.xlu1 %2017 }
 0x3cd   : > { %4187 = vpow2.f32 %v2111_v40  ;;  %v2065_v43 = vsub.f32 %v5704_v30, %v2020_v36  ;;  %v2064_v39 = vsub.f32 %v5706_v63, %v2018_v27 }
 0x3ce   : > { %v5795_v48 = vpop.eup %4175  ;;  %4189 = vpow2.f32 %v2109_v51 }
 0x3cf   : > { %v5797_v20 = vpop.eup %4177  ;;  %v2115_v2 = vmul.f32 1.442695, %v2065_v43  ;;  %v2113_v60 = vmul.f32 1.442695, %v2064_v39 }
 0x3d0   : > { %2163 = vadd.xlane.f32.xlu0 %v5795_v48  ;;  %2161 = vadd.xlane.f32.xlu1 %v5797_v20  ;;  %v2024_v19 = vpop.xlane.xlu0 %2023  ;;  %v2022_v61 = vpop.xlane.xlu1 %2021 }
 0x3d1   : > { %4191 = vpow2.f32 %v2115_v2  ;;  %v2067_v46 = vsub.f32 %v5712_v13, %v2024_v19  ;;  %v2066_v30 = vsub.f32 %v5710_v34, %v2022_v61 }
 0x3d2   : > { %v5803_v1 = vpop.eup %4179  ;;  %4193 = vpow2.f32 %v2113_v60 }
 0x3d3   : > { %v5805_v63 = vpop.eup %4181  ;;  %v2119_v54 = vmul.f32 1.442695, %v2067_v46  ;;  %v2117_v24 = vmul.f32 1.442695, %v2066_v30 }
 0x3d4   : > { %2167 = vadd.xlane.f32.xlu0 %v5805_v63  ;;  %2165 = vadd.xlane.f32.xlu1 %v5803_v1  ;;  %v2028_v8 = vpop.xlane.xlu0 %2027  ;;  %v2026_v50 = vpop.xlane.xlu1 %2025 }
 0x3d5   : > { %4195 = vpow2.f32 %v2119_v54  ;;  %v2069_v15 = vsub.f32 %v5716_v56, %v2028_v8  ;;  %v2068_v13 = vsub.f32 %v5718_v3, %v2026_v50 }
 0x3d6   : > { %v5811_v55 = vpop.eup %4183  ;;  %4197 = vpow2.f32 %v2117_v24 }
 0x3d7   : > { %v5813_v34 = vpop.eup %4185  ;;  %v2123_v37 = vmul.f32 1.442695, %v2069_v15  ;;  %v2121_v10 = vmul.f32 1.442695, %v2068_v13 }
 0x3d8   : > { %2171 = vadd.xlane.f32.xlu0 %v5811_v55  ;;  %2169 = vadd.xlane.f32.xlu1 %v5813_v34  ;;  %v2032_v17 = vpop.xlane.xlu0 %2031  ;;  %v2030_v0 = vpop.xlane.xlu1 %2029 }
 0x3d9   : > { %4199 = vpow2.f32 %v2123_v37  ;;  %v2071_v53 = vsub.f32 %v5724_v23, %v2032_v17  ;;  %v2070_v56 = vsub.f32 %v5722_v47, %v2030_v0 }
 0x3da   : > { %v5819_v33 = vpop.eup %4187  ;;  %4201 = vpow2.f32 %v2121_v10 }
 0x3db   : > { %v5821_v3 = vpop.eup %4189  ;;  %v2127_v14 = vmul.f32 1.442695, %v2071_v53  ;;  %v2125_v12 = vmul.f32 1.442695, %v2070_v56 }
 0x3dc   : > { %2175 = vadd.xlane.f32.xlu0 %v5819_v33  ;;  %2173 = vadd.xlane.f32.xlu1 %v5821_v3  ;;  %v2036_v18 = vpop.xlane.xlu0 %2035  ;;  %v2034_v40 = vpop.xlane.xlu1 %2033 }
 0x3dd   : > { %4203 = vpow2.f32 %v2127_v14  ;;  %v2073_v51 = vsub.f32 %v5728_v44, %v2036_v18  ;;  %v2072_v23 = vsub.f32 %v5730_v25, %v2034_v40  ;;  %v4155_v18 = vld [vmem:[%s5144_s0 + $0x8] sm:$0xff]   ;;  %v4156_v40 = vld [vmem:[%s5144_s0] sm:$0xff]  }
 0x3de   : > { %v5827_v36 = vpop.eup %4191  ;;  %4205 = vpow2.f32 %v2125_v12  ;;  %3871 = vmatprep.subr.bf16.mxu0 %v4155_v18 }
 0x3df   : > { %v5829_v47 = vpop.eup %4193  ;;  %v2131_v27 = vmul.f32 1.442695, %v2073_v51  ;;  %v2129_v43 = vmul.f32 1.442695, %v2072_v23  ;;  %3872 = vmatpush3.bf16.msra.mxu0 %v4155_v18 }
 0x3e0   : > { %2179 = vadd.xlane.f32.xlu0 %v5827_v36  ;;  %2177 = vadd.xlane.f32.xlu1 %v5829_v47  ;;  %v2040_v39 = vpop.xlane.xlu0 %2039  ;;  %v2038_v2 = vpop.xlane.xlu1 %2037 }
 0x3e1   : > { %4207 = vpow2.f32 %v2131_v27  ;;  %v2075_v60 = vsub.f32 %v5736_v28, %v2040_v39  ;;  %v2074_v44 = vsub.f32 %v5734_v41, %v2038_v2  ;;  %3873 = vmatprep.subr.bf16.mxu0 %v4156_v40 }
 0x3e2   : > { %v5835_v19 = vpop.eup %4195  ;;  %4209 = vpow2.f32 %v2129_v43 }
 0x3e3   : > { %v5837_v25 = vpop.eup %4197  ;;  %v2135_v61 = vmul.f32 1.442695, %v2075_v60  ;;  %v2133_v46 = vmul.f32 1.442695, %v2074_v44  ;;  %3874 = vmatpush3.bf16.msra.mxu0 %v4156_v40  ;;  %v1614_v40 = vadd.f32 %v5504_v49, %v5644_v35 }
 0x3e4   : > { %2183 = vadd.xlane.f32.xlu0 %v5835_v19  ;;  %2181 = vadd.xlane.f32.xlu1 %v5837_v25  ;;  %v2044_v30 = vpop.xlane.xlu0 %2043  ;;  %v2042_v54 = vpop.xlane.xlu1 %2041 }
 0x3e5   : > { %4211 = vpow2.f32 %v2135_v61  ;;  %v2077_v24 = vsub.f32 %v5740_v21, %v2044_v30  ;;  %v2076_v28 = vsub.f32 %v5742_v29, %v2042_v54 }
 0x3e6   : > { %v5843_v8 = vpop.eup %4199  ;;  %4213 = vpow2.f32 %v2133_v46 }
 0x3e7   : > { %v5845_v41 = vpop.eup %4201  ;;  %v2139_v50 = vmul.f32 1.442695, %v2077_v24  ;;  %v2137_v15 = vmul.f32 1.442695, %v2076_v28 }
 0x3e8   : > { %2187 = vadd.xlane.f32.xlu0 %v5843_v8  ;;  %2185 = vadd.xlane.f32.xlu1 %v5845_v41  ;;  %v2046_v13 = vpop.xlane.xlu1 %2045 }
 0x3e9   : > { %4215 = vpow2.f32 %v2139_v50  ;;  %v2078_v37 = vsub.f32 %v5746_v42, %v2046_v13 }
 0x3ea   : > { %v5850_v10 = vpop.eup %4203  ;;  %4217 = vpow2.f32 %v2137_v15 }
 0x3eb   : > { %v5852_v21 = vpop.eup %4205  ;;  %v2141_v29 = vmul.f32 1.442695, %v2078_v37 }
 0x3ec   : > { %2191 = vadd.xlane.f32.xlu0 %v5850_v10  ;;  %2189 = vadd.xlane.f32.xlu1 %v5852_v21 }
 0x3ed   : > { %4219 = vpow2.f32 %v2141_v29 }
 0x3ee   : > { %v5856_v17 = vpop.eup %4207 }
 0x3ef   : > { %v5858_v0 = vpop.eup %4209 }
 0x3f0   : > { %2195 = vadd.xlane.f32.xlu0 %v5856_v17  ;;  %2193 = vadd.xlane.f32.xlu1 %v5858_v0 }
 0x3f2   : > { %v5862_v42 = vpop.eup %4211 }
 0x3f3   : > { %v5864_v53 = vpop.eup %4213 }
 0x3f4   : > { %2199 = vadd.xlane.f32.xlu0 %v5862_v42  ;;  %2197 = vadd.xlane.f32.xlu1 %v5864_v53 }
 0x3f6   : > { %v5868_v56 = vpop.eup %4215 }
 0x3f7   : > { %v5870_v14 = vpop.eup %4217 }
 0x3f8   : > { %2203 = vadd.xlane.f32.xlu0 %v5868_v56  ;;  %2201 = vadd.xlane.f32.xlu1 %v5870_v14 }
 0x3fa   : > { %v5874_v12 = vpop.eup %4219 }
 0x3fc   : > { %2205 = vadd.xlane.f32.xlu1 %v5874_v12 }
 0x444   : > { %v2144_v51 = vpop.xlane.xlu0 %2143 }
 0x445   : > { %4221 = vrcp.f32 %v2144_v51 }
 0x448   : > { %v2148_v23 = vpop.xlane.xlu0 %2147  ;;  %v2146_v27 = vpop.xlane.xlu1 %2145 }
 0x449   : > { %4223 = vrcp.f32 %v2148_v23 }
 0x44a   : > { %4225 = vrcp.f32 %v2146_v27 }
 0x44c   : > { %v2152_v43 = vpop.xlane.xlu0 %2151  ;;  %v2150_v39 = vpop.xlane.xlu1 %2149 }
 0x44d   : > { %4227 = vrcp.f32 %v2152_v43 }
 0x44e   : > { %4229 = vrcp.f32 %v2150_v39 }
 0x450   : > { %v2156_v2 = vpop.xlane.xlu0 %2155 }
 0x451   : > { %4231 = vrcp.f32 %v2156_v2  ;;  %v2154_v60 = vpop.xlane.xlu1 %2153 }
 0x452   : > { %v4222_v44 = vpop.eup %4221  ;;  %4233 = vrcp.f32 %v2154_v60 }
 0x453   : > { %v2239_v61 = vmul.f32 %v4222_v44, %v5758_v38 }
 0x455   : > { %v2160_v46 = vpop.xlane.xlu0 %2159  ;;  %v2158_v30 = vpop.xlane.xlu1 %2157  ;;  %2271 = vst [vmem:[%s5173_s8] sm:$0xff] %v2239_v61 }
 0x456   : > { %v4224_v54 = vpop.eup %4223  ;;  %4235 = vrcp.f32 %v2160_v46 }
 0x457   : > { %v4226_v24 = vpop.eup %4225  ;;  %4237 = vrcp.f32 %v2158_v30  ;;  %v2241_v28 = vmul.f32 %v4224_v54, %v5761_v59  ;;  %v1617_v59 = vadd.f32 %v5504_v49, %v5690_v5 }
 0x458   : > { %v2240_v50 = vmul.f32 %v4226_v24, %v5765_v22 }
 0x459   : > { %v2164_v15 = vpop.xlane.xlu0 %2163  ;;  %v2162_v13 = vpop.xlane.xlu1 %2161  ;;  %2273 = vst [vmem:[%s5173_s8 + $0x10] sm:$0xff] %v2241_v28  ;;  %v2333_v35 = vpack.c.bf16 %v1617_v59, %v1614_v40  ;;  %v4285_v40 = vld [vmem:[%s6322_s15] ss:$0 sm:$0xff] }
 0x45a   : > { %v4228_v37 = vpop.eup %4227  ;;  %4239 = vrcp.f32 %v2164_v15  ;;  %2272 = vst [vmem:[%s5173_s8 + $0x8] sm:$0xff] %v2240_v50  ;;  %v2303_v38 = vpack.c.bf16 %v2240_v50, %v2239_v61  ;;  %v1574_v59 = vadd.f32 %v4285_v40, %v5616_v9 }
 0x45b   : > { %v4230_v29 = vpop.eup %4229  ;;  %4241 = vrcp.f32 %v2162_v13  ;;  %v2243_v18 = vmul.f32 %v4228_v37, %v5773_v62 }
 0x45c   : > { %3823 = vmatprep.mubr.bf16.mxu1 %v2303_v38  ;;  %v2242_v22 = vmul.f32 %v4230_v29, %v5769_v11 }
 0x45d   : > { %v2168_v51 = vpop.xlane.xlu0 %2167  ;;  %v2166_v23 = vpop.xlane.xlu1 %2165  ;;  %2275 = vst [vmem:[%s5173_s8 + $0x20] sm:$0xff] %v2243_v18 }
 0x45e   : > { %v4232_v27 = vpop.eup %4231  ;;  %4243 = vrcp.f32 %v2168_v51  ;;  %2274 = vst [vmem:[%s5173_s8 + $0x18] sm:$0xff] %v2242_v22  ;;  %v2304_v43 = vpack.c.bf16 %v2242_v22, %v2241_v28 }
 0x45f   : > { %v4234_v39 = vpop.eup %4233  ;;  %4245 = vrcp.f32 %v2166_v23  ;;  %v2245_v62 = vmul.f32 %v4232_v27, %v5779_v4 }
 0x460   : > { %3824 = vmatmul.mubr.bf16.vlgmr.msra.gmra.mxu1 %v2304_v43  ;;  %v2244_v49 = vmul.f32 %v4234_v39, %v5781_v58 }
 0x461   : > { %3840 = vmatpush3.bf16.msra.mxu1 %v5648_v32  ;;  %v2172_v5 = vpop.xlane.xlu0 %2171  ;;  %v2170_v11 = vpop.xlane.xlu1 %2169  ;;  %2277 = vst [vmem:[%s5173_s8 + $0x30] sm:$0xff] %v2245_v62 }
 0x462   : > { %4247 = vrcp.f32 %v2172_v5  ;;  %3841 = vmatprep.subr.bf16.mxu1 %v2333_v35  ;;  %2276 = vst [vmem:[%s5173_s8 + $0x28] sm:$0xff] %v2244_v49  ;;  %v2305_v2 = vpack.c.bf16 %v2244_v49, %v2243_v18 }
 0x463   : > { %v4236_v60 = vpop.eup %4235  ;;  %4249 = vrcp.f32 %v2170_v11 }
 0x464   : > { %v4238_v44 = vpop.eup %4237  ;;  %3827 = vmatprep.mubr.bf16.mxu1 %v2305_v2  ;;  %v2247_v4 = vmul.f32 %v4236_v60, %v5789_v16 }
 0x465   : > { %3842 = vmatpush3.bf16.msra.mxu1 %v2333_v35  ;;  %v2176_v61 = vpop.xlane.xlu0 %2175  ;;  %v2174_v58 = vpop.xlane.xlu1 %2173  ;;  %v2246_v32 = vmul.f32 %v4238_v44, %v5787_v45 }
 0x466   : > { %4251 = vrcp.f32 %v2176_v61  ;;  %3843 = vmatprep.subr.bf16.mxu1 %v5639_v52  ;;  %2279 = vst [vmem:[%s5173_s8 + $0x40] sm:$0xff] %v2247_v4 }
 0x467   : > { %v4240_v46 = vpop.eup %4239  ;;  %4253 = vrcp.f32 %v2174_v58  ;;  %2278 = vst [vmem:[%s5173_s8 + $0x38] sm:$0xff] %v2246_v32  ;;  %v2306_v30 = vpack.c.bf16 %v2246_v32, %v2245_v62 }
 0x468   : > { %v4242_v54 = vpop.eup %4241  ;;  %v2249_v24 = vmul.f32 %v4240_v46, %v5795_v48 }
 0x469   : > { %3828 = vmatmul.mubr.bf16.gmra.mxu1 %v2306_v30  ;;  %v2180_v16 = vpop.xlane.xlu0 %2179  ;;  %v2178_v28 = vpop.xlane.xlu1 %2177  ;;  %v2248_v50 = vmul.f32 %v4242_v54, %v5797_v20 }
 0x46a   : > { %3844 = vmatpush3.bf16.msra.mxu1 %v5639_v52  ;;  %4255 = vrcp.f32 %v2180_v16  ;;  %2281 = vst [vmem:[%s5173_s8 + $0x50] sm:$0xff] %v2249_v24 }
 0x46b   : > { %v4244_v45 = vpop.eup %4243  ;;  %3845 = vmatprep.subr.bf16.mxu1 %v5642_v57  ;;  %4257 = vrcp.f32 %v2178_v28  ;;  %2280 = vst [vmem:[%s5173_s8 + $0x48] sm:$0xff] %v2248_v50  ;;  %v2307_v15 = vpack.c.bf16 %v2248_v50, %v2247_v4 }
 0x46c   : > { %v4246_v13 = vpop.eup %4245  ;;  %v2251_v48 = vmul.f32 %v4244_v45, %v5805_v63 }
 0x46d   : > { %3831 = vmatprep.mubr.bf16.mxu1 %v2307_v15  ;;  %v2184_v37 = vpop.xlane.xlu0 %2183  ;;  %v2182_v38 = vpop.xlane.xlu1 %2181  ;;  %v2250_v20 = vmul.f32 %v4246_v13, %v5803_v1  ;;  %v1577_v1 = vadd.f32 %v4285_v40, %v5622_v26 }
 0x46e   : > { %3846 = vmatpush3.bf16.msra.mxu1 %v5642_v57  ;;  %4259 = vrcp.f32 %v2184_v37  ;;  %2283 = vst [vmem:[%s5173_s8 + $0x60] sm:$0xff] %v2251_v48 }
 0x46f   : > { %v4248_v52 = vpop.eup %4247  ;;  %3847 = vmatprep.subr.bf16.mxu1 %v5631_v7  ;;  %4261 = vrcp.f32 %v2182_v38  ;;  %2282 = vst [vmem:[%s5173_s8 + $0x58] sm:$0xff] %v2250_v20  ;;  %v2308_v29 = vpack.c.bf16 %v2250_v20, %v2249_v24  ;;  %v2328_v27 = vpack.c.bf16 %v1577_v1, %v1574_v59 }
 0x470   : > { %v4250_v18 = vpop.eup %4249  ;;  %v2253_v63 = vmul.f32 %v4248_v52, %v5811_v55 }
 0x471   : > { %3832 = vmatmul.mubr.bf16.gmra.mxu1 %v2308_v29  ;;  %v2188_v57 = vpop.xlane.xlu0 %2187  ;;  %v2186_v22 = vpop.xlane.xlu1 %2185  ;;  %v2252_v51 = vmul.f32 %v4250_v18, %v5813_v34 }
 0x472   : > { %3848 = vmatpush3.bf16.msra.mxu1 %v5631_v7  ;;  %4263 = vrcp.f32 %v2188_v57  ;;  %2285 = vst [vmem:[%s5173_s8 + $0x70] sm:$0xff] %v2253_v63 }
 0x473   : > { %v4252_v23 = vpop.eup %4251  ;;  %3849 = vmatprep.subr.bf16.mxu1 %v5634_v6  ;;  %4265 = vrcp.f32 %v2186_v22  ;;  %2284 = vst [vmem:[%s5173_s8 + $0x68] sm:$0xff] %v2252_v51  ;;  %v2309_v55 = vpack.c.bf16 %v2252_v51, %v2251_v48 }
 0x474   : > { %v4254_v9 = vpop.eup %4253  ;;  %v2255_v26 = vmul.f32 %v4252_v23, %v5819_v33 }
 0x475   : > { %3835 = vmatprep.mubr.bf16.mxu1 %v2309_v55  ;;  %v2192_v43 = vpop.xlane.xlu0 %2191  ;;  %v2190_v39 = vpop.xlane.xlu1 %2189  ;;  %v2254_v34 = vmul.f32 %v4254_v9, %v5821_v3 }
 0x476   : > { %3850 = vmatpush3.bf16.msra.mxu1 %v5634_v6  ;;  %4267 = vrcp.f32 %v2192_v43  ;;  %2287 = vst [vmem:[%s5173_s8 + $0x80] sm:$0xff] %v2255_v26 }
 0x477   : > { %v4256_v7 = vpop.eup %4255  ;;  %3851 = vmatprep.subr.bf16.mxu1 %v2328_v27  ;;  %4269 = vrcp.f32 %v2190_v39  ;;  %2286 = vst [vmem:[%s5173_s8 + $0x78] sm:$0xff] %v2254_v34  ;;  %v2310_v62 = vpack.c.bf16 %v2254_v34, %v2253_v63 }
 0x478   : > { %v4258_v35 = vpop.eup %4257  ;;  %v2257_v33 = vmul.f32 %v4256_v7, %v5827_v36 }
 0x479   : > { %3836 = vmatmul.mubr.bf16.gmra.mxu1 %v2310_v62  ;;  %v2196_v49 = vpop.xlane.xlu0 %2195  ;;  %v2194_v5 = vpop.xlane.xlu1 %2193  ;;  %v2256_v11 = vmul.f32 %v4258_v35, %v5829_v47 }
 0x47a   : > { %3852 = vmatpush3.bf16.msra.mxu1 %v2328_v27  ;;  %4271 = vrcp.f32 %v2196_v49  ;;  %2289 = vst [vmem:[%s5173_s8 + $0x90] sm:$0xff] %v2257_v33 }
 0x47b   : > { %v4260_v6 = vpop.eup %4259  ;;  %3853 = vmatprep.subr.bf16.mxu1 %v5626_v31  ;;  %4273 = vrcp.f32 %v2194_v5  ;;  %2288 = vst [vmem:[%s5173_s8 + $0x88] sm:$0xff] %v2256_v11  ;;  %v2311_v3 = vpack.c.bf16 %v2256_v11, %v2255_v26 }
 0x47c   : > { %v4262_v2 = vpop.eup %4261  ;;  %v2259_v60 = vmul.f32 %v4260_v6, %v5835_v19 }
 0x47d   : > { %3855 = vmatprep.mubr.bf16.mxu1 %v2311_v3  ;;  %v2200_v36 = vpop.xlane.xlu0 %2199  ;;  %v2198_v44 = vpop.xlane.xlu1 %2197  ;;  %v2258_v47 = vmul.f32 %v4262_v2, %v5837_v25 }
 0x47e   : > { %3854 = vmatpush3.bf16.msra.mxu1 %v5626_v31  ;;  %4275 = vrcp.f32 %v2200_v36  ;;  %2291 = vst [vmem:[%s5173_s8 + $0xa0] sm:$0xff] %v2259_v60 }
 0x47f   : > { %v4264_v4 = vpop.eup %4263  ;;  %4277 = vrcp.f32 %v2198_v44  ;;  %2290 = vst [vmem:[%s5173_s8 + $0x98] sm:$0xff] %v2258_v47  ;;  %v2312_v61 = vpack.c.bf16 %v2258_v47, %v2257_v33 }
 0x480   : > { %v4266_v58 = vpop.eup %4265  ;;  %v2261_v32 = vmul.f32 %v4264_v4, %v5843_v8 }
 0x481   : > { %3856 = vmatmul.mubr.bf16.vlgmr.msra.gmra.mxu1 %v2312_v61  ;;  %v2204_v19 = vpop.xlane.xlu0 %2203  ;;  %v2202_v46 = vpop.xlane.xlu1 %2201  ;;  %v2260_v30 = vmul.f32 %v4266_v58, %v5845_v41 }
 0x482   : > { %4279 = vrcp.f32 %v2204_v19  ;;  %2293 = vst [vmem:[%s5173_s8 + $0xb0] sm:$0xff] %v2261_v32 }
 0x483   : > { %v4268_v31 = vpop.eup %4267  ;;  %4281 = vrcp.f32 %v2202_v46  ;;  %2292 = vst [vmem:[%s5173_s8 + $0xa8] sm:$0xff] %v2260_v30  ;;  %v2313_v25 = vpack.c.bf16 %v2260_v30, %v2259_v60 }
 0x484   : > { %v4270_v54 = vpop.eup %4269  ;;  %v2263_v24 = vmul.f32 %v4268_v31, %v5850_v10 }
 0x485   : > { %3859 = vmatprep.mubr.bf16.mxu1 %v2313_v25  ;;  %v2206_v8 = vpop.xlane.xlu1 %2205  ;;  %v2262_v16 = vmul.f32 %v4270_v54, %v5852_v21 }
 0x486   : > { %4283 = vrcp.f32 %v2206_v8  ;;  %2295 = vst [vmem:[%s5173_s8 + $0xc0] sm:$0xff] %v2263_v24 }
 0x487   : > { %v4272_v28 = vpop.eup %4271  ;;  %2294 = vst [vmem:[%s5173_s8 + $0xb8] sm:$0xff] %v2262_v16  ;;  %v2314_v41 = vpack.c.bf16 %v2262_v16, %v2261_v32 }
 0x488   : > { %v4274_v50 = vpop.eup %4273  ;;  %v2265_v45 = vmul.f32 %v4272_v28, %v5856_v17 }
 0x489   : > { %3860 = vmatmul.mubr.bf16.gmra.mxu1 %v2314_v41  ;;  %v2264_v15 = vmul.f32 %v4274_v50, %v5858_v0 }
 0x48a   : > { %2297 = vst [vmem:[%s5173_s8 + $0xd0] sm:$0xff] %v2265_v45 }
 0x48b   : > { %v4276_v10 = vpop.eup %4275  ;;  %2296 = vst [vmem:[%s5173_s8 + $0xc8] sm:$0xff] %v2264_v15  ;;  %v2315_v13 = vpack.c.bf16 %v2264_v15, %v2263_v24 }
 0x48c   : > { %v4278_v21 = vpop.eup %4277  ;;  %v2267_v48 = vmul.f32 %v4276_v10, %v5862_v42  ;;  %v2770_v10 = vld [vmem:[#allocation2 + $0xb0] sm:$0xff] }
 0x48d   : > { %3863 = vmatprep.mubr.bf16.mxu1 %v2315_v13  ;;  %v2266_v37 = vmul.f32 %v4278_v21, %v5864_v53 }
 0x48e   : > { %2299 = vst [vmem:[%s5173_s8 + $0xe0] sm:$0xff] %v2267_v48 }
 0x48f   : > { %v4280_v38 = vpop.eup %4279  ;;  %2298 = vst [vmem:[%s5173_s8 + $0xd8] sm:$0xff] %v2266_v37  ;;  %v2316_v17 = vpack.c.bf16 %v2266_v37, %v2265_v45  ;;  %v2772_v45 = vld [vmem:[#allocation2 + $0xd8] sm:$0xff] }
 0x490   : > { %v4282_v20 = vpop.eup %4281  ;;  %v2269_v0 = vmul.f32 %v4280_v38, %v5868_v56 }
 0x491   : > { %3864 = vmatmul.mubr.bf16.gmra.mxu1 %v2316_v17  ;;  %v2268_v52 = vmul.f32 %v4282_v20, %v5870_v14  ;;  %v2771_v17 = vld [vmem:[#allocation2] sm:$0xff] }
 0x492   : > { %2301 = vst [vmem:[%s5173_s8 + $0xf0] sm:$0xff] %v2269_v0 }
 0x493   : > { %v4284_v29 = vpop.eup %4283  ;;  %2300 = vst [vmem:[%s5173_s8 + $0xe8] sm:$0xff] %v2268_v52  ;;  %v2317_v18 = vpack.c.bf16 %v2268_v52, %v2267_v48  ;;  %v2773_v48 = vld [vmem:[#allocation2 + $0x18] sm:$0xff] }
 0x494   : > { %v2270_v42 = vmul.f32 %v4284_v29, %v5874_v12  ;;  %v2776_v29 = vld [vmem:[#allocation2 + $0x30] sm:$0xff] }
 0x495   : > { %3867 = vmatprep.mubr.bf16.mxu1 %v2317_v18 }
 0x496   : > { %2302 = vst [vmem:[%s5173_s8 + $0xf8] sm:$0xff] %v2270_v42  ;;  %v2318_v63 = vpack.c.bf16 %v2270_v42, %v2269_v0  ;;  %v2774_v42 = vld [vmem:[#allocation2 + $0x50] sm:$0xff] }
 0x499   : > { %3868 = vmatmul.mubr.bf16.gmra.mxu1 %v2318_v63 }
 0x520   : > { %v3825_v53 = vpop.f32.mrf.mxu1 }
 0x522   : > { %v2369_v40 = vpop.f32.mrf.mxu1 }
 0x524   : > { %v3826_v59 = vpop.f32.mrf.mxu1 }
 0x525   : > { %v2530_v22 = vpack.c.bf16 %v3826_v59, %v3825_v53 }
 0x526   : > { %v2372_v1 = vpop.f32.mrf.mxu1 }
 0x527   : > { %v2529_v57 = vpack.c.bf16 %v2372_v1, %v2369_v40  ;;  %v2777_v40 = vld [vmem:[#allocation2 + $0x48] sm:$0xff] }
 0x529   : > { %v3829_v56 = vpop.f32.mrf.mxu1  ;;  %3875 = vmatprep.mubr.msk.bf16.mxu0 %vm1660_vm0, %v2529_v57  ;;  %v2775_v57 = vld [vmem:[#allocation2 + $0x68] sm:$0xff] }
 0x52a   : > { %3876 = vmatmul.mubr.msk.bf16.vlgmr.msra.gmra.mxu0 %vm1660_vm0, %v2530_v22 }
 0x52b   : > { %v2385_v14 = vpop.f32.mrf.mxu1 }
 0x52d   : > { %v3830_v51 = vpop.f32.mrf.mxu1 }
 0x52e   : > { %v2532_v12 = vpack.c.bf16 %v3830_v51, %v3829_v56 }
 0x52f   : > { %v2388_v23 = vpop.f32.mrf.mxu1 }
 0x530   : > { %v2531_v55 = vpack.c.bf16 %v2388_v23, %v2385_v14  ;;  %v2780_v14 = vld [vmem:[#allocation2 + $0xe8] sm:$0xff] }
 0x531   : > { %v3833_v9 = vpop.f32.mrf.mxu1 }
 0x532   : > { %3879 = vmatprep.mubr.msk.bf16.mxu0 %vm1660_vm0, %v2531_v55  ;;  %v2778_v55 = vld [vmem:[#allocation2 + $0x80] sm:$0xff] }
 0x533   : > { %v2401_v26 = vpop.f32.mrf.mxu1  ;;  %3880 = vmatmul.mubr.msk.bf16.gmra.mxu0 %vm1660_vm0, %v2532_v12 }
 0x535   : > { %v3834_v27 = vpop.f32.mrf.mxu1 }
 0x536   : > { %v2534_v34 = vpack.c.bf16 %v3834_v27, %v3833_v9 }
 0x537   : > { %v2404_v43 = vpop.f32.mrf.mxu1 }
 0x538   : > { %v2533_v39 = vpack.c.bf16 %v2404_v43, %v2401_v26  ;;  %v2781_v26 = vld [vmem:[#allocation2 + $0xb8] sm:$0xff] }
 0x539   : > { %v3837_v7 = vpop.f32.mrf.mxu1 }
 0x53a   : > { %3883 = vmatprep.mubr.msk.bf16.mxu0 %vm1660_vm0, %v2533_v39  ;;  %v2779_v39 = vld [vmem:[#allocation2 + $0x88] sm:$0xff] }
 0x53b   : > { %v2417_v62 = vpop.f32.mrf.mxu1  ;;  %3884 = vmatmul.mubr.msk.bf16.gmra.mxu0 %vm1660_vm0, %v2534_v34 }
 0x53d   : > { %v3838_v35 = vpop.f32.mrf.mxu1 }
 0x53e   : > { %v2536_v5 = vpack.c.bf16 %v3838_v35, %v3837_v7 }
 0x53f   : > { %v2420_v33 = vpop.f32.mrf.mxu1 }
 0x540   : > { %v2535_v49 = vpack.c.bf16 %v2420_v33, %v2417_v62  ;;  %v2784_v62 = vld [vmem:[#allocation2 + $0x8] sm:$0xff] }
 0x541   : > { %v3857_v11 = vpop.f32.mrf.mxu1 }
 0x542   : > { %3887 = vmatprep.mubr.msk.bf16.mxu0 %vm1660_vm0, %v2535_v49  ;;  %v2782_v49 = vld [vmem:[#allocation2 + $0x60] sm:$0xff] }
 0x543   : > { %v2466_v6 = vpop.f32.mrf.mxu1  ;;  %3888 = vmatmul.mubr.msk.bf16.gmra.mxu0 %vm1660_vm0, %v2536_v5 }
 0x545   : > { %v3858_v3 = vpop.f32.mrf.mxu1 }
 0x546   : > { %v2538_v36 = vpack.c.bf16 %v3858_v3, %v3857_v11 }
 0x547   : > { %v2469_v2 = vpop.f32.mrf.mxu1 }
 0x548   : > { %v2537_v60 = vpack.c.bf16 %v2469_v2, %v2466_v6  ;;  %v2785_v6 = vld [vmem:[#allocation2 + $0x78] sm:$0xff] }
 0x549   : > { %v3861_v44 = vpop.f32.mrf.mxu1 }
 0x54a   : > { %3891 = vmatprep.mubr.msk.bf16.mxu0 %vm1660_vm0, %v2537_v60  ;;  %v2783_v60 = vld [vmem:[#allocation2 + $0xf0] sm:$0xff] }
 0x54b   : > { %v2482_v47 = vpop.f32.mrf.mxu1  ;;  %3892 = vmatmul.mubr.msk.bf16.gmra.mxu0 %vm1660_vm0, %v2538_v36 }
 0x54d   : > { %v3862_v4 = vpop.f32.mrf.mxu1 }
 0x54e   : > { %v2540_v32 = vpack.c.bf16 %v3862_v4, %v3861_v44 }
 0x54f   : > { %v2485_v61 = vpop.f32.mrf.mxu1 }
 0x550   : > { %v2539_v58 = vpack.c.bf16 %v2485_v61, %v2482_v47  ;;  %v2788_v47 = vld [vmem:[#allocation2 + $0x40] sm:$0xff] }
 0x551   : > { %v3865_v19 = vpop.f32.mrf.mxu1 }
 0x552   : > { %3895 = vmatprep.mubr.msk.bf16.mxu0 %vm1660_vm0, %v2539_v58  ;;  %v2786_v58 = vld [vmem:[#allocation2 + $0x38] sm:$0xff] }
 0x553   : > { %v2498_v46 = vpop.f32.mrf.mxu1  ;;  %3896 = vmatmul.mubr.msk.bf16.gmra.mxu0 %vm1660_vm0, %v2540_v32 }
 0x555   : > { %v3866_v30 = vpop.f32.mrf.mxu1 }
 0x556   : > { %v2542_v54 = vpack.c.bf16 %v3866_v30, %v3865_v19 }
 0x557   : > { %v2501_v31 = vpop.f32.mrf.mxu1 }
 0x558   : > { %v2541_v25 = vpack.c.bf16 %v2501_v31, %v2498_v46  ;;  %v2789_v46 = vld [vmem:[#allocation2 + $0xc8] sm:$0xff] }
 0x559   : > { %v3869_v24 = vpop.f32.mrf.mxu1 }
 0x55a   : > { %3899 = vmatprep.mubr.msk.bf16.mxu0 %vm1660_vm0, %v2541_v25  ;;  %v2787_v25 = vld [vmem:[#allocation2 + $0x58] sm:$0xff] }
 0x55b   : > { %v2514_v8 = vpop.f32.mrf.mxu1  ;;  %3900 = vmatmul.mubr.msk.bf16.gmra.mxu0 %vm1660_vm0, %v2542_v54 }
 0x55d   : > { %v3870_v16 = vpop.f32.mrf.mxu1 }
 0x55e   : > { %v2544_v50 = vpack.c.bf16 %v3870_v16, %v3869_v24 }
 0x55f   : > { %v2517_v28 = vpop.f32.mrf.mxu1 }
 0x560   : > { %v2543_v41 = vpack.c.bf16 %v2517_v28, %v2514_v8  ;;  %v2792_v8 = vld [vmem:[#allocation2 + $0x70] sm:$0xff] }
 0x562   : > { %3903 = vmatprep.mubr.msk.bf16.mxu0 %vm1660_vm0, %v2543_v41  ;;  %v2790_v41 = vld [vmem:[#allocation2 + $0xe0] sm:$0xff] }
 0x563   : > { %3904 = vmatmul.mubr.msk.bf16.gmra.mxu0 %vm1660_vm0, %v2544_v50 }
 0x5ea   : > { %v3877_v15 = vpop.f32.mrf.mxu0 }
 0x5eb   : > { %v2804_v13 = vadd.f32 %v3877_v15, %v2772_v45  ;;  %v2793_v15 = vld [vmem:[#allocation2 + $0xc0] sm:$0xff] }
 0x5ec   : > { %v2643_v21 = vpop.f32.mrf.mxu0 }
 0x5ed   : > { %2836 = vst [vmem:[#allocation2 + $0xd8] sm:$0xff] %v2804_v13  ;;  %v2802_v37 = vadd.f32 %v2770_v10, %v2643_v21  ;;  %v2791_v21 = vld [vmem:[#allocation2 + $0x90] sm:$0xff] }
 0x5ee   : > { %v3878_v38 = vpop.f32.mrf.mxu0 }
 0x5ef   : > { %2834 = vst [vmem:[#allocation2 + $0xb0] sm:$0xff] %v2802_v37  ;;  %v2805_v20 = vadd.f32 %v3878_v38, %v2773_v48  ;;  %v2796_v38 = vld [vmem:[#allocation2 + $0x10] sm:$0xff] }
 0x5f0   : > { %v2646_v0 = vpop.f32.mrf.mxu0 }
 0x5f1   : > { %2837 = vst [vmem:[#allocation2 + $0x18] sm:$0xff] %v2805_v20  ;;  %v2803_v52 = vadd.f32 %v2771_v17, %v2646_v0  ;;  %v2794_v0 = vld [vmem:[#allocation2 + $0xa8] sm:$0xff] }
 0x5f3   : > { %2835 = vst [vmem:[#allocation2] sm:$0xff] %v2803_v52  ;;  %v3881_v18 = vpop.f32.mrf.mxu0 }
 0x5f4   : > { %v2808_v63 = vadd.f32 %v3881_v18, %v2776_v29  ;;  %v2797_v18 = vld [vmem:[#allocation2 + $0x28] sm:$0xff] }
 0x5f5   : > { %v2659_v53 = vpop.f32.mrf.mxu0 }
 0x5f6   : > { %2840 = vst [vmem:[#allocation2 + $0x30] sm:$0xff] %v2808_v63  ;;  %v2806_v59 = vadd.f32 %v2774_v42, %v2659_v53  ;;  %v2795_v53 = vld [vmem:[#allocation2 + $0xd0] sm:$0xff] }
 0x5f7   : > { %v3882_v1 = vpop.f32.mrf.mxu0 }
 0x5f8   : > { %2838 = vst [vmem:[#allocation2 + $0x50] sm:$0xff] %v2806_v59  ;;  %v2809_v22 = vadd.f32 %v3882_v1, %v2777_v40  ;;  %v2800_v1 = vld [vmem:[#allocation2 + $0x20] sm:$0xff] }
 0x5f9   : > { %v2662_v56 = vpop.f32.mrf.mxu0 }
 0x5fa   : > { %2841 = vst [vmem:[#allocation2 + $0x48] sm:$0xff] %v2809_v22  ;;  %v2807_v51 = vadd.f32 %v2775_v57, %v2662_v56  ;;  %v2798_v56 = vld [vmem:[#allocation2 + $0xa0] sm:$0xff] }
 0x5fb   : > { %v3885_v23 = vpop.f32.mrf.mxu0 }
 0x5fc   : > { %2839 = vst [vmem:[#allocation2 + $0x68] sm:$0xff] %v2807_v51  ;;  %v2812_v12 = vadd.f32 %v3885_v23, %v2780_v14  ;;  %v2801_v23 = vld [vmem:[#allocation2 + $0x98] sm:$0xff] }
 0x5fd   : > { %v2675_v9 = vpop.f32.mrf.mxu0 }
 0x5fe   : > { %2844 = vst [vmem:[#allocation2 + $0xe8] sm:$0xff] %v2812_v12  ;;  %v2810_v27 = vadd.f32 %v2778_v55, %v2675_v9  ;;  %v2799_v9 = vld [vmem:[#allocation2 + $0xf8] sm:$0xff] }
 0x5ff   : > { %v3886_v43 = vpop.f32.mrf.mxu0 }
 0x600   : > { %2842 = vst [vmem:[#allocation2 + $0x80] sm:$0xff] %v2810_v27  ;;  %v2813_v34 = vadd.f32 %v3886_v43, %v2781_v26 }
 0x601   : > { %v2678_v7 = vpop.f32.mrf.mxu0 }
 0x602   : > { %2845 = vst [vmem:[#allocation2 + $0xb8] sm:$0xff] %v2813_v34  ;;  %v2811_v35 = vadd.f32 %v2779_v39, %v2678_v7 }
 0x603   : > { %v3889_v33 = vpop.f32.mrf.mxu0 }
 0x604   : > { %2843 = vst [vmem:[#allocation2 + $0x88] sm:$0xff] %v2811_v35  ;;  %v2816_v5 = vadd.f32 %v3889_v33, %v2784_v62 }
 0x605   : > { %v2691_v11 = vpop.f32.mrf.mxu0 }
 0x606   : > { %2848 = vst [vmem:[#allocation2 + $0x8] sm:$0xff] %v2816_v5  ;;  %v2814_v3 = vadd.f32 %v2782_v49, %v2691_v11 }
 0x607   : > { %v3890_v2 = vpop.f32.mrf.mxu0 }
 0x608   : > { %2846 = vst [vmem:[#allocation2 + $0x60] sm:$0xff] %v2814_v3  ;;  %v2817_v36 = vadd.f32 %v3890_v2, %v2785_v6 }
 0x609   : > { %v2694_v44 = vpop.f32.mrf.mxu0 }
 0x60a   : > { %2849 = vst [vmem:[#allocation2 + $0x78] sm:$0xff] %v2817_v36  ;;  %v2815_v4 = vadd.f32 %v2783_v60, %v2694_v44 }
 0x60b   : > { %v3893_v61 = vpop.f32.mrf.mxu0 }
 0x60c   : > { %2847 = vst [vmem:[#allocation2 + $0xf0] sm:$0xff] %v2815_v4  ;;  %v2820_v32 = vadd.f32 %v3893_v61, %v2788_v47 }
 0x60d   : > { %v2707_v19 = vpop.f32.mrf.mxu0 }
 0x60e   : > { %2852 = vst [vmem:[#allocation2 + $0x40] sm:$0xff] %v2820_v32  ;;  %v2818_v30 = vadd.f32 %v2786_v58, %v2707_v19 }
 0x60f   : > { %v3894_v31 = vpop.f32.mrf.mxu0 }
 0x610   : > { %2850 = vst [vmem:[#allocation2 + $0x38] sm:$0xff] %v2818_v30  ;;  %v2821_v54 = vadd.f32 %v3894_v31, %v2789_v46 }
 0x611   : > { %v2710_v24 = vpop.f32.mrf.mxu0 }
 0x612   : > { %2853 = vst [vmem:[#allocation2 + $0xc8] sm:$0xff] %v2821_v54  ;;  %v2819_v16 = vadd.f32 %v2787_v25, %v2710_v24 }
 0x613   : > { %v3897_v28 = vpop.f32.mrf.mxu0 }
 0x614   : > { %2851 = vst [vmem:[#allocation2 + $0x58] sm:$0xff] %v2819_v16  ;;  %v2824_v50 = vadd.f32 %v3897_v28, %v2792_v8 }
 0x615   : > { %v2723_v45 = vpop.f32.mrf.mxu0 }
 0x616   : > { %2856 = vst [vmem:[#allocation2 + $0x70] sm:$0xff] %v2824_v50  ;;  %v2822_v10 = vadd.f32 %v2790_v41, %v2723_v45 }
 0x617   : > { %v3898_v13 = vpop.f32.mrf.mxu0 }
 0x618   : > { %2854 = vst [vmem:[#allocation2 + $0xe0] sm:$0xff] %v2822_v10  ;;  %v2825_v48 = vadd.f32 %v3898_v13, %v2793_v15 }
 0x619   : > { %v2726_v37 = vpop.f32.mrf.mxu0 }
 0x61a   : > { %2857 = vst [vmem:[#allocation2 + $0xc0] sm:$0xff] %v2825_v48  ;;  %v2823_v17 = vadd.f32 %v2791_v21, %v2726_v37 }
 0x61b   : > { %v3901_v20 = vpop.f32.mrf.mxu0 }
 0x61c   : > { %2855 = vst [vmem:[#allocation2 + $0x90] sm:$0xff] %v2823_v17  ;;  %v2828_v52 = vadd.f32 %v3901_v20, %v2796_v38 }
 0x61d   : > { %v2739_v29 = vpop.f32.mrf.mxu0 }
 0x61e   : > { %2860 = vst [vmem:[#allocation2 + $0x10] sm:$0xff] %v2828_v52  ;;  %v2826_v42 = vadd.f32 %v2794_v0, %v2739_v29 }
 0x61f   : > { %v3902_v63 = vpop.f32.mrf.mxu0 }
 0x620   : > { %2858 = vst [vmem:[#allocation2 + $0xa8] sm:$0xff] %v2826_v42  ;;  %v2829_v40 = vadd.f32 %v3902_v63, %v2797_v18 }
 0x621   : > { %v2742_v59 = vpop.f32.mrf.mxu0 }
 0x622   : > { %2861 = vst [vmem:[#allocation2 + $0x28] sm:$0xff] %v2829_v40  ;;  %v2827_v57 = vadd.f32 %v2795_v53, %v2742_v59 }
 0x623   : > { %v3905_v22 = vpop.f32.mrf.mxu0 }
 0x624   : > { %2859 = vst [vmem:[#allocation2 + $0xd0] sm:$0xff] %v2827_v57  ;;  %v2832_v14 = vadd.f32 %v3905_v22, %v2800_v1 }
 0x625   : > { %v2755_v51 = vpop.f32.mrf.mxu0 }
 0x626   : > { %2864 = vst [vmem:[#allocation2 + $0x20] sm:$0xff] %v2832_v14  ;;  %v2830_v55 = vadd.f32 %v2798_v56, %v2755_v51 }
 0x627   : > { %v3906_v12 = vpop.f32.mrf.mxu0 }
 0x628   : > { %2862 = vst [vmem:[#allocation2 + $0xa0] sm:$0xff] %v2830_v55  ;;  %v2833_v26 = vadd.f32 %v3906_v12, %v2801_v23  ;;  %2869 = sbr.rel (%p3419_p4) target bundleno = 1600 (0x640), region = 104 }
 0x629   : > { %v2758_v27 = vpop.f32.mrf.mxu0 }
 0x62a   : > { %2865 = vst [vmem:[#allocation2 + $0x98] sm:$0xff] %v2833_v26  ;;  %v2831_v43 = vadd.f32 %v2799_v9, %v2758_v27 }
 0x62c   : > { %2863 = vst [vmem:[#allocation2 + $0xf8] sm:$0xff] %v2831_v43 }
 0x62d   : > { %v2870_v39 = vld [vmem:[#allocation2 + $0xb0] sm:$0xff]  ;;  %v5979_v34 = vld [vmem:[#allocation15] ss:$0 sm:$0xff]  ;;  %v2872_v33 = vld [vmem:[#allocation2 + $0xd8] sm:$0xff] }
 0x62e   : > { %v2871_v7 = vld [vmem:[#allocation2] sm:$0xff]  ;;  %v2909_v62 = vadd.f32 %v5979_v34, %v2870_v39  ;;  %v2873_v49 = vld [vmem:[#allocation2 + $0x18] sm:$0xff]  ;;  %v2874_v5 = vld [vmem:[#allocation2 + $0x50] sm:$0xff]  ;;  %v2911_v11 = vadd.f32 %v5979_v34, %v2872_v33 }
 0x62f   : > { %v2910_v35 = vadd.f32 %v5979_v34, %v2871_v7  ;;  %v2912_v6 = vadd.f32 %v5979_v34, %v2873_v49  ;;  %v2913_v3 = vadd.f32 %v5979_v34, %v2874_v5  ;;  %v2875_v2 = vld [vmem:[#allocation2 + $0x68] sm:$0xff]  ;;  %v2876_v60 = vld [vmem:[#allocation2 + $0x30] sm:$0xff]  ;;  %v2878_v61 = vld [vmem:[#allocation2 + $0x80] sm:$0xff] }
 0x630   : > { %v2877_v36 = vld [vmem:[#allocation2 + $0x48] sm:$0xff]  ;;  %2941 = vst [vmem:[%s5171_s6] sm:$0xff] %v2909_v62  ;;  %v2914_v44 = vadd.f32 %v5979_v34, %v2875_v2  ;;  %v2915_v47 = vadd.f32 %v5979_v34, %v2876_v60  ;;  %2943 = vst [vmem:[%s5171_s6 + $0x10] sm:$0xff] %v2911_v11  ;;  %v2917_v19 = vadd.f32 %v5979_v34, %v2878_v61  ;;  %v2881_v31 = vld [vmem:[#allocation2 + $0xb8] sm:$0xff] }
 0x631   : > { %2942 = vst [vmem:[%s5171_s6 + $0x8] sm:$0xff] %v2910_v35  ;;  %v2916_v4 = vadd.f32 %v5979_v34, %v2877_v36  ;;  %v2879_v58 = vld [vmem:[#allocation2 + $0x88] sm:$0xff]  ;;  %2944 = vst [vmem:[%s5171_s6 + $0x18] sm:$0xff] %v2912_v6  ;;  %v2882_v25 = vld [vmem:[#allocation2 + $0x60] sm:$0xff]  ;;  %v2920_v24 = vadd.f32 %v5979_v34, %v2881_v31 }
 0x632   : > { %v2880_v32 = vld [vmem:[#allocation2 + $0xe8] sm:$0xff]  ;;  %2945 = vst [vmem:[%s5171_s6 + $0x20] sm:$0xff] %v2913_v3  ;;  %v2918_v46 = vadd.f32 %v5979_v34, %v2879_v58  ;;  %v2883_v54 = vld [vmem:[#allocation2 + $0xf0] sm:$0xff]  ;;  %2946 = vst [vmem:[%s5171_s6 + $0x28] sm:$0xff] %v2914_v44  ;;  %v2921_v8 = vadd.f32 %v5979_v34, %v2882_v25 }
 0x633   : > { %v2919_v30 = vadd.f32 %v5979_v34, %v2880_v32  ;;  %2947 = vst [vmem:[%s5171_s6 + $0x30] sm:$0xff] %v2915_v47  ;;  %2948 = vst [vmem:[%s5171_s6 + $0x38] sm:$0xff] %v2916_v4  ;;  %v2922_v16 = vadd.f32 %v5979_v34, %v2883_v54  ;;  %v2884_v28 = vld [vmem:[#allocation2 + $0x8] sm:$0xff]  ;;  %v2885_v41 = vld [vmem:[#allocation2 + $0x78] sm:$0xff] }
 0x634   : > { %v2886_v50 = vld [vmem:[#allocation2 + $0x38] sm:$0xff]  ;;  %2949 = vst [vmem:[%s5171_s6 + $0x40] sm:$0xff] %v2917_v19  ;;  %2950 = vst [vmem:[%s5171_s6 + $0x48] sm:$0xff] %v2918_v46  ;;  %v2923_v45 = vadd.f32 %v5979_v34, %v2884_v28  ;;  %v2924_v15 = vadd.f32 %v5979_v34, %v2885_v41  ;;  %v2888_v21 = vld [vmem:[#allocation2 + $0x40] sm:$0xff] }
 0x635   : > { %2951 = vst [vmem:[%s5171_s6 + $0x50] sm:$0xff] %v2919_v30  ;;  %v2925_v10 = vadd.f32 %v5979_v34, %v2886_v50  ;;  %v2887_v13 = vld [vmem:[#allocation2 + $0x58] sm:$0xff]  ;;  %v2889_v48 = vld [vmem:[#allocation2 + $0xc8] sm:$0xff]  ;;  %2952 = vst [vmem:[%s5171_s6 + $0x58] sm:$0xff] %v2920_v24  ;;  %v2927_v38 = vadd.f32 %v5979_v34, %v2888_v21 }
 0x636   : > { %2953 = vst [vmem:[%s5171_s6 + $0x60] sm:$0xff] %v2921_v8  ;;  %2954 = vst [vmem:[%s5171_s6 + $0x68] sm:$0xff] %v2922_v16  ;;  %v2926_v37 = vadd.f32 %v5979_v34, %v2887_v13  ;;  %v2928_v17 = vadd.f32 %v5979_v34, %v2889_v48  ;;  %v2890_v20 = vld [vmem:[#allocation2 + $0xe0] sm:$0xff]  ;;  %v2891_v0 = vld [vmem:[#allocation2 + $0x90] sm:$0xff] }
 0x637   : > { %v2892_v52 = vld [vmem:[#allocation2 + $0x70] sm:$0xff]  ;;  %2955 = vst [vmem:[%s5171_s6 + $0x70] sm:$0xff] %v2923_v45  ;;  %2956 = vst [vmem:[%s5171_s6 + $0x78] sm:$0xff] %v2924_v15  ;;  %v2929_v29 = vadd.f32 %v5979_v34, %v2890_v20  ;;  %v2930_v18 = vadd.f32 %v5979_v34, %v2891_v0  ;;  %v2893_v63 = vld [vmem:[#allocation2 + $0xc0] sm:$0xff] }
 0x638   : > { %2957 = vst [vmem:[%s5171_s6 + $0x80] sm:$0xff] %v2925_v10  ;;  %v2931_v42 = vadd.f32 %v5979_v34, %v2892_v52  ;;  %v2894_v53 = vld [vmem:[#allocation2 + $0xa8] sm:$0xff]  ;;  %v2895_v40 = vld [vmem:[#allocation2 + $0xd0] sm:$0xff]  ;;  %2958 = vst [vmem:[%s5171_s6 + $0x88] sm:$0xff] %v2926_v37  ;;  %v2932_v59 = vadd.f32 %v5979_v34, %v2893_v63 }
 0x639   : > { %2959 = vst [vmem:[%s5171_s6 + $0x90] sm:$0xff] %v2927_v38  ;;  %2960 = vst [vmem:[%s5171_s6 + $0x98] sm:$0xff] %v2928_v17  ;;  %v2933_v1 = vadd.f32 %v5979_v34, %v2894_v53  ;;  %v2934_v57 = vadd.f32 %v5979_v34, %v2895_v40  ;;  %v2896_v22 = vld [vmem:[#allocation2 + $0x10] sm:$0xff]  ;;  %v2897_v56 = vld [vmem:[#allocation2 + $0x28] sm:$0xff] }
 0x63a   : > { %v2898_v14 = vld [vmem:[#allocation2 + $0xa0] sm:$0xff]  ;;  %2961 = vst [vmem:[%s5171_s6 + $0xa0] sm:$0xff] %v2929_v29  ;;  %2962 = vst [vmem:[%s5171_s6 + $0xa8] sm:$0xff] %v2930_v18  ;;  %v2935_v51 = vadd.f32 %v5979_v34, %v2896_v22  ;;  %v2936_v23 = vadd.f32 %v5979_v34, %v2897_v56  ;;  %v2899_v12 = vld [vmem:[#allocation2 + $0xf8] sm:$0xff] }
 0x63b   : > { %2963 = vst [vmem:[%s5171_s6 + $0xb0] sm:$0xff] %v2931_v42  ;;  %v2937_v55 = vadd.f32 %v5979_v34, %v2898_v14  ;;  %v2900_v9 = vld [vmem:[#allocation2 + $0x20] sm:$0xff]  ;;  %v2901_v26 = vld [vmem:[#allocation2 + $0x98] sm:$0xff]  ;;  %2964 = vst [vmem:[%s5171_s6 + $0xb8] sm:$0xff] %v2932_v59  ;;  %v2938_v27 = vadd.f32 %v5979_v34, %v2899_v12 }
 0x63c   : > { %2965 = vst [vmem:[%s5171_s6 + $0xc0] sm:$0xff] %v2933_v1  ;;  %2966 = vst [vmem:[%s5171_s6 + $0xc8] sm:$0xff] %v2934_v57  ;;  %v2939_v43 = vadd.f32 %v5979_v34, %v2900_v9  ;;  %v2940_v39 = vadd.f32 %v5979_v34, %v2901_v26 }
 0x63d   : > { %2967 = vst [vmem:[%s5171_s6 + $0xd0] sm:$0xff] %v2935_v51  ;;  %2968 = vst [vmem:[%s5171_s6 + $0xd8] sm:$0xff] %v2936_v23 }
 0x63e   : > { %2969 = vst [vmem:[%s5171_s6 + $0xe0] sm:$0xff] %v2937_v55  ;;  %2970 = vst [vmem:[%s5171_s6 + $0xe8] sm:$0xff] %v2938_v27 }
 0x63f   : > { %2971 = vst [vmem:[%s5171_s6 + $0xf0] sm:$0xff] %v2939_v43  ;;  %2972 = vst [vmem:[%s5171_s6 + $0xf8] sm:$0xff] %v2940_v39 }
 0x640 PF: > { %s6324_s19 = sld [smem:[#allocation35_spill]]  ;;  %s2993_s0 = sshll.u32 %s5171_s6, 4  ;;  %s6052_s0 = int_to_ptr.vmem [resolvable:$true] %s2993_s0 }
 0x641   : > { %s6325_s11 = sld [smem:[#allocation40_spill]]  ;;  %s2974_s5 = scalar_lea.sflag [#allocation5], %s5105_s24 }
 0x642   : > { %s6326_s4 = sld [smem:[#allocation65_spill]]  ;;  %s4508_s16 = scalar_lea.vmem %s6052_s0, 4096 }
 0x643   : > { %p4509_p9 = scmp.ne.s32.totalorder %s6052_s0, %s4508_s16  ;;  %s4687_s30 = smov [#allocation17]  }
 0x644   : > { %s4512_s13 = sshll.u32 %s4687_s30, 4  ;;  %s4513_s13 = int_to_ptr.vmem [resolvable:$false] %s4512_s13 }
 0x645   : > { %s4514_s6 = scalar_lea.vmem %s4513_s13, 8192  ;;  %p4515_p3 = scmp.lt.s32.totalorder %s6052_s0, %s4513_s13 }
 0x646   : > { %s3443_s29 = sshll.u32 %s6324_s19, 12  ;;  %p4516_p6 = scmp.lt.s32.totalorder %s4514_s6, %s4508_s16 }
 0x647   : > { %p6327_p5 = scmp.ne.s32.totalorder %s6325_s11, 0 }
 0x648   : > { %s6050_s23 = scalar_lea.hbm %s6326_s4, %s3443_s29  ;;  %p4517_p7 = por %p4516_p6, %p4515_p3 }
 0x649   : > { %p4510_p13 = pnand %p4509_p9, %p6327_p5 }
 0x64b   : > { %p4511_p1 = pneg %p4510_p13 }
 0x64d   : > { %p4518_p10 = pnand %p4517_p7, %p4511_p1 }
 0x64f   : > { %4521 = shalt.err (!%p4518_p10)
}
 0x650   : > { %s4522_s26 = scalar_lea.hbm %s6050_s23, 4096  ;;  %s4526_s10 = scalar_lea.hbm %s6326_s4, 16384 }
 0x651   : > { %p4523_p2 = scmp.ne.s32.totalorder %s6050_s23, %s4522_s26  ;;  %p4527_p0 = scmp.lt.s32.totalorder %s6050_s23, %s6326_s4 }
 0x652   : > { %p4528_p4 = scmp.lt.s32.totalorder %s4526_s10, %s4522_s26 }
 0x653   : > { %p4524_p8 = pnand %p4523_p2, %p6327_p5 }
 0x654   : > { %p4529_p9 = por %p4528_p4, %p4527_p0 }
 0x655   : > { %p4525_p11 = pneg %p4524_p8 }
 0x657   : > { %p4530_p13 = pnand %p4529_p9, %p4525_p11 }
 0x659   : > { %4533 = shalt.err (!%p4530_p13)
}
 0x65a   : > { %s4688_s9 = smov 128   ;;  %s4689_s7 = smov 8  }
 0x65b   : > { %3957 = dma.vmem_to_hbm [thread:$0]  (%p6327_p5), %s6052_s0, 4096, %s6050_s23, %s2974_s5, %s4688_s9, %s4688_s9, %s4689_s7  }
 0x65c   : > { %s6328_s17 = sand.u32 1, %s4624_s22  }
 0x65d   : > { %s2979_s15 = scalar_lea.sflag [#allocation19], %s6328_s17 }
 0x65e   : > { %s6329_s12 = sld [smem:[#allocation34_spill]]  ;;  %s3444_s3 = sshll.u32 %s6324_s19, 7 }
 0x65f   : > { %s3022_s30 = sshll.u32 %s5173_s8, 4  ;;  %s6331_s0 = sld [smem:[#allocation66_spill]]  ;;  %s3023_s30 = int_to_ptr.vmem [resolvable:$true] %s3022_s30 }
 0x660   : > { %s4690_s5 = smov 2048   ;;  %s4691_s6 = smov 8192  }
 0x661   : > { %3958 = sst [smem:[#allocation21]] (%p4995_p12), %s4690_s5  ;;  %s4692_s26 = smov 16  }
 0x662   : > { %3959 = sst [smem:[#allocation21 + $0x1]] (%p4995_p12), %s4691_s6  ;;  %s4693_s19 = smov 128  }
 0x663   : > { %3960 = sst [smem:[#allocation21 + $0x2]] (%p4995_p12), %s4692_s26  ;;  %s4694_s8 = smov 8  }
 0x664   : > { %s3427_s1 = sshll.u32 %s6329_s12, 4  ;;  %3961 = sst [smem:[#allocation21 + $0x3]] (%p4995_p12), %s4693_s19 }
 0x665   : > { %s3009_s16 = sadd.s32 %s3444_s3, %s3427_s1  ;;  %3962 = sst [smem:[#allocation21 + $0x4]] (%p4995_p12), %s4693_s19 }
 0x666   : > { %s3429_s13 = sshll.u32 %s3009_s16, 7  ;;  %3963 = sst [smem:[#allocation21 + $0x5]] (%p4995_p12), %s4694_s8 }
 0x667   : > { %s3011_s23 = scalar_lea.hbm %s6331_s0, %s3429_s13  ;;  %s4695_s18 = smov 131072  }
 0x668   : > { %s4696_s14 = smov 0  }
 0x669   : > { %3964 = dma.general (%p4995_p12), %s3023_s30, 4096, %s3011_s23, %s2979_s15, %s4695_s18, [#allocation21], %s4696_s14, 0  }
 0x66a PF: > { %s6332_s10 = sld [smem:[#allocation38_spill]] }
 0x66b   : > { %s6333_s27 = sld [smem:[#allocation32_spill]] }
 0x66c   : > { %s6334_s21 = sld [smem:[#allocation46_spill]] }
 0x670   : > { %p4003_p5 = scmp.ge.s32.totalorder %s6332_s10, 2 }
 0x671   : > { %s3050_s9 = sand.u32 1, %s6333_s27  }
 0x672   : > { %p6335_p1 = scmp.ne.s32.totalorder %s6334_s21, 0  ;;  %s3051_s7 = scalar_lea.sflag [#allocation5], %s3050_s9 }
 0x674   : > { %p3994_p3 = pnand %p4003_p5, %p6335_p1 }
 0x676   : > { %p3995_p6 = pneg %p3994_p3 }
 0x678   : > { %4611 = dma.done.wait (%p3995_p6), %s3051_s7, 4096  }
 0x679   : > { %4613 = vsyncadd (%p3995_p6), %s3051_s7, 4294963200  ;;  %s6336_s17 = sld [smem:[#allocation29_spill]] }
 0x67a   : > { %s6337_s12 = sld [smem:[#allocation48_spill]] }
 0x67f   : > { %s3059_s1 = sand.u32 1, %s6336_s17  }
 0x680   : > { %p6338_p7 = scmp.ne.s32.totalorder %s6337_s12, 0  ;;  %s3060_s29 = scalar_lea.sflag [#allocation19], %s3059_s1 }
 0x682   : > { %p3997_p10 = pnand %p4003_p5, %p6338_p7 }
 0x684   : > { %p3998_p2 = pneg %p3997_p10 }
 0x686   : > { %4615 = dma.done.wait (%p3998_p2), %s3060_s29, 4096  }
 0x687   : > { %4617 = vsyncadd (%p3998_p2), %s3060_s29, 4294963200  ;;  %s42_s16 = sadd.s32 1, %s6332_s10   ;;  %s6340_s3 = sld [smem:[#allocation30_spill]] }
 0x688   : > { %p6107_p12 = scmp.ge.s32.totalorder %s42_s16, 18   ;;  %s6341_s23 = sld [smem:[#allocation47_spill]] }
 0x689   : > { %s6342_s30 = sld [smem:[#allocation31_spill]]  ;;  %s6351_s21 = smov %s4624_s22 }
 0x68a   : > { %s6343_s26 = sld [smem:[#allocation44_spill]]  ;;  %s6353_s24 = smov %s4636_s25 }
 0x68b   : > { %s6344_s13 = sld [smem:[#allocation33_spill]]  ;;  %s6355_s27 = smov %s4648_s28 }
 0x68c   : > { %s6345_s29 = sld [smem:[#allocation45_spill]] }
 0x68d   : > { %s6346_s11 = sld [smem:[#allocation36_spill]]  ;;  %s6352_s22 = smov %s6340_s3 }
 0x68e   : > { %s6347_s0 = sld [smem:[#allocation37_spill]] }
 0x68f   : > { %s6348_s14 = sld [smem:[#allocation42_spill]]  ;;  %s6354_s25 = smov %s6342_s30 }
 0x690   : > { %s6349_s5 = sld [smem:[#allocation43_spill]] }
 0x691   : > { %s6356_s28 = smov %s6344_s13 }
 0x692   :  { %41 = sbr.rel (!%p6107_p12) target bundleno = 33 (0x21), region = 224 }
 0x693   : > { %s6357_s30 = smov %s6346_s11 }
 0x694   : > { %s6358_s13 = smov %s6347_s0 }
 0x696   : > { %s6359_s15 = smov %s6349_s5 }
 0x697   :  { %3065 = vsyncpa [#allocation4], 1 }
 0x698   :  { %3067 = vsyncpa [#allocation4 + $0x1], 1 }
 0x699   :  { %3068 = vsyncpa [#allocation7], 1 }
 0x69a   :  { %3070 = vsyncpa [#allocation7 + $0x1], 1 }
 0x69b   :  { %3071 = vsyncpa [#allocation10], 1 }
 0x69c   :  { %3073 = vsyncpa [#allocation10 + $0x1], 1 }
 0x69d   :  { %3074 = vsyncpa [#allocation13], 1 }
 0x69e   :  { %3076 = vsyncpa [#allocation13 + $0x1], 1 }
 0x69f   :  { %3077 = vsyncpa [#allocation16], 1 }
 0x6a0   :  { %3078 = vsyncpa [#allocation5], 1 }
 0x6a1   :  { %3080 = vsyncpa [#allocation5 + $0x1], 1 }
 0x6a2   :  { %3081 = vsyncpa [#allocation19], 1 }
 0x6a3   :  { %3083 = vsyncpa [#allocation19 + $0x1], 1 }

</bundles_post_ra>
